<compile_context>
chip_gen: v6e
topology: v6e:2x2x1
jax: 0.10.0
libtpu: 0.0.40
codegen_flags: <defaults>
</compile_context>

<pallas_src>
import functools

import numpy as np
import jax
import jax.numpy as jnp
from jax import lax
from jax.experimental import pallas as pl
from jax.experimental.pallas import tpu as pltpu


# ---------------------------------------------------------------------------
# Kernels
# ---------------------------------------------------------------------------

def crpb_mlp_kernel(table_ref, w1_ref, b1_ref, w2_ref, tab_ref):
    """One-shot prologue: rpe_mlp over the whole coords table (grid-invariant).

    table_ref: (2, Tp)   f32  coords table, lane-major (Tp on lanes)
    w1_ref:    (H, 2)    f32  torch Linear layout (out_features, in_features)
    b1_ref:    (H, 1)    f32
    w2_ref:    (nh, H)   f32  torch LinearFP32 layout (no bias)
    tab_ref:   (nh, Tp)  f32  transposed bias table (lane-dense)
    """
    # Linear(2 -> H) + ReLU on the VPU: a K=2 matmul would waste the MXU.
    x0 = table_ref[0:1, :]                                    # (1, Tp)
    x1 = table_ref[1:2, :]                                    # (1, Tp)
    h = jnp.maximum(
        w1_ref[:, 0:1] * x0 + w1_ref[:, 1:2] * x1 + b1_ref[...], 0.0)  # (H, Tp)
    # LinearFP32(H -> nh, no bias), transposed so Tp stays on lanes.
    tab_ref[...] = jnp.dot(w2_ref[...], h, preferred_element_type=jnp.float32)


def crpb_gather_kernel(tab_ref, rpi_ref, out_ref, *, apply_sigmoid):
    """Gather tab[:, rpi] expressed as an on-the-fly one-hot matmul.

    tab_ref: (nh, Tp)       f32  precomputed (grid-invariant) bias table
    rpi_ref: (1, tile_nn)   i32  relative_position_index tile
    out_ref: (nh, tile_nn)  f32  lane-dense output tile
    """
    t_pad = tab_ref.shape[1]
    # Column iota; the lane broadcast is folded into the compare where Mosaic
    # allows it. Padded rows t >= T never match any index -> contribute 0.
    t_iota = lax.broadcasted_iota(jnp.int32, (t_pad, 1), 0)
    onehot = (t_iota == rpi_ref[...]).astype(jnp.float32)     # (Tp, tile_nn)
    bias = jnp.dot(tab_ref[...], onehot,
                   preferred_element_type=jnp.float32)        # (nh, tile_nn)
    if apply_sigmoid:  # rpe_output_type == 'sigmoid'
        bias = 16.0 * jax.nn.sigmoid(bias)
    out_ref[...] = bias


# ---------------------------------------------------------------------------
# Wrappers
# ---------------------------------------------------------------------------

def crpb_mlp_pallas(table_t, w1, b1, w2):
    nh = w2.shape[0]
    t_pad = table_t.shape[1]
    return pl.pallas_call(
        crpb_mlp_kernel,
        out_shape=jax.ShapeDtypeStruct((nh, t_pad), jnp.float32),
        grid_spec=pltpu.PrefetchScalarGridSpec(
            num_scalar_prefetch=0,
            grid=(1,),
            in_specs=[
                pl.BlockSpec(table_t.shape, lambda i: (0, 0)),
                pl.BlockSpec(w1.shape, lambda i: (0, 0)),
                pl.BlockSpec(b1.shape, lambda i: (0, 0)),
                pl.BlockSpec(w2.shape, lambda i: (0, 0)),
            ],
            out_specs=pl.BlockSpec((nh, t_pad), lambda i: (0, 0)),
        ),
        compiler_params=pltpu.CompilerParams(
            dimension_semantics=("arbitrary",)),
    )(table_t, w1, b1, w2)


def crpb_gather_pallas(tab_t, rpi_row, *, tile_nn, apply_sigmoid=False):
    nh, t_pad = tab_t.shape
    nn_total = rpi_row.shape[1]
    assert nn_total % tile_nn == 0, (nn_total, tile_nn)
    grid = (nn_total // tile_nn,)
    kernel = functools.partial(crpb_gather_kernel, apply_sigmoid=apply_sigmoid)
    return pl.pallas_call(
        kernel,
        out_shape=jax.ShapeDtypeStruct((nh, nn_total), jnp.float32),
        grid_spec=pltpu.PrefetchScalarGridSpec(
            num_scalar_prefetch=0,
            grid=grid,
            in_specs=[
                pl.BlockSpec((nh, t_pad), lambda i: (0, 0)),
                pl.BlockSpec((1, tile_nn), lambda i: (0, i)),
            ],
            out_specs=pl.BlockSpec((nh, tile_nn), lambda i: (0, i)),
        ),
        compiler_params=pltpu.CompilerParams(
            dimension_semantics=("parallel",),
            vmem_limit_bytes=32 * 1024 * 1024),
        cost_estimate=pl.CostEstimate(
            flops=2 * nh * t_pad * nn_total,
            transcendentals=0,
            bytes_accessed=(nn_total * 4            # rpi (int32)
                            + nh * nn_total * 4     # output
                            + nh * t_pad * 4)),     # table
    )(tab_t, rpi_row)


def crpb_forward(w1, b1, w2, table_t, rpi_row, *, window_size, num_heads,
                 tile_nn, rpe_output_type="normal"):
    Wh, Ww = window_size
    N = Wh * Ww
    # grid-invariant MLP hoisted into a one-shot prologue kernel
    tab_t = crpb_mlp_pallas(table_t, w1, b1, w2)                # (nh, Tp)
    bias_t = crpb_gather_pallas(
        tab_t, rpi_row, tile_nn=tile_nn,
        apply_sigmoid=(rpe_output_type == "sigmoid"))           # (nh, N*N)
    # already lane-dense (num_heads, N*N) -> torch's permute(2,0,1) is free
    return bias_t.reshape(num_heads, N, N)


# ---------------- compile-time constants (built once, kept resident) ---------

def build_coords_table_t(window_size, t_pad):
    """norm8_log relative coords table, transposed+padded to (2, t_pad), f32."""
    Wh, Ww = window_size
    rel_h = np.arange(-(Wh - 1), Wh, dtype=np.float32)
    rel_w = np.arange(-(Ww - 1), Ww, dtype=np.float32)
    gh, gw = np.meshgrid(rel_h, rel_w, indexing="ij")
    table = np.stack([gh, gw], axis=-1)                         # (2Wh-1, 2Ww-1, 2)
    table[..., 0] /= max(Wh - 1, 1)
    table[..., 1] /= max(Ww - 1, 1)
    table *= 8.0
    table = np.sign(table) * np.log2(np.abs(table) + 1.0) / np.log2(8.0)
    flat_t = table.reshape(-1, 2).T.astype(np.float32)          # (2, T)
    T = flat_t.shape[1]
    out = np.zeros((2, t_pad), dtype=np.float32)
    out[:, :T] = flat_t
    return jnp.asarray(out)


def build_relative_position_index(window_size):
    Wh, Ww = window_size
    ch, cw = np.meshgrid(np.arange(Wh), np.arange(Ww), indexing="ij")
    coords_flatten = np.stack([ch.reshape(-1), cw.reshape(-1)])       # (2, N)
    rel = coords_flatten[:, :, None] - coords_flatten[:, None, :]     # (2, N, N)
    rel = rel.transpose(1, 2, 0).astype(np.int64)                     # (N, N, 2)
    rel[..., 0] += Wh - 1
    rel[..., 1] += Ww - 1
    rel[..., 0] *= 2 * Ww - 1
    return rel.sum(-1)                                                # (N, N)


def num_tensorcores_per_chip():
    """Grid-sharding target: 2 tiles for the 2-TC v7x, 1 tile for v5e/v6e."""
    try:
        kind = jax.devices()[0].device_kind.lower()
    except Exception:
        return 1
    return 2 if ("v7" in kind or "tpu7" in kind) else 1


def pick_tile_nn(nn_total, t_pad, num_tc):
    """Largest lane-aligned divisor of NN that (a) gives ~one tile per TC and
    (b) keeps the one-hot intermediates (~8 B/elem over Tp x tile_nn) within
    ~10 MiB per grid step (fits default scoped VMEM on v5e/v6e/v7x)."""
    budget_bytes = 10 * 1024 * 1024
    max_tile = max(128, (budget_bytes // (t_pad * 8)) // 128 * 128)
    target = nn_total // num_tc if nn_total % num_tc == 0 else nn_total
    cap = min(target, max_tile)
    candidates = [nn_total] + [m for m in range(128, nn_total, 128)
                               if nn_total % m == 0]
    feasible = [c for c in candidates if c <= cap]
    if feasible:
        return max(feasible)
    return min(candidates)


if __name__ == "__main__":
    # small shapes consistent with the module
    window_size = (8, 8)
    num_heads = 4
    rpe_hidden_dim = 32

    Wh, Ww = window_size
    N = Wh * Ww
    NN = N * N
    T = (2 * Wh - 1) * (2 * Ww - 1)
    Tp = -(-T // 128) * 128                    # pad contraction dim to lane width
    num_tc = num_tensorcores_per_chip()
    tile_nn = pick_tile_nn(NN, Tp, num_tc)     # NN on v5e/v6e, NN/2 on v7x

    # constants built once, outside the jitted forward
    table_t = build_coords_table_t(window_size, Tp)               # (2, Tp)
    rpi = build_relative_position_index(window_size)               # (N, N)
    assert int(rpi.max()) < T                  # padded table rows never selected
    rpi_row = jnp.asarray(rpi.reshape(1, -1), dtype=jnp.int32)     # (1, NN)

    key = jax.random.PRNGKey(0)
    k1, k2, k3 = jax.random.split(key, 3)
    # torch nn.Linear layout: weight (out_features, in_features)
    w1 = jax.random.normal(k1, (rpe_hidden_dim, 2), dtype=jnp.float32) * 0.5
    b1 = jax.random.normal(k2, (rpe_hidden_dim, 1), dtype=jnp.float32) * 0.1
    w2 = jax.random.normal(k3, (num_heads, rpe_hidden_dim), dtype=jnp.float32) * 0.5

    fwd = jax.jit(functools.partial(
        crpb_forward, window_size=window_size, num_heads=num_heads,
        tile_nn=tile_nn, rpe_output_type="normal"))
    out = fwd(w1, b1, w2, table_t, rpi_row)                        # (nh, N, N)
    jax.block_until_ready(out)

    # reference check in plain JAX (direct indexing gather, f32 MLP)
    table2d = jnp.asarray(np.asarray(table_t)[:, :T].T)            # (T, 2)
    h_ref = jnp.maximum(table2d @ w1.T + b1.T, 0.0)                # (T, H)
    tab_ref = h_ref @ w2.T                                         # (T, nh)
    ref = tab_ref[rpi_row.reshape(-1)].reshape(N, N, num_heads)
    ref = jnp.transpose(ref, (2, 0, 1))                            # (nh, N, N)

    assert out.shape == (num_heads, N, N)
    assert jnp.allclose(out, ref, atol=1e-5, rtol=1e-5)

    print("KERNEL_OK")
</pallas_src>

<mosaic_0001>
module attributes {stable_mosaic.version = 11 : i64} {
  func.func @crpb_gather_kernel(%arg0: i32, %arg1: memref<4x256xf32, #tpu.memory_space<vmem>>, %arg2: memref<1x4096xi32, #tpu.memory_space<vmem>>, %arg3: memref<4x4096xf32, #tpu.memory_space<vmem>>) attributes {dimension_semantics = [#tpu.dimension_semantics<parallel>], iteration_bounds = array<i64: 1>, scalar_prefetch = 0 : i64, scratch_operands = 0 : i64, tpu.core_type = #tpu.core_type<tc>, window_params = [{pipeline_mode = #tpu.pipeline_mode<synchronous>, transform_indices = @transform_0, window_bounds = array<i64: 4, 256>}, {transform_indices = @transform_1, window_bounds = array<i64: 1, 4096>}, {transform_indices = @transform_2, window_bounds = array<i64: 4, 4096>}]} {
    %0 = tpu.iota {dimensions = array<i32: 0>} : vector<256x1xi32>
    %c0 = arith.constant 0 : index
    %c0_0 = arith.constant 0 : index
    %1 = vector.load %arg2[%c0, %c0_0] : memref<1x4096xi32, #tpu.memory_space<vmem>>, vector<1x4096xi32>
    %2 = vector.broadcast %0 : vector<256x1xi32> to vector<256x4096xi32>
    %3 = vector.broadcast %1 : vector<1x4096xi32> to vector<256x4096xi32>
    %4 = arith.cmpi eq, %2, %3 : vector<256x4096xi32>
    %5 = arith.extui %4 : vector<256x4096xi1> to vector<256x4096xi32>
    %6 = arith.sitofp %5 : vector<256x4096xi32> to vector<256x4096xf32>
    %c0_1 = arith.constant 0 : index
    %c0_2 = arith.constant 0 : index
    %7 = vector.load %arg1[%c0_1, %c0_2] : memref<4x256xf32, #tpu.memory_space<vmem>>, vector<4x256xf32>
    %cst = arith.constant dense<0.000000e+00> : vector<4x4096xf32>
    %8 = tpu.matmul %7, %6, %cst {dimension_numbers = #tpu.dot_dimension_numbers<[1], [0], [0], [1], [0, 0, 1, 1], [], []>} : vector<4x256xf32>, vector<256x4096xf32>, vector<4x4096xf32> -> vector<4x4096xf32>
    %c0_3 = arith.constant 0 : index
    %c0_4 = arith.constant 0 : index
    %9 = vector.load %arg3[%c0_3, %c0_4] : memref<4x4096xf32, #tpu.memory_space<vmem>>, vector<4x4096xf32>
    tpu.vector_store %arg3[%c0_3, %c0_4], %8 {strides = array<i32>} : memref<4x4096xf32, #tpu.memory_space<vmem>>, vector<4x4096xf32>,
    return
  }
  func.func @transform_0(%arg0: i32) -> (i32, i32) {
    %c0_i32 = arith.constant 0 : i32
    %c0_i32_0 = arith.constant 0 : i32
    %c0_i32_1 = arith.constant 0 : i32
    return %c0_i32, %c0_i32_0 : i32, i32
  }
  func.func @transform_1(%arg0: i32) -> (i32, i32) {
    %c0_i32 = arith.constant 0 : i32
    %c0_i32_0 = arith.constant 0 : i32
    return %c0_i32, %arg0 : i32, i32
  }
  func.func @transform_2(%arg0: i32) -> (i32, i32) {
    %c0_i32 = arith.constant 0 : i32
    %c0_i32_0 = arith.constant 0 : i32
    return %c0_i32, %arg0 : i32, i32
  }
}

module attributes {stable_mosaic.version = 11 : i64} {
  func.func @crpb_mlp_kernel(%arg0: i32, %arg1: memref<2x256xf32, #tpu.memory_space<vmem>>, %arg2: memref<32x2xf32, #tpu.memory_space<vmem>>, %arg3: memref<32x1xf32, #tpu.memory_space<vmem>>, %arg4: memref<4x32xf32, #tpu.memory_space<vmem>>, %arg5: memref<4x256xf32, #tpu.memory_space<vmem>>) attributes {dimension_semantics = [#tpu.dimension_semantics<arbitrary>], iteration_bounds = array<i64: 1>, scalar_prefetch = 0 : i64, scratch_operands = 0 : i64, tpu.core_type = #tpu.core_type<tc>, window_params = [{pipeline_mode = #tpu.pipeline_mode<synchronous>, transform_indices = @transform_0, window_bounds = array<i64: 2, 256>}, {pipeline_mode = #tpu.pipeline_mode<synchronous>, transform_indices = @transform_1, window_bounds = array<i64: 32, 2>}, {pipeline_mode = #tpu.pipeline_mode<synchronous>, transform_indices = @transform_2, window_bounds = array<i64: 32, 1>}, {pipeline_mode = #tpu.pipeline_mode<synchronous>, transform_indices = @transform_3, window_bounds = array<i64: 4, 32>}, {pipeline_mode = #tpu.pipeline_mode<synchronous>, transform_indices = @transform_4, window_bounds = array<i64: 4, 256>}]} {
    %c0 = arith.constant 0 : index
    %c0_0 = arith.constant 0 : index
    %0 = vector.load %arg1[%c0, %c0_0] : memref<2x256xf32, #tpu.memory_space<vmem>>, vector<1x256xf32>
    %c1 = arith.constant 1 : index
    %c0_1 = arith.constant 0 : index
    %1 = vector.load %arg1[%c1, %c0_1] : memref<2x256xf32, #tpu.memory_space<vmem>>, vector<1x256xf32>
    %c0_2 = arith.constant 0 : index
    %c0_3 = arith.constant 0 : index
    %2 = vector.load %arg2[%c0_2, %c0_3] : memref<32x2xf32, #tpu.memory_space<vmem>>, vector<32x1xf32>
    %3 = vector.broadcast %2 : vector<32x1xf32> to vector<32x256xf32>
    %4 = vector.broadcast %0 : vector<1x256xf32> to vector<32x256xf32>
    %5 = arith.mulf %3, %4 : vector<32x256xf32>
    %c0_4 = arith.constant 0 : index
    %c1_5 = arith.constant 1 : index
    %6 = vector.load %arg2[%c0_4, %c1_5] : memref<32x2xf32, #tpu.memory_space<vmem>>, vector<32x1xf32>
    %7 = vector.broadcast %6 : vector<32x1xf32> to vector<32x256xf32>
    %8 = vector.broadcast %1 : vector<1x256xf32> to vector<32x256xf32>
    %9 = arith.mulf %7, %8 : vector<32x256xf32>
    %10 = arith.addf %5, %9 : vector<32x256xf32>
    %c0_6 = arith.constant 0 : index
    %c0_7 = arith.constant 0 : index
    %11 = vector.load %arg3[%c0_6, %c0_7] : memref<32x1xf32, #tpu.memory_space<vmem>>, vector<32x1xf32>
    %12 = vector.broadcast %11 : vector<32x1xf32> to vector<32x256xf32>
    %13 = arith.addf %10, %12 : vector<32x256xf32>
    %cst = arith.constant 0.000000e+00 : f32
    %14 = vector.broadcast %cst : f32 to vector<32x256xf32>
    %15 = arith.maximumf %13, %14 : vector<32x256xf32>
    %c0_8 = arith.constant 0 : index
    %c0_9 = arith.constant 0 : index
    %16 = vector.load %arg4[%c0_8, %c0_9] : memref<4x32xf32, #tpu.memory_space<vmem>>, vector<4x32xf32>
    %cst_10 = arith.constant dense<0.000000e+00> : vector<4x256xf32>
    %17 = tpu.matmul %16, %15, %cst_10 {dimension_numbers = #tpu.dot_dimension_numbers<[1], [0], [0], [1], [0, 0, 1, 1], [], []>} : vector<4x32xf32>, vector<32x256xf32>, vector<4x256xf32> -> vector<4x256xf32>
    %c0_11 = arith.constant 0 : index
    %c0_12 = arith.constant 0 : index
    %18 = vector.load %arg5[%c0_11, %c0_12] : memref<4x256xf32, #tpu.memory_space<vmem>>, vector<4x256xf32>
    tpu.vector_store %arg5[%c0_11, %c0_12], %17 {strides = array<i32>} : memref<4x256xf32, #tpu.memory_space<vmem>>, vector<4x256xf32>,
    return
  }
  func.func @transform_0(%arg0: i32) -> (i32, i32) {
    %c0_i32 = arith.constant 0 : i32
    %c0_i32_0 = arith.constant 0 : i32
    %c0_i32_1 = arith.constant 0 : i32
    return %c0_i32, %c0_i32_0 : i32, i32
  }
  func.func @transform_1(%arg0: i32) -> (i32, i32) {
    %c0_i32 = arith.constant 0 : i32
    %c0_i32_0 = arith.constant 0 : i32
    %c0_i32_1 = arith.constant 0 : i32
    return %c0_i32, %c0_i32_0 : i32, i32
  }
  func.func @transform_2(%arg0: i32) -> (i32, i32) {
    %c0_i32 = arith.constant 0 : i32
    %c0_i32_0 = arith.constant 0 : i32
    %c0_i32_1 = arith.constant 0 : i32
    return %c0_i32, %c0_i32_0 : i32, i32
  }
  func.func @transform_3(%arg0: i32) -> (i32, i32) {
    %c0_i32 = arith.constant 0 : i32
    %c0_i32_0 = arith.constant 0 : i32
    %c0_i32_1 = arith.constant 0 : i32
    return %c0_i32, %c0_i32_0 : i32, i32
  }
  func.func @transform_4(%arg0: i32) -> (i32, i32) {
    %c0_i32 = arith.constant 0 : i32
    %c0_i32_0 = arith.constant 0 : i32
    %c0_i32_1 = arith.constant 0 : i32
    return %c0_i32, %c0_i32_0 : i32, i32
  }
}

</mosaic_0001>

<bundles_post_ra>
// kernel: crpb_forward.2
= control target key start
LH: loop header
LB: loop body
LE: loop exit
PB: predicated region body
PF: predicated region fallthrough
CT: control target
= control target key end

     0   :  { %v243_v0 = vmov 1   ;;  %v244_v1 = vmov 0   ;;  %v245_v10 = vmov 0.0   ;;  %v45_v11 = vlaneseq  ;;  %s307_s1 = inlined_call_operand.vmem [shape: f32[32,2], index: 1, kind: input, shape index: {}]   ;;  %s308_s2 = inlined_call_operand.vmem [shape: f32[32,1], index: 2, kind: input, shape index: {}]   ;;  %s309_s0 = inlined_call_operand.vmem [shape: f32[2,256], index: 0, kind: input, shape index: {}]   ;;  %s310_s3 = inlined_call_operand.vmem [shape: f32[4,32], index: 3, kind: input, shape index: {}]   ;;  %s311_s4 = inlined_call_operand.vmem [shape: f32[4,256], index: 4, kind: output, shape index: {}]  }
   0x1   :  { %236 = vset.pattern.permute.xlu0 %v243_v0  ;;  %237 = vset.pattern.permute.xlu1 %v244_v1  ;;  %v23_v2 = vld [vmem:[%s307_s1 + $0x18] sm:$0xff]  ;;  %v22_v3 = vld [vmem:[%s307_s1 + $0x10] sm:$0xff]  ;;  %v21_v4 = vld [vmem:[%s307_s1 + $0x8] sm:$0xff]  ;;  %vm147_vm0 = vcmask 261120  }
   0x2   :  { %76 = vperm.xlu0 %236, %v23_v2   ;;  %36 = vperm.xlu1 %237, %v22_v3   ;;  %v20_v5 = vld [vmem:[%s307_s1] sm:$0xff]  ;;  %v109_v6 = vld [vmem:[%s308_s2 + $0x18] sm:$0xff]  ;;  %v107_v7 = vld [vmem:[%s308_s2 + $0x8] sm:$0xff]  ;;  %v46_v12 = vshrl.u32 %v45_v11, 7 }
   0x3   :  { %v108_v8 = vld [vmem:[%s308_s2 + $0x10] sm:$0xff]  ;;  %v106_v9 = vld [vmem:[%s308_s2] sm:$0xff]  ;;  %215 = vmatprep.mubr.f32.mxu0 %v245_v10 }
   0x4   :  { %v231_v15 = vld [vmem:[%s309_s0 + $0x1] ss:$2 sm:$0x3]  ;;  %v47_v16 = vsub.s32 0, %v46_v12  ;;  %v51_v17 = vsub.s32 1, %v46_v12 }
   0x5   :  { %v17_v19 = vld [vmem:[%s309_s0] ss:$2 sm:$0x3] }
   0x6   :  { %238 = vset.pattern.permute.xlu1 %v243_v0  ;;  %68 = vperm.xlu0 %236, %v21_v4   ;;  %v83_v21 = vrot.slane %v231_v15, %v47_v16  ;;  %v87_v22 = vrot.slane %v231_v15, %v51_v17  ;;  %v48_v23 = vrot.slane %v17_v19, %v47_v16 }
   0x7   :  { %72 = vperm.xlu1 %238, %v22_v3   ;;  %v52_v24 = vrot.slane %v17_v19, %v51_v17 }
   0xa   :  { %240 = vset.pattern.permute.xlu0 %v244_v1 }
   0xb   :  { %239 = vset.pattern.permute.xlu1 %v244_v1  ;;  %41 = vperm.xlu0 %240, %v23_v2  }
   0xc   :  { %31 = vperm.xlu1 %239, %v21_v4  }
   0xf   :  { %26 = vperm.xlu0 %240, %v20_v5  }
  0x10   :  { %127 = vperm.xlu1 %239, %v109_v6  }
  0x13   :  { %117 = vperm.xlu0 %240, %v107_v7  }
  0x14   :  { %241 = vset.pattern.permute.xlu1 %v243_v0 }
  0x15   :  { %64 = vperm.xlu1 %241, %v20_v5  }
  0x19   :  { %242 = vset.pattern.permute.xlu1 %v244_v1 }
  0x1a   :  { %122 = vperm.xlu1 %242, %v108_v8  }
  0x1e   :  { %112 = vperm.xlu1 %242, %v106_v9   ;;  %v146_v9 = vld [vmem:[%s310_s3] sm:$0xf] }
  0x7d   :  { %v37_v13 = vpop.permute.xlu1 %36  ;;  %v77_v14 = vpop.permute.xlu0 %76 }
  0x7e   :  { %v96_v25 = vmul.f32 %v83_v21, %v77_v14  ;;  %v97_v26 = vmul.f32 %v87_v22, %v77_v14  ;;  %v59_v44 = vmul.f32 %v48_v23, %v37_v13  ;;  %v60_v45 = vmul.f32 %v52_v24, %v37_v13 }
  0x81   :  { %v69_v18 = vpop.permute.xlu0 %68 }
  0x82   :  { %v73_v20 = vpop.permute.xlu1 %72  ;;  %v93_v41 = vmul.f32 %v87_v22, %v69_v18  ;;  %v92_v46 = vmul.f32 %v83_v21, %v69_v18 }
  0x83   :  { %v94_v39 = vmul.f32 %v83_v21, %v73_v20  ;;  %v95_v40 = vmul.f32 %v87_v22, %v73_v20 }
  0x85   :  { %v102_v50 = vadd.f32 %v94_v39, %v59_v44  ;;  %v103_v51 = vadd.f32 %v95_v40, %v60_v45 }
  0x86   :  { %v42_v27 = vpop.permute.xlu0 %41 }
  0x87   :  { %v61_v28 = vmul.f32 %v48_v23, %v42_v27  ;;  %v62_v29 = vmul.f32 %v52_v24, %v42_v27  ;;  %v32_v30 = vpop.permute.xlu1 %31 }
  0x88   :  { %v58_v42 = vmul.f32 %v52_v24, %v32_v30  ;;  %v57_v47 = vmul.f32 %v48_v23, %v32_v30 }
  0x89   :  { %v104_v31 = vadd.f32 %v96_v25, %v61_v28  ;;  %v105_v32 = vadd.f32 %v97_v26, %v62_v29 }
  0x8a   :  { %v27_v36 = vpop.permute.xlu0 %26  ;;  %v101_v49 = vadd.f32 %v93_v41, %v58_v42  ;;  %v100_v56 = vadd.f32 %v92_v46, %v57_v47 }
  0x8b   :  { %v128_v33 = vpop.permute.xlu1 %127  ;;  %v55_v52 = vmul.f32 %v48_v23, %v27_v36  ;;  %v56_v53 = vmul.f32 %v52_v24, %v27_v36 }
  0x8c   :  { %v136_v34 = vadd.f32 %v128_v33, %v104_v31  ;;  %v137_v35 = vadd.f32 %v128_v33, %v105_v32 }
  0x8e   :  { %v145_v37 = vmax.f32 %v137_v35, 0.0  ;;  %v144_v38 = vmax.f32 %v136_v34, 0.0  ;;  %v118_v48 = vpop.permute.xlu0 %117 }
  0x8f   :  { %v133_v58 = vadd.f32 %v118_v48, %v101_v49  ;;  %v132_v61 = vadd.f32 %v118_v48, %v100_v56 }
  0x90   :  { %v65_v43 = vpop.permute.xlu1 %64  ;;  %175 = vmatprep.subr.mxu0 %v145_v37 }
  0x91   :  { %176 = vmatpush1.msra.mxu0 %v144_v38  ;;  %v90_v54 = vmul.f32 %v83_v21, %v65_v43  ;;  %v91_v55 = vmul.f32 %v87_v22, %v65_v43  ;;  %v141_v3 = vmax.f32 %v133_v58, 0.0  ;;  %v140_v6 = vmax.f32 %v132_v61, 0.0 }
  0x93   :  { %v98_v0 = vadd.f32 %v90_v54, %v55_v52  ;;  %v99_v1 = vadd.f32 %v91_v55, %v56_v53 }
  0x95   :  { %v123_v57 = vpop.permute.xlu1 %122 }
  0x96   :  { %v134_v59 = vadd.f32 %v123_v57, %v102_v50  ;;  %v135_v60 = vadd.f32 %v123_v57, %v103_v51 }
  0x98   :  { %v142_v62 = vmax.f32 %v134_v59, 0.0  ;;  %v143_v63 = vmax.f32 %v135_v60, 0.0 }
  0x99   :  { %v113_v2 = vpop.permute.xlu1 %112 }
  0x9a   :  { %v130_v4 = vadd.f32 %v113_v2, %v98_v0  ;;  %v131_v5 = vadd.f32 %v113_v2, %v99_v1  ;;  %177 = vmatprep.subr.mxu0 %v143_v63 }
  0x9b   :  { %178 = vmatpush1.msra.mxu0 %v142_v62 }
  0x9c   :  { %v138_v7 = vmax.f32 %v130_v4, 0.0  ;;  %v139_v8 = vmax.f32 %v131_v5, 0.0  ;;  %179 = vmatprep.subr.mxu0 %v141_v3 }
  0x9d   :  { %180 = vmatpush1.msra.mxu0 %v140_v6 }
  0x9e   :  { %181 = vmatprep.subr.mxu0 %v139_v8 }
  0x9f   :  { %182 = vmatpush1.msra.mxu0 %v138_v7 }
  0xa0   :  { %232 = vmatmul.mubr.msk.f32.vlgmr.msra.gmra.mxu0 %vm147_vm0, %v146_v9 }
 0x160   :  { %v217_v10 = vpop.f32.mrf.mxu0 }
 0x162   :  { %v219_v11 = vpop.f32.mrf.mxu0 }
 0x163   :  { %v224_v12 = vcombine.low %v217_v10, %v219_v11 }
 0x165   :  { %226 = vst [vmem:[%s311_s4] sm:$0xff] %v224_v12 }

// kernel: crpb_forward.3
= control target key start
LH: loop header
LB: loop body
LE: loop exit
PB: predicated region body
PF: predicated region fallthrough
CT: control target
= control target key end

     0   :  { %v11_v0 = vlaneseq  ;;  %v6526_v17 = vmov 1.0   ;;  %s10019_s1 = inlined_call_operand.vmem [shape: s32[1,4096], index: 1, kind: input, shape index: {}]   ;;  %s10020_s0 = inlined_call_operand.vmem [shape: f32[4,256], index: 0, kind: input, shape index: {}]   ;;  %s10021_s2 = inlined_call_operand.vmem [shape: f32[4,4096], index: 2, kind: output, shape index: {}]  }
   0x1   :  { %v6545_v1 = vld [vmem:[%s10020_s0] sm:$0xff]  ;;  %v7455_v53 = vld [vmem:[%s10019_s1 + $0x8] sm:$0xff]  ;;  %v8279_v63 = vld [vmem:[%s10019_s1 + $0x10] sm:$0xff] }
   0x2   :  { %v6547_v2 = vshrl.u32 %v11_v0, 7  ;;  %v6551_v3 = vcombine.high %v6545_v1, %v6545_v1  ;;  %v6556_v4 = vld [vmem:[%s10019_s1] sm:$0xff] }
   0x3   :  { %v7522_v58 = vld [vmem:[%s10020_s0] sm:$0xff] }
   0x4   :  { %v6559_v5 = vadd.s32 120, %v6547_v2  ;;  %v6562_v6 = vsub.s32 1, %v6547_v2  ;;  %v6565_v7 = vsub.s32 3, %v6547_v2  ;;  %v6568_v8 = vsub.s32 0, %v6547_v2  ;;  %3316 = vmatprep.mubr.f32.mxu0 %v6551_v3  ;;  %3387 = vmatprep.mubr.f32.mxu1 %v6551_v3 }
   0x5   :  { %v6573_v9 = vsub.s32 2, %v6547_v2  ;;  %v6576_v10 = vadd.s32 112, %v6547_v2  ;;  %v6591_v14 = vadd.s32 104, %v6547_v2  ;;  %v6598_v16 = vadd.s32 96, %v6547_v2 }
   0x6   :  { %v6580_v11 = vrot.slane %v6556_v4, %v6562_v6  ;;  %v6584_v12 = vrot.slane %v6556_v4, %v6565_v7  ;;  %v6588_v13 = vrot.slane %v6556_v4, %v6568_v8  ;;  %v6625_v18 = vadd.s32 88, %v6547_v2 }
   0x7   :  { %v6595_v15 = vrot.slane %v6556_v4, %v6573_v9  ;;  %v6640_v19 = vadd.s32 80, %v6547_v2  ;;  %v6655_v20 = vadd.s32 72, %v6547_v2  ;;  %v6670_v21 = vadd.s32 64, %v6547_v2 }
   0x8   :  { %vm657_vm0 = vcmp.eq.s32.totalorder %v6559_v5, %v6580_v11  ;;  %vm659_vm1 = vcmp.eq.s32.totalorder %v6559_v5, %v6584_v12  ;;  %vm656_vm2 = vcmp.eq.s32.totalorder %v6559_v5, %v6588_v13  ;;  %vm625_vm3 = vcmp.eq.s32.totalorder %v6576_v10, %v6580_v11 }
   0x9   :  { %5496 = vmatprep.subr.msk.mxu0 %vm657_vm0, %v6526_v17  ;;  %5560 = vmatprep.subr.msk.mxu1 %vm659_vm1, %v6526_v17  ;;  %vm658_vm4 = vcmp.eq.s32.totalorder %v6559_v5, %v6595_v15  ;;  %vm627_vm5 = vcmp.eq.s32.totalorder %v6576_v10, %v6584_v12  ;;  %vm624_vm6 = vcmp.eq.s32.totalorder %v6576_v10, %v6588_v13  ;;  %v6685_v22 = vadd.s32 56, %v6547_v2 }
   0xa   :  { %5497 = vmatpush1.msk.msra.mxu0 %vm656_vm2, %v6526_v17  ;;  %5561 = vmatpush1.msk.msra.mxu1 %vm658_vm4, %v6526_v17  ;;  %vm626_vm7 = vcmp.eq.s32.totalorder %v6576_v10, %v6595_v15  ;;  %vm593_vm8 = vcmp.eq.s32.totalorder %v6591_v14, %v6580_v11  ;;  %vm595_vm9 = vcmp.eq.s32.totalorder %v6591_v14, %v6584_v12  ;;  %v6700_v23 = vadd.s32 48, %v6547_v2 }
   0xb   :  { %5498 = vmatprep.subr.msk.mxu0 %vm625_vm3, %v6526_v17  ;;  %5562 = vmatprep.subr.msk.mxu1 %vm627_vm5, %v6526_v17  ;;  %vm592_vm10 = vcmp.eq.s32.totalorder %v6591_v14, %v6588_v13  ;;  %vm594_vm11 = vcmp.eq.s32.totalorder %v6591_v14, %v6595_v15  ;;  %vm561_vm12 = vcmp.eq.s32.totalorder %v6598_v16, %v6580_v11  ;;  %v6715_v24 = vadd.s32 40, %v6547_v2 }
   0xc   :  { %5499 = vmatpush1.msk.msra.mxu0 %vm624_vm6, %v6526_v17  ;;  %5563 = vmatpush1.msk.msra.mxu1 %vm626_vm7, %v6526_v17  ;;  %vm563_vm13 = vcmp.eq.s32.totalorder %v6598_v16, %v6584_v12  ;;  %vm560_vm14 = vcmp.eq.s32.totalorder %v6598_v16, %v6588_v13  ;;  %vm562_vm15 = vcmp.eq.s32.totalorder %v6598_v16, %v6595_v15  ;;  %v6730_v25 = vadd.s32 32, %v6547_v2 }
   0xd   :  { %5500 = vmatprep.subr.msk.mxu0 %vm593_vm8, %v6526_v17  ;;  %5564 = vmatprep.subr.msk.mxu1 %vm595_vm9, %v6526_v17  ;;  %vm529_vm0 = vcmp.eq.s32.totalorder %v6625_v18, %v6580_v11  ;;  %vm531_vm1 = vcmp.eq.s32.totalorder %v6625_v18, %v6584_v12  ;;  %vm528_vm2 = vcmp.eq.s32.totalorder %v6625_v18, %v6588_v13  ;;  %v6745_v26 = vadd.s32 24, %v6547_v2 }
   0xe   :  { %5501 = vmatpush1.msk.msra.mxu0 %vm592_vm10, %v6526_v17  ;;  %5565 = vmatpush1.msk.msra.mxu1 %vm594_vm11, %v6526_v17  ;;  %vm530_vm3 = vcmp.eq.s32.totalorder %v6625_v18, %v6595_v15  ;;  %vm497_vm4 = vcmp.eq.s32.totalorder %v6640_v19, %v6580_v11  ;;  %vm499_vm5 = vcmp.eq.s32.totalorder %v6640_v19, %v6584_v12  ;;  %v6760_v27 = vadd.s32 16, %v6547_v2 }
   0xf   :  { %5502 = vmatprep.subr.msk.mxu0 %vm561_vm12, %v6526_v17  ;;  %5566 = vmatprep.subr.msk.mxu1 %vm563_vm13, %v6526_v17  ;;  %vm496_vm6 = vcmp.eq.s32.totalorder %v6640_v19, %v6588_v13  ;;  %vm498_vm7 = vcmp.eq.s32.totalorder %v6640_v19, %v6595_v15  ;;  %vm465_vm8 = vcmp.eq.s32.totalorder %v6655_v20, %v6580_v11  ;;  %v6775_v28 = vadd.s32 8, %v6547_v2 }
  0x10   :  { %5503 = vmatpush1.msk.msra.mxu0 %vm560_vm14, %v6526_v17  ;;  %5567 = vmatpush1.msk.msra.mxu1 %vm562_vm15, %v6526_v17  ;;  %vm467_vm9 = vcmp.eq.s32.totalorder %v6655_v20, %v6584_v12  ;;  %vm464_vm10 = vcmp.eq.s32.totalorder %v6655_v20, %v6588_v13  ;;  %vm466_vm11 = vcmp.eq.s32.totalorder %v6655_v20, %v6595_v15  ;;  %v6802_v29 = vadd.s32 248, %v6547_v2 }
  0x11   :  { %5504 = vmatprep.subr.msk.mxu0 %vm529_vm0, %v6526_v17  ;;  %5568 = vmatprep.subr.msk.mxu1 %vm531_vm1, %v6526_v17  ;;  %vm433_vm12 = vcmp.eq.s32.totalorder %v6670_v21, %v6580_v11  ;;  %vm435_vm13 = vcmp.eq.s32.totalorder %v6670_v21, %v6584_v12  ;;  %vm432_vm14 = vcmp.eq.s32.totalorder %v6670_v21, %v6588_v13  ;;  %v6817_v30 = vadd.s32 240, %v6547_v2 }
  0x12   :  { %5505 = vmatpush1.msk.msra.mxu0 %vm528_vm2, %v6526_v17  ;;  %5569 = vmatpush1.msk.msra.mxu1 %vm530_vm3, %v6526_v17  ;;  %vm434_vm15 = vcmp.eq.s32.totalorder %v6670_v21, %v6595_v15  ;;  %vm401_vm0 = vcmp.eq.s32.totalorder %v6685_v22, %v6580_v11  ;;  %vm403_vm1 = vcmp.eq.s32.totalorder %v6685_v22, %v6584_v12  ;;  %v6832_v31 = vadd.s32 232, %v6547_v2 }
  0x13   :  { %5506 = vmatprep.subr.msk.mxu0 %vm497_vm4, %v6526_v17  ;;  %5570 = vmatprep.subr.msk.mxu1 %vm499_vm5, %v6526_v17  ;;  %vm400_vm2 = vcmp.eq.s32.totalorder %v6685_v22, %v6588_v13  ;;  %vm402_vm3 = vcmp.eq.s32.totalorder %v6685_v22, %v6595_v15  ;;  %vm369_vm4 = vcmp.eq.s32.totalorder %v6700_v23, %v6580_v11  ;;  %v6847_v32 = vadd.s32 224, %v6547_v2 }
  0x14   :  { %5507 = vmatpush1.msk.msra.mxu0 %vm496_vm6, %v6526_v17  ;;  %5571 = vmatpush1.msk.msra.mxu1 %vm498_vm7, %v6526_v17  ;;  %vm371_vm5 = vcmp.eq.s32.totalorder %v6700_v23, %v6584_v12  ;;  %vm368_vm6 = vcmp.eq.s32.totalorder %v6700_v23, %v6588_v13  ;;  %vm370_vm7 = vcmp.eq.s32.totalorder %v6700_v23, %v6595_v15  ;;  %v6862_v33 = vadd.s32 216, %v6547_v2 }
  0x15   :  { %5508 = vmatprep.subr.msk.mxu0 %vm465_vm8, %v6526_v17  ;;  %5572 = vmatprep.subr.msk.mxu1 %vm467_vm9, %v6526_v17  ;;  %vm337_vm8 = vcmp.eq.s32.totalorder %v6715_v24, %v6580_v11  ;;  %vm339_vm9 = vcmp.eq.s32.totalorder %v6715_v24, %v6584_v12  ;;  %v6877_v34 = vadd.s32 208, %v6547_v2  ;;  %v6892_v35 = vadd.s32 200, %v6547_v2 }
  0x16   :  { %5509 = vmatpush1.msk.msra.mxu0 %vm464_vm10, %v6526_v17  ;;  %5573 = vmatpush1.msk.msra.mxu1 %vm466_vm11, %v6526_v17  ;;  %vm336_vm10 = vcmp.eq.s32.totalorder %v6715_v24, %v6588_v13  ;;  %vm338_vm11 = vcmp.eq.s32.totalorder %v6715_v24, %v6595_v15  ;;  %v6907_v36 = vadd.s32 192, %v6547_v2  ;;  %v6922_v37 = vadd.s32 184, %v6547_v2 }
  0x17   :  { %5510 = vmatprep.subr.msk.mxu0 %vm433_vm12, %v6526_v17  ;;  %5574 = vmatprep.subr.msk.mxu1 %vm435_vm13, %v6526_v17  ;;  %vm305_vm12 = vcmp.eq.s32.totalorder %v6730_v25, %v6580_v11  ;;  %vm307_vm13 = vcmp.eq.s32.totalorder %v6730_v25, %v6584_v12  ;;  %v6937_v38 = vadd.s32 176, %v6547_v2  ;;  %v6952_v39 = vadd.s32 168, %v6547_v2 }
  0x18   :  { %5511 = vmatpush1.msk.msra.mxu0 %vm432_vm14, %v6526_v17  ;;  %5575 = vmatpush1.msk.msra.mxu1 %vm434_vm15, %v6526_v17  ;;  %vm304_vm14 = vcmp.eq.s32.totalorder %v6730_v25, %v6588_v13  ;;  %vm306_vm15 = vcmp.eq.s32.totalorder %v6730_v25, %v6595_v15  ;;  %v6967_v40 = vadd.s32 160, %v6547_v2  ;;  %v6982_v41 = vadd.s32 152, %v6547_v2 }
  0x19   :  { %5512 = vmatprep.subr.msk.mxu0 %vm401_vm0, %v6526_v17  ;;  %5576 = vmatprep.subr.msk.mxu1 %vm403_vm1, %v6526_v17  ;;  %vm273_vm0 = vcmp.eq.s32.totalorder %v6745_v26, %v6580_v11  ;;  %vm275_vm1 = vcmp.eq.s32.totalorder %v6745_v26, %v6584_v12  ;;  %v6997_v42 = vadd.s32 144, %v6547_v2  ;;  %v7006_v43 = vadd.s32 136, %v6547_v2 }
  0x1a   :  { %5513 = vmatpush1.msk.msra.mxu0 %vm400_vm2, %v6526_v17  ;;  %5577 = vmatpush1.msk.msra.mxu1 %vm402_vm3, %v6526_v17  ;;  %vm272_vm2 = vcmp.eq.s32.totalorder %v6745_v26, %v6588_v13  ;;  %vm274_vm3 = vcmp.eq.s32.totalorder %v6745_v26, %v6595_v15  ;;  %v7015_v44 = vadd.s32 128, %v6547_v2  ;;  %v7024_v45 = vsub.s32 5, %v6547_v2 }
  0x1b   :  { %5514 = vmatprep.subr.msk.mxu0 %vm369_vm4, %v6526_v17  ;;  %5578 = vmatprep.subr.msk.mxu1 %vm371_vm5, %v6526_v17  ;;  %vm241_vm4 = vcmp.eq.s32.totalorder %v6760_v27, %v6580_v11  ;;  %vm243_vm5 = vcmp.eq.s32.totalorder %v6760_v27, %v6584_v12  ;;  %v7027_v46 = vsub.s32 7, %v6547_v2  ;;  %v7036_v47 = vsub.s32 4, %v6547_v2 }
  0x1c   :  { %5515 = vmatpush1.msk.msra.mxu0 %vm368_vm6, %v6526_v17  ;;  %5579 = vmatpush1.msk.msra.mxu1 %vm370_vm7, %v6526_v17  ;;  %vm240_vm6 = vcmp.eq.s32.totalorder %v6760_v27, %v6588_v13  ;;  %vm242_vm7 = vcmp.eq.s32.totalorder %v6760_v27, %v6595_v15  ;;  %v7039_v48 = vsub.s32 6, %v6547_v2  ;;  %v7063_v49 = vrot.slane %v6556_v4, %v7024_v45 }
  0x1d   :  { %5516 = vmatprep.subr.msk.mxu0 %vm337_vm8, %v6526_v17  ;;  %5580 = vmatprep.subr.msk.mxu1 %vm339_vm9, %v6526_v17  ;;  %vm209_vm8 = vcmp.eq.s32.totalorder %v6775_v28, %v6580_v11  ;;  %vm211_vm9 = vcmp.eq.s32.totalorder %v6775_v28, %v6584_v12  ;;  %v7067_v50 = vrot.slane %v6556_v4, %v7027_v46 }
  0x1e   :  { %5517 = vmatpush1.msk.msra.mxu0 %vm336_vm10, %v6526_v17  ;;  %5581 = vmatpush1.msk.msra.mxu1 %vm338_vm11, %v6526_v17  ;;  %vm208_vm10 = vcmp.eq.s32.totalorder %v6775_v28, %v6588_v13  ;;  %vm210_vm11 = vcmp.eq.s32.totalorder %v6775_v28, %v6595_v15  ;;  %v7075_v51 = vrot.slane %v6556_v4, %v7036_v47 }
  0x1f   :  { %5518 = vmatprep.subr.msk.mxu0 %vm305_vm12, %v6526_v17  ;;  %5582 = vmatprep.subr.msk.mxu1 %vm307_vm13, %v6526_v17  ;;  %vm177_vm12 = vcmp.eq.s32.totalorder %v6547_v2, %v6580_v11  ;;  %vm179_vm13 = vcmp.eq.s32.totalorder %v6547_v2, %v6584_v12  ;;  %v7079_v52 = vrot.slane %v6556_v4, %v7039_v48 }
  0x20   :  { %5519 = vmatpush1.msk.msra.mxu0 %vm304_vm14, %v6526_v17  ;;  %5583 = vmatpush1.msk.msra.mxu1 %vm306_vm15, %v6526_v17  ;;  %vm176_vm14 = vcmp.eq.s32.totalorder %v6547_v2, %v6588_v13  ;;  %vm178_vm15 = vcmp.eq.s32.totalorder %v6547_v2, %v6595_v15  ;;  %v7477_v54 = vrot.slane %v7455_v53, %v6562_v6 }
  0x21   :  { %5520 = vmatprep.subr.msk.mxu0 %vm273_vm0, %v6526_v17  ;;  %5584 = vmatprep.subr.msk.mxu1 %vm275_vm1, %v6526_v17  ;;  %vm1169_vm0 = vcmp.eq.s32.totalorder %v6802_v29, %v6580_v11  ;;  %vm1171_vm1 = vcmp.eq.s32.totalorder %v6802_v29, %v6584_v12  ;;  %v7487_v55 = vrot.slane %v7455_v53, %v6565_v7 }
  0x22   :  { %5521 = vmatpush1.msk.msra.mxu0 %vm272_vm2, %v6526_v17  ;;  %5585 = vmatpush1.msk.msra.mxu1 %vm274_vm3, %v6526_v17  ;;  %vm1168_vm2 = vcmp.eq.s32.totalorder %v6802_v29, %v6588_v13  ;;  %vm1170_vm3 = vcmp.eq.s32.totalorder %v6802_v29, %v6595_v15  ;;  %v7495_v56 = vrot.slane %v7455_v53, %v6568_v8 }
  0x23   :  { %5522 = vmatprep.subr.msk.mxu0 %vm241_vm4, %v6526_v17  ;;  %5586 = vmatprep.subr.msk.mxu1 %vm243_vm5, %v6526_v17  ;;  %vm1137_vm4 = vcmp.eq.s32.totalorder %v6817_v30, %v6580_v11  ;;  %vm1139_vm5 = vcmp.eq.s32.totalorder %v6817_v30, %v6584_v12  ;;  %v7499_v57 = vrot.slane %v7455_v53, %v6573_v9 }
  0x24   :  { %5523 = vmatpush1.msk.msra.mxu0 %vm240_vm6, %v6526_v17  ;;  %5587 = vmatpush1.msk.msra.mxu1 %vm242_vm7, %v6526_v17  ;;  %vm1136_vm6 = vcmp.eq.s32.totalorder %v6817_v30, %v6588_v13  ;;  %vm1138_vm7 = vcmp.eq.s32.totalorder %v6817_v30, %v6595_v15  ;;  %v7892_v59 = vrot.slane %v7455_v53, %v7024_v45 }
  0x25   :  { %5524 = vmatprep.subr.msk.mxu0 %vm209_vm8, %v6526_v17  ;;  %5588 = vmatprep.subr.msk.mxu1 %vm211_vm9, %v6526_v17  ;;  %vm1105_vm8 = vcmp.eq.s32.totalorder %v6832_v31, %v6580_v11  ;;  %vm1107_vm9 = vcmp.eq.s32.totalorder %v6832_v31, %v6584_v12  ;;  %v7896_v60 = vrot.slane %v7455_v53, %v7027_v46 }
  0x26   :  { %5525 = vmatpush1.msk.msra.mxu0 %vm208_vm10, %v6526_v17  ;;  %5589 = vmatpush1.msk.msra.mxu1 %vm210_vm11, %v6526_v17  ;;  %vm1104_vm10 = vcmp.eq.s32.totalorder %v6832_v31, %v6588_v13  ;;  %vm1106_vm11 = vcmp.eq.s32.totalorder %v6832_v31, %v6595_v15  ;;  %v7904_v61 = vrot.slane %v7455_v53, %v7036_v47 }
  0x27   :  { %5526 = vmatprep.subr.msk.mxu0 %vm177_vm12, %v6526_v17  ;;  %5590 = vmatprep.subr.msk.mxu1 %vm179_vm13, %v6526_v17  ;;  %vm1073_vm12 = vcmp.eq.s32.totalorder %v6847_v32, %v6580_v11  ;;  %vm1075_vm13 = vcmp.eq.s32.totalorder %v6847_v32, %v6584_v12  ;;  %v7908_v62 = vrot.slane %v7455_v53, %v7039_v48 }
  0x28   :  { %5527 = vmatpush1.msk.msra.mxu0 %vm176_vm14, %v6526_v17  ;;  %5591 = vmatpush1.msk.msra.mxu1 %vm178_vm15, %v6526_v17  ;;  %vm1072_vm14 = vcmp.eq.s32.totalorder %v6847_v32, %v6588_v13  ;;  %vm1074_vm15 = vcmp.eq.s32.totalorder %v6847_v32, %v6595_v15  ;;  %v8301_v4 = vrot.slane %v8279_v63, %v6562_v6 }
  0x29   :  { %5528 = vmatprep.subr.msk.mxu0 %vm1169_vm0, %v6526_v17  ;;  %5592 = vmatprep.subr.msk.mxu1 %vm1171_vm1, %v6526_v17  ;;  %vm1041_vm0 = vcmp.eq.s32.totalorder %v6862_v33, %v6580_v11  ;;  %vm1043_vm1 = vcmp.eq.s32.totalorder %v6862_v33, %v6584_v12 }
  0x2a   :  { %5529 = vmatpush2.msk.msra.mxu0 %vm1168_vm2, %v6526_v17  ;;  %5593 = vmatpush2.msk.msra.mxu1 %vm1170_vm3, %v6526_v17  ;;  %vm1040_vm2 = vcmp.eq.s32.totalorder %v6862_v33, %v6588_v13  ;;  %vm1042_vm3 = vcmp.eq.s32.totalorder %v6862_v33, %v6595_v15 }
  0x2b   :  { %5530 = vmatprep.subr.msk.mxu0 %vm1137_vm4, %v6526_v17  ;;  %5594 = vmatprep.subr.msk.mxu1 %vm1139_vm5, %v6526_v17  ;;  %vm1009_vm4 = vcmp.eq.s32.totalorder %v6877_v34, %v6580_v11  ;;  %vm1011_vm5 = vcmp.eq.s32.totalorder %v6877_v34, %v6584_v12 }
  0x2c   :  { %5531 = vmatpush2.msk.msra.mxu0 %vm1136_vm6, %v6526_v17  ;;  %5595 = vmatpush2.msk.msra.mxu1 %vm1138_vm7, %v6526_v17  ;;  %vm1008_vm6 = vcmp.eq.s32.totalorder %v6877_v34, %v6588_v13  ;;  %vm1010_vm7 = vcmp.eq.s32.totalorder %v6877_v34, %v6595_v15 }
  0x2d   :  { %5532 = vmatprep.subr.msk.mxu0 %vm1105_vm8, %v6526_v17  ;;  %5596 = vmatprep.subr.msk.mxu1 %vm1107_vm9, %v6526_v17  ;;  %vm977_vm8 = vcmp.eq.s32.totalorder %v6892_v35, %v6580_v11  ;;  %vm979_vm9 = vcmp.eq.s32.totalorder %v6892_v35, %v6584_v12 }
  0x2e   :  { %5533 = vmatpush2.msk.msra.mxu0 %vm1104_vm10, %v6526_v17  ;;  %5597 = vmatpush2.msk.msra.mxu1 %vm1106_vm11, %v6526_v17  ;;  %vm976_vm10 = vcmp.eq.s32.totalorder %v6892_v35, %v6588_v13  ;;  %vm978_vm11 = vcmp.eq.s32.totalorder %v6892_v35, %v6595_v15 }
  0x2f   :  { %5534 = vmatprep.subr.msk.mxu0 %vm1073_vm12, %v6526_v17  ;;  %5598 = vmatprep.subr.msk.mxu1 %vm1075_vm13, %v6526_v17  ;;  %vm945_vm12 = vcmp.eq.s32.totalorder %v6907_v36, %v6580_v11  ;;  %vm947_vm13 = vcmp.eq.s32.totalorder %v6907_v36, %v6584_v12 }
  0x30   :  { %5535 = vmatpush2.msk.msra.mxu0 %vm1072_vm14, %v6526_v17  ;;  %5599 = vmatpush2.msk.msra.mxu1 %vm1074_vm15, %v6526_v17  ;;  %vm944_vm14 = vcmp.eq.s32.totalorder %v6907_v36, %v6588_v13  ;;  %vm946_vm15 = vcmp.eq.s32.totalorder %v6907_v36, %v6595_v15 }
  0x31   :  { %5536 = vmatprep.subr.msk.mxu0 %vm1041_vm0, %v6526_v17  ;;  %5600 = vmatprep.subr.msk.mxu1 %vm1043_vm1, %v6526_v17  ;;  %vm913_vm0 = vcmp.eq.s32.totalorder %v6922_v37, %v6580_v11  ;;  %vm915_vm1 = vcmp.eq.s32.totalorder %v6922_v37, %v6584_v12 }
  0x32   :  { %5537 = vmatpush2.msk.msra.mxu0 %vm1040_vm2, %v6526_v17  ;;  %5601 = vmatpush2.msk.msra.mxu1 %vm1042_vm3, %v6526_v17  ;;  %vm912_vm2 = vcmp.eq.s32.totalorder %v6922_v37, %v6588_v13  ;;  %vm914_vm3 = vcmp.eq.s32.totalorder %v6922_v37, %v6595_v15 }
  0x33   :  { %5538 = vmatprep.subr.msk.mxu0 %vm1009_vm4, %v6526_v17  ;;  %5602 = vmatprep.subr.msk.mxu1 %vm1011_vm5, %v6526_v17  ;;  %vm881_vm4 = vcmp.eq.s32.totalorder %v6937_v38, %v6580_v11  ;;  %vm883_vm5 = vcmp.eq.s32.totalorder %v6937_v38, %v6584_v12 }
  0x34   :  { %5539 = vmatpush2.msk.msra.mxu0 %vm1008_vm6, %v6526_v17  ;;  %5603 = vmatpush2.msk.msra.mxu1 %vm1010_vm7, %v6526_v17  ;;  %vm880_vm6 = vcmp.eq.s32.totalorder %v6937_v38, %v6588_v13  ;;  %vm882_vm7 = vcmp.eq.s32.totalorder %v6937_v38, %v6595_v15 }
  0x35   :  { %5540 = vmatprep.subr.msk.mxu0 %vm977_vm8, %v6526_v17  ;;  %5604 = vmatprep.subr.msk.mxu1 %vm979_vm9, %v6526_v17  ;;  %vm849_vm8 = vcmp.eq.s32.totalorder %v6952_v39, %v6580_v11  ;;  %vm851_vm9 = vcmp.eq.s32.totalorder %v6952_v39, %v6584_v12 }
  0x36   :  { %5541 = vmatpush2.msk.msra.mxu0 %vm976_vm10, %v6526_v17  ;;  %5605 = vmatpush2.msk.msra.mxu1 %vm978_vm11, %v6526_v17  ;;  %vm848_vm10 = vcmp.eq.s32.totalorder %v6952_v39, %v6588_v13  ;;  %vm850_vm11 = vcmp.eq.s32.totalorder %v6952_v39, %v6595_v15 }
  0x37   :  { %5542 = vmatprep.subr.msk.mxu0 %vm945_vm12, %v6526_v17  ;;  %5606 = vmatprep.subr.msk.mxu1 %vm947_vm13, %v6526_v17  ;;  %vm817_vm12 = vcmp.eq.s32.totalorder %v6967_v40, %v6580_v11  ;;  %vm819_vm13 = vcmp.eq.s32.totalorder %v6967_v40, %v6584_v12 }
  0x38   :  { %5543 = vmatpush2.msk.msra.mxu0 %vm944_vm14, %v6526_v17  ;;  %5607 = vmatpush2.msk.msra.mxu1 %vm946_vm15, %v6526_v17  ;;  %vm816_vm14 = vcmp.eq.s32.totalorder %v6967_v40, %v6588_v13  ;;  %vm818_vm15 = vcmp.eq.s32.totalorder %v6967_v40, %v6595_v15 }
  0x39   :  { %5544 = vmatprep.subr.msk.mxu0 %vm913_vm0, %v6526_v17  ;;  %5608 = vmatprep.subr.msk.mxu1 %vm915_vm1, %v6526_v17  ;;  %vm785_vm0 = vcmp.eq.s32.totalorder %v6982_v41, %v6580_v11  ;;  %vm787_vm1 = vcmp.eq.s32.totalorder %v6982_v41, %v6584_v12 }
  0x3a   :  { %5545 = vmatpush2.msk.msra.mxu0 %vm912_vm2, %v6526_v17  ;;  %5609 = vmatpush2.msk.msra.mxu1 %vm914_vm3, %v6526_v17  ;;  %vm784_vm2 = vcmp.eq.s32.totalorder %v6982_v41, %v6588_v13  ;;  %vm786_vm3 = vcmp.eq.s32.totalorder %v6982_v41, %v6595_v15 }
  0x3b   :  { %5546 = vmatprep.subr.msk.mxu0 %vm881_vm4, %v6526_v17  ;;  %5610 = vmatprep.subr.msk.mxu1 %vm883_vm5, %v6526_v17  ;;  %vm753_vm4 = vcmp.eq.s32.totalorder %v6997_v42, %v6580_v11  ;;  %vm755_vm5 = vcmp.eq.s32.totalorder %v6997_v42, %v6584_v12 }
  0x3c   :  { %5547 = vmatpush2.msk.msra.mxu0 %vm880_vm6, %v6526_v17  ;;  %5611 = vmatpush2.msk.msra.mxu1 %vm882_vm7, %v6526_v17  ;;  %vm752_vm6 = vcmp.eq.s32.totalorder %v6997_v42, %v6588_v13  ;;  %vm754_vm7 = vcmp.eq.s32.totalorder %v6997_v42, %v6595_v15 }
  0x3d   :  { %5548 = vmatprep.subr.msk.mxu0 %vm849_vm8, %v6526_v17  ;;  %5612 = vmatprep.subr.msk.mxu1 %vm851_vm9, %v6526_v17  ;;  %vm721_vm8 = vcmp.eq.s32.totalorder %v7006_v43, %v6580_v11  ;;  %vm723_vm9 = vcmp.eq.s32.totalorder %v7006_v43, %v6584_v12 }
  0x3e   :  { %5549 = vmatpush2.msk.msra.mxu0 %vm848_vm10, %v6526_v17  ;;  %5613 = vmatpush2.msk.msra.mxu1 %vm850_vm11, %v6526_v17  ;;  %vm720_vm10 = vcmp.eq.s32.totalorder %v7006_v43, %v6588_v13  ;;  %vm722_vm11 = vcmp.eq.s32.totalorder %v7006_v43, %v6595_v15 }
  0x3f   :  { %5550 = vmatprep.subr.msk.mxu0 %vm817_vm12, %v6526_v17  ;;  %5614 = vmatprep.subr.msk.mxu1 %vm819_vm13, %v6526_v17  ;;  %vm689_vm12 = vcmp.eq.s32.totalorder %v7015_v44, %v6580_v11  ;;  %vm691_vm13 = vcmp.eq.s32.totalorder %v7015_v44, %v6584_v12  ;;  %v8305_v11 = vrot.slane %v8279_v63, %v6565_v7 }
  0x40   :  { %5551 = vmatpush2.msk.msra.mxu0 %vm816_vm14, %v6526_v17  ;;  %5615 = vmatpush2.msk.msra.mxu1 %vm818_vm15, %v6526_v17  ;;  %vm688_vm14 = vcmp.eq.s32.totalorder %v7015_v44, %v6588_v13  ;;  %vm690_vm15 = vcmp.eq.s32.totalorder %v7015_v44, %v6595_v15  ;;  %v8313_v12 = vrot.slane %v8279_v63, %v6568_v8 }
  0x41   :  { %5552 = vmatprep.subr.msk.mxu0 %vm785_vm0, %v6526_v17  ;;  %5616 = vmatprep.subr.msk.mxu1 %vm787_vm1, %v6526_v17  ;;  %vm661_vm0 = vcmp.eq.s32.totalorder %v6559_v5, %v7063_v49  ;;  %vm663_vm1 = vcmp.eq.s32.totalorder %v6559_v5, %v7067_v50  ;;  %v8317_v13 = vrot.slane %v8279_v63, %v6573_v9 }
  0x42   :  { %5553 = vmatpush2.msk.msra.mxu0 %vm784_vm2, %v6526_v17  ;;  %5617 = vmatpush2.msk.msra.mxu1 %vm786_vm3, %v6526_v17  ;;  %vm660_vm2 = vcmp.eq.s32.totalorder %v6559_v5, %v7075_v51  ;;  %vm662_vm3 = vcmp.eq.s32.totalorder %v6559_v5, %v7079_v52 }
  0x43   :  { %5554 = vmatprep.subr.msk.mxu0 %vm753_vm4, %v6526_v17  ;;  %5618 = vmatprep.subr.msk.mxu1 %vm755_vm5, %v6526_v17  ;;  %vm629_vm4 = vcmp.eq.s32.totalorder %v6576_v10, %v7063_v49  ;;  %vm631_vm5 = vcmp.eq.s32.totalorder %v6576_v10, %v7067_v50 }
  0x44   :  { %5555 = vmatpush2.msk.msra.mxu0 %vm752_vm6, %v6526_v17  ;;  %5619 = vmatpush2.msk.msra.mxu1 %vm754_vm7, %v6526_v17  ;;  %vm628_vm6 = vcmp.eq.s32.totalorder %v6576_v10, %v7075_v51  ;;  %vm630_vm7 = vcmp.eq.s32.totalorder %v6576_v10, %v7079_v52 }
  0x45   :  { %5556 = vmatprep.subr.msk.mxu0 %vm721_vm8, %v6526_v17  ;;  %5620 = vmatprep.subr.msk.mxu1 %vm723_vm9, %v6526_v17  ;;  %vm597_vm8 = vcmp.eq.s32.totalorder %v6591_v14, %v7063_v49  ;;  %vm599_vm9 = vcmp.eq.s32.totalorder %v6591_v14, %v7067_v50 }
  0x46   :  { %5557 = vmatpush2.msk.msra.mxu0 %vm720_vm10, %v6526_v17  ;;  %5621 = vmatpush2.msk.msra.mxu1 %vm722_vm11, %v6526_v17  ;;  %vm596_vm10 = vcmp.eq.s32.totalorder %v6591_v14, %v7075_v51  ;;  %vm598_vm11 = vcmp.eq.s32.totalorder %v6591_v14, %v7079_v52 }
  0x47   :  { %5558 = vmatprep.subr.msk.mxu0 %vm689_vm12, %v6526_v17  ;;  %5622 = vmatprep.subr.msk.mxu1 %vm691_vm13, %v6526_v17  ;;  %vm565_vm12 = vcmp.eq.s32.totalorder %v6598_v16, %v7063_v49  ;;  %vm567_vm13 = vcmp.eq.s32.totalorder %v6598_v16, %v7067_v50 }
  0x48   :  { %5559 = vmatpush2.msk.msra.mxu0 %vm688_vm14, %v6526_v17  ;;  %5623 = vmatpush2.msk.msra.mxu1 %vm690_vm15, %v6526_v17  ;;  %vm564_vm14 = vcmp.eq.s32.totalorder %v6598_v16, %v7075_v51  ;;  %vm566_vm15 = vcmp.eq.s32.totalorder %v6598_v16, %v7079_v52 }
  0x49   :  { %3317 = vmatmul.mubr.f32.vlgmr.msra.gmra.mxu0 %v6545_v1  ;;  %3388 = vmatmul.mubr.f32.vlgmr.msra.gmra.mxu1 %v6545_v1 }
  0x4a   :  { %5624 = vmatprep.subr.msk.mxu0 %vm661_vm0, %v6526_v17  ;;  %5688 = vmatprep.subr.msk.mxu1 %vm663_vm1, %v6526_v17  ;;  %vm533_vm0 = vcmp.eq.s32.totalorder %v6625_v18, %v7063_v49  ;;  %vm535_vm1 = vcmp.eq.s32.totalorder %v6625_v18, %v7067_v50 }
  0x4b   :  { %5625 = vmatpush1.msk.msra.mxu0 %vm660_vm2, %v6526_v17  ;;  %5689 = vmatpush1.msk.msra.mxu1 %vm662_vm3, %v6526_v17  ;;  %vm532_vm2 = vcmp.eq.s32.totalorder %v6625_v18, %v7075_v51  ;;  %vm534_vm3 = vcmp.eq.s32.totalorder %v6625_v18, %v7079_v52 }
  0x4c   :  { %5626 = vmatprep.subr.msk.mxu0 %vm629_vm4, %v6526_v17  ;;  %5690 = vmatprep.subr.msk.mxu1 %vm631_vm5, %v6526_v17  ;;  %vm501_vm4 = vcmp.eq.s32.totalorder %v6640_v19, %v7063_v49  ;;  %vm503_vm5 = vcmp.eq.s32.totalorder %v6640_v19, %v7067_v50 }
  0x4d   :  { %5627 = vmatpush1.msk.msra.mxu0 %vm628_vm6, %v6526_v17  ;;  %5691 = vmatpush1.msk.msra.mxu1 %vm630_vm7, %v6526_v17  ;;  %vm500_vm6 = vcmp.eq.s32.totalorder %v6640_v19, %v7075_v51  ;;  %vm502_vm7 = vcmp.eq.s32.totalorder %v6640_v19, %v7079_v52 }
  0x4e   :  { %5628 = vmatprep.subr.msk.mxu0 %vm597_vm8, %v6526_v17  ;;  %5692 = vmatprep.subr.msk.mxu1 %vm599_vm9, %v6526_v17  ;;  %vm469_vm8 = vcmp.eq.s32.totalorder %v6655_v20, %v7063_v49  ;;  %vm471_vm9 = vcmp.eq.s32.totalorder %v6655_v20, %v7067_v50 }
  0x4f   :  { %5629 = vmatpush1.msk.msra.mxu0 %vm596_vm10, %v6526_v17  ;;  %5693 = vmatpush1.msk.msra.mxu1 %vm598_vm11, %v6526_v17  ;;  %vm468_vm10 = vcmp.eq.s32.totalorder %v6655_v20, %v7075_v51  ;;  %vm470_vm11 = vcmp.eq.s32.totalorder %v6655_v20, %v7079_v52 }
  0x50   :  { %5630 = vmatprep.subr.msk.mxu0 %vm565_vm12, %v6526_v17  ;;  %5694 = vmatprep.subr.msk.mxu1 %vm567_vm13, %v6526_v17  ;;  %vm437_vm12 = vcmp.eq.s32.totalorder %v6670_v21, %v7063_v49  ;;  %vm439_vm13 = vcmp.eq.s32.totalorder %v6670_v21, %v7067_v50 }
  0x51   :  { %5631 = vmatpush1.msk.msra.mxu0 %vm564_vm14, %v6526_v17  ;;  %5695 = vmatpush1.msk.msra.mxu1 %vm566_vm15, %v6526_v17  ;;  %vm436_vm14 = vcmp.eq.s32.totalorder %v6670_v21, %v7075_v51  ;;  %vm438_vm15 = vcmp.eq.s32.totalorder %v6670_v21, %v7079_v52 }
  0x52   :  { %5632 = vmatprep.subr.msk.mxu0 %vm533_vm0, %v6526_v17  ;;  %5696 = vmatprep.subr.msk.mxu1 %vm535_vm1, %v6526_v17  ;;  %vm405_vm0 = vcmp.eq.s32.totalorder %v6685_v22, %v7063_v49  ;;  %vm407_vm1 = vcmp.eq.s32.totalorder %v6685_v22, %v7067_v50 }
  0x53   :  { %5633 = vmatpush1.msk.msra.mxu0 %vm532_vm2, %v6526_v17  ;;  %5697 = vmatpush1.msk.msra.mxu1 %vm534_vm3, %v6526_v17  ;;  %vm404_vm2 = vcmp.eq.s32.totalorder %v6685_v22, %v7075_v51  ;;  %vm406_vm3 = vcmp.eq.s32.totalorder %v6685_v22, %v7079_v52 }
  0x54   :  { %5634 = vmatprep.subr.msk.mxu0 %vm501_vm4, %v6526_v17  ;;  %5698 = vmatprep.subr.msk.mxu1 %vm503_vm5, %v6526_v17  ;;  %vm373_vm4 = vcmp.eq.s32.totalorder %v6700_v23, %v7063_v49  ;;  %vm375_vm5 = vcmp.eq.s32.totalorder %v6700_v23, %v7067_v50 }
  0x55   :  { %5635 = vmatpush1.msk.msra.mxu0 %vm500_vm6, %v6526_v17  ;;  %5699 = vmatpush1.msk.msra.mxu1 %vm502_vm7, %v6526_v17  ;;  %vm372_vm6 = vcmp.eq.s32.totalorder %v6700_v23, %v7075_v51  ;;  %vm374_vm7 = vcmp.eq.s32.totalorder %v6700_v23, %v7079_v52 }
  0x56   :  { %5636 = vmatprep.subr.msk.mxu0 %vm469_vm8, %v6526_v17  ;;  %5700 = vmatprep.subr.msk.mxu1 %vm471_vm9, %v6526_v17  ;;  %vm341_vm8 = vcmp.eq.s32.totalorder %v6715_v24, %v7063_v49  ;;  %vm343_vm9 = vcmp.eq.s32.totalorder %v6715_v24, %v7067_v50 }
  0x57   :  { %5637 = vmatpush1.msk.msra.mxu0 %vm468_vm10, %v6526_v17  ;;  %5701 = vmatpush1.msk.msra.mxu1 %vm470_vm11, %v6526_v17  ;;  %vm340_vm10 = vcmp.eq.s32.totalorder %v6715_v24, %v7075_v51  ;;  %vm342_vm11 = vcmp.eq.s32.totalorder %v6715_v24, %v7079_v52 }
  0x58   :  { %5638 = vmatprep.subr.msk.mxu0 %vm437_vm12, %v6526_v17  ;;  %5702 = vmatprep.subr.msk.mxu1 %vm439_vm13, %v6526_v17  ;;  %vm309_vm12 = vcmp.eq.s32.totalorder %v6730_v25, %v7063_v49  ;;  %vm311_vm13 = vcmp.eq.s32.totalorder %v6730_v25, %v7067_v50 }
  0x59   :  { %5639 = vmatpush1.msk.msra.mxu0 %vm436_vm14, %v6526_v17  ;;  %5703 = vmatpush1.msk.msra.mxu1 %vm438_vm15, %v6526_v17  ;;  %vm308_vm14 = vcmp.eq.s32.totalorder %v6730_v25, %v7075_v51  ;;  %vm310_vm15 = vcmp.eq.s32.totalorder %v6730_v25, %v7079_v52 }
  0x5a   :  { %5640 = vmatprep.subr.msk.mxu0 %vm405_vm0, %v6526_v17  ;;  %5704 = vmatprep.subr.msk.mxu1 %vm407_vm1, %v6526_v17  ;;  %vm277_vm0 = vcmp.eq.s32.totalorder %v6745_v26, %v7063_v49  ;;  %vm279_vm1 = vcmp.eq.s32.totalorder %v6745_v26, %v7067_v50 }
  0x5b   :  { %5641 = vmatpush1.msk.msra.mxu0 %vm404_vm2, %v6526_v17  ;;  %5705 = vmatpush1.msk.msra.mxu1 %vm406_vm3, %v6526_v17  ;;  %vm276_vm2 = vcmp.eq.s32.totalorder %v6745_v26, %v7075_v51  ;;  %vm278_vm3 = vcmp.eq.s32.totalorder %v6745_v26, %v7079_v52 }
  0x5c   :  { %5642 = vmatprep.subr.msk.mxu0 %vm373_vm4, %v6526_v17  ;;  %5706 = vmatprep.subr.msk.mxu1 %vm375_vm5, %v6526_v17  ;;  %vm245_vm4 = vcmp.eq.s32.totalorder %v6760_v27, %v7063_v49  ;;  %vm247_vm5 = vcmp.eq.s32.totalorder %v6760_v27, %v7067_v50 }
  0x5d   :  { %5643 = vmatpush1.msk.msra.mxu0 %vm372_vm6, %v6526_v17  ;;  %5707 = vmatpush1.msk.msra.mxu1 %vm374_vm7, %v6526_v17  ;;  %vm244_vm6 = vcmp.eq.s32.totalorder %v6760_v27, %v7075_v51  ;;  %vm246_vm7 = vcmp.eq.s32.totalorder %v6760_v27, %v7079_v52 }
  0x5e   :  { %5644 = vmatprep.subr.msk.mxu0 %vm341_vm8, %v6526_v17  ;;  %5708 = vmatprep.subr.msk.mxu1 %vm343_vm9, %v6526_v17  ;;  %vm213_vm8 = vcmp.eq.s32.totalorder %v6775_v28, %v7063_v49  ;;  %vm215_vm9 = vcmp.eq.s32.totalorder %v6775_v28, %v7067_v50 }
  0x5f   :  { %5645 = vmatpush1.msk.msra.mxu0 %vm340_vm10, %v6526_v17  ;;  %5709 = vmatpush1.msk.msra.mxu1 %vm342_vm11, %v6526_v17  ;;  %vm212_vm10 = vcmp.eq.s32.totalorder %v6775_v28, %v7075_v51  ;;  %vm214_vm11 = vcmp.eq.s32.totalorder %v6775_v28, %v7079_v52 }
  0x60   :  { %5646 = vmatprep.subr.msk.mxu0 %vm309_vm12, %v6526_v17  ;;  %5710 = vmatprep.subr.msk.mxu1 %vm311_vm13, %v6526_v17  ;;  %vm181_vm12 = vcmp.eq.s32.totalorder %v6547_v2, %v7063_v49  ;;  %vm183_vm13 = vcmp.eq.s32.totalorder %v6547_v2, %v7067_v50 }
  0x61   :  { %5647 = vmatpush1.msk.msra.mxu0 %vm308_vm14, %v6526_v17  ;;  %5711 = vmatpush1.msk.msra.mxu1 %vm310_vm15, %v6526_v17  ;;  %vm180_vm14 = vcmp.eq.s32.totalorder %v6547_v2, %v7075_v51  ;;  %vm182_vm15 = vcmp.eq.s32.totalorder %v6547_v2, %v7079_v52 }
  0x62   :  { %5648 = vmatprep.subr.msk.mxu0 %vm277_vm0, %v6526_v17  ;;  %5712 = vmatprep.subr.msk.mxu1 %vm279_vm1, %v6526_v17  ;;  %vm1173_vm0 = vcmp.eq.s32.totalorder %v6802_v29, %v7063_v49  ;;  %vm1175_vm1 = vcmp.eq.s32.totalorder %v6802_v29, %v7067_v50 }
  0x63   :  { %5649 = vmatpush1.msk.msra.mxu0 %vm276_vm2, %v6526_v17  ;;  %5713 = vmatpush1.msk.msra.mxu1 %vm278_vm3, %v6526_v17  ;;  %vm1172_vm2 = vcmp.eq.s32.totalorder %v6802_v29, %v7075_v51  ;;  %vm1174_vm3 = vcmp.eq.s32.totalorder %v6802_v29, %v7079_v52 }
  0x64   :  { %5650 = vmatprep.subr.msk.mxu0 %vm245_vm4, %v6526_v17  ;;  %5714 = vmatprep.subr.msk.mxu1 %vm247_vm5, %v6526_v17  ;;  %vm1141_vm4 = vcmp.eq.s32.totalorder %v6817_v30, %v7063_v49  ;;  %vm1143_vm5 = vcmp.eq.s32.totalorder %v6817_v30, %v7067_v50 }
  0x65   :  { %5651 = vmatpush1.msk.msra.mxu0 %vm244_vm6, %v6526_v17  ;;  %5715 = vmatpush1.msk.msra.mxu1 %vm246_vm7, %v6526_v17  ;;  %vm1140_vm6 = vcmp.eq.s32.totalorder %v6817_v30, %v7075_v51  ;;  %vm1142_vm7 = vcmp.eq.s32.totalorder %v6817_v30, %v7079_v52 }
  0x66   :  { %5652 = vmatprep.subr.msk.mxu0 %vm213_vm8, %v6526_v17  ;;  %5716 = vmatprep.subr.msk.mxu1 %vm215_vm9, %v6526_v17  ;;  %vm1109_vm8 = vcmp.eq.s32.totalorder %v6832_v31, %v7063_v49  ;;  %vm1111_vm9 = vcmp.eq.s32.totalorder %v6832_v31, %v7067_v50 }
  0x67   :  { %5653 = vmatpush1.msk.msra.mxu0 %vm212_vm10, %v6526_v17  ;;  %5717 = vmatpush1.msk.msra.mxu1 %vm214_vm11, %v6526_v17  ;;  %vm1108_vm10 = vcmp.eq.s32.totalorder %v6832_v31, %v7075_v51  ;;  %vm1110_vm11 = vcmp.eq.s32.totalorder %v6832_v31, %v7079_v52 }
  0x68   :  { %5654 = vmatprep.subr.msk.mxu0 %vm181_vm12, %v6526_v17  ;;  %5718 = vmatprep.subr.msk.mxu1 %vm183_vm13, %v6526_v17  ;;  %vm1077_vm12 = vcmp.eq.s32.totalorder %v6847_v32, %v7063_v49  ;;  %vm1079_vm13 = vcmp.eq.s32.totalorder %v6847_v32, %v7067_v50 }
  0x69   :  { %5655 = vmatpush1.msk.msra.mxu0 %vm180_vm14, %v6526_v17  ;;  %5719 = vmatpush1.msk.msra.mxu1 %vm182_vm15, %v6526_v17  ;;  %vm1076_vm14 = vcmp.eq.s32.totalorder %v6847_v32, %v7075_v51  ;;  %vm1078_vm15 = vcmp.eq.s32.totalorder %v6847_v32, %v7079_v52 }
  0x6a   :  { %5656 = vmatprep.subr.msk.mxu0 %vm1173_vm0, %v6526_v17  ;;  %5720 = vmatprep.subr.msk.mxu1 %vm1175_vm1, %v6526_v17  ;;  %vm1045_vm0 = vcmp.eq.s32.totalorder %v6862_v33, %v7063_v49  ;;  %vm1047_vm1 = vcmp.eq.s32.totalorder %v6862_v33, %v7067_v50 }
  0x6b   :  { %5657 = vmatpush2.msk.msra.mxu0 %vm1172_vm2, %v6526_v17  ;;  %5721 = vmatpush2.msk.msra.mxu1 %vm1174_vm3, %v6526_v17  ;;  %vm1044_vm2 = vcmp.eq.s32.totalorder %v6862_v33, %v7075_v51  ;;  %vm1046_vm3 = vcmp.eq.s32.totalorder %v6862_v33, %v7079_v52 }
  0x6c   :  { %5658 = vmatprep.subr.msk.mxu0 %vm1141_vm4, %v6526_v17  ;;  %5722 = vmatprep.subr.msk.mxu1 %vm1143_vm5, %v6526_v17  ;;  %vm1013_vm4 = vcmp.eq.s32.totalorder %v6877_v34, %v7063_v49  ;;  %vm1015_vm5 = vcmp.eq.s32.totalorder %v6877_v34, %v7067_v50 }
  0x6d   :  { %5659 = vmatpush2.msk.msra.mxu0 %vm1140_vm6, %v6526_v17  ;;  %5723 = vmatpush2.msk.msra.mxu1 %vm1142_vm7, %v6526_v17  ;;  %vm1012_vm6 = vcmp.eq.s32.totalorder %v6877_v34, %v7075_v51  ;;  %vm1014_vm7 = vcmp.eq.s32.totalorder %v6877_v34, %v7079_v52 }
  0x6e   :  { %5660 = vmatprep.subr.msk.mxu0 %vm1109_vm8, %v6526_v17  ;;  %5724 = vmatprep.subr.msk.mxu1 %vm1111_vm9, %v6526_v17  ;;  %vm981_vm8 = vcmp.eq.s32.totalorder %v6892_v35, %v7063_v49  ;;  %vm983_vm9 = vcmp.eq.s32.totalorder %v6892_v35, %v7067_v50 }
  0x6f   :  { %5661 = vmatpush2.msk.msra.mxu0 %vm1108_vm10, %v6526_v17  ;;  %5725 = vmatpush2.msk.msra.mxu1 %vm1110_vm11, %v6526_v17  ;;  %vm980_vm10 = vcmp.eq.s32.totalorder %v6892_v35, %v7075_v51  ;;  %vm982_vm11 = vcmp.eq.s32.totalorder %v6892_v35, %v7079_v52 }
  0x70   :  { %5662 = vmatprep.subr.msk.mxu0 %vm1077_vm12, %v6526_v17  ;;  %5726 = vmatprep.subr.msk.mxu1 %vm1079_vm13, %v6526_v17  ;;  %vm949_vm12 = vcmp.eq.s32.totalorder %v6907_v36, %v7063_v49  ;;  %vm951_vm13 = vcmp.eq.s32.totalorder %v6907_v36, %v7067_v50 }
  0x71   :  { %5663 = vmatpush2.msk.msra.mxu0 %vm1076_vm14, %v6526_v17  ;;  %5727 = vmatpush2.msk.msra.mxu1 %vm1078_vm15, %v6526_v17  ;;  %vm948_vm14 = vcmp.eq.s32.totalorder %v6907_v36, %v7075_v51  ;;  %vm950_vm15 = vcmp.eq.s32.totalorder %v6907_v36, %v7079_v52 }
  0x72   :  { %5664 = vmatprep.subr.msk.mxu0 %vm1045_vm0, %v6526_v17  ;;  %5728 = vmatprep.subr.msk.mxu1 %vm1047_vm1, %v6526_v17  ;;  %vm917_vm0 = vcmp.eq.s32.totalorder %v6922_v37, %v7063_v49  ;;  %vm919_vm1 = vcmp.eq.s32.totalorder %v6922_v37, %v7067_v50 }
  0x73   :  { %5665 = vmatpush2.msk.msra.mxu0 %vm1044_vm2, %v6526_v17  ;;  %5729 = vmatpush2.msk.msra.mxu1 %vm1046_vm3, %v6526_v17  ;;  %vm916_vm2 = vcmp.eq.s32.totalorder %v6922_v37, %v7075_v51  ;;  %vm918_vm3 = vcmp.eq.s32.totalorder %v6922_v37, %v7079_v52 }
  0x74   :  { %5666 = vmatprep.subr.msk.mxu0 %vm1013_vm4, %v6526_v17  ;;  %5730 = vmatprep.subr.msk.mxu1 %vm1015_vm5, %v6526_v17  ;;  %vm885_vm4 = vcmp.eq.s32.totalorder %v6937_v38, %v7063_v49  ;;  %vm887_vm5 = vcmp.eq.s32.totalorder %v6937_v38, %v7067_v50 }
  0x75   :  { %5667 = vmatpush2.msk.msra.mxu0 %vm1012_vm6, %v6526_v17  ;;  %5731 = vmatpush2.msk.msra.mxu1 %vm1014_vm7, %v6526_v17  ;;  %vm884_vm6 = vcmp.eq.s32.totalorder %v6937_v38, %v7075_v51  ;;  %vm886_vm7 = vcmp.eq.s32.totalorder %v6937_v38, %v7079_v52 }
  0x76   :  { %5668 = vmatprep.subr.msk.mxu0 %vm981_vm8, %v6526_v17  ;;  %5732 = vmatprep.subr.msk.mxu1 %vm983_vm9, %v6526_v17  ;;  %vm853_vm8 = vcmp.eq.s32.totalorder %v6952_v39, %v7063_v49  ;;  %vm855_vm9 = vcmp.eq.s32.totalorder %v6952_v39, %v7067_v50 }
  0x77   :  { %5669 = vmatpush2.msk.msra.mxu0 %vm980_vm10, %v6526_v17  ;;  %5733 = vmatpush2.msk.msra.mxu1 %vm982_vm11, %v6526_v17  ;;  %vm852_vm10 = vcmp.eq.s32.totalorder %v6952_v39, %v7075_v51  ;;  %vm854_vm11 = vcmp.eq.s32.totalorder %v6952_v39, %v7079_v52 }
  0x78   :  { %5670 = vmatprep.subr.msk.mxu0 %vm949_vm12, %v6526_v17  ;;  %5734 = vmatprep.subr.msk.mxu1 %vm951_vm13, %v6526_v17  ;;  %vm821_vm12 = vcmp.eq.s32.totalorder %v6967_v40, %v7063_v49  ;;  %vm823_vm13 = vcmp.eq.s32.totalorder %v6967_v40, %v7067_v50 }
  0x79   :  { %5671 = vmatpush2.msk.msra.mxu0 %vm948_vm14, %v6526_v17  ;;  %5735 = vmatpush2.msk.msra.mxu1 %vm950_vm15, %v6526_v17  ;;  %vm820_vm14 = vcmp.eq.s32.totalorder %v6967_v40, %v7075_v51  ;;  %vm822_vm15 = vcmp.eq.s32.totalorder %v6967_v40, %v7079_v52 }
  0x7a   :  { %5672 = vmatprep.subr.msk.mxu0 %vm917_vm0, %v6526_v17  ;;  %5736 = vmatprep.subr.msk.mxu1 %vm919_vm1, %v6526_v17  ;;  %vm789_vm0 = vcmp.eq.s32.totalorder %v6982_v41, %v7063_v49  ;;  %vm791_vm1 = vcmp.eq.s32.totalorder %v6982_v41, %v7067_v50 }
  0x7b   :  { %5673 = vmatpush2.msk.msra.mxu0 %vm916_vm2, %v6526_v17  ;;  %5737 = vmatpush2.msk.msra.mxu1 %vm918_vm3, %v6526_v17  ;;  %vm788_vm2 = vcmp.eq.s32.totalorder %v6982_v41, %v7075_v51  ;;  %vm790_vm3 = vcmp.eq.s32.totalorder %v6982_v41, %v7079_v52 }
  0x7c   :  { %5674 = vmatprep.subr.msk.mxu0 %vm885_vm4, %v6526_v17  ;;  %5738 = vmatprep.subr.msk.mxu1 %vm887_vm5, %v6526_v17  ;;  %vm757_vm4 = vcmp.eq.s32.totalorder %v6997_v42, %v7063_v49  ;;  %vm759_vm5 = vcmp.eq.s32.totalorder %v6997_v42, %v7067_v50 }
  0x7d   :  { %5675 = vmatpush2.msk.msra.mxu0 %vm884_vm6, %v6526_v17  ;;  %5739 = vmatpush2.msk.msra.mxu1 %vm886_vm7, %v6526_v17  ;;  %vm756_vm6 = vcmp.eq.s32.totalorder %v6997_v42, %v7075_v51  ;;  %vm758_vm7 = vcmp.eq.s32.totalorder %v6997_v42, %v7079_v52 }
  0x7e   :  { %5676 = vmatprep.subr.msk.mxu0 %vm853_vm8, %v6526_v17  ;;  %5740 = vmatprep.subr.msk.mxu1 %vm855_vm9, %v6526_v17  ;;  %vm725_vm8 = vcmp.eq.s32.totalorder %v7006_v43, %v7063_v49  ;;  %vm727_vm9 = vcmp.eq.s32.totalorder %v7006_v43, %v7067_v50 }
  0x7f   :  { %5677 = vmatpush2.msk.msra.mxu0 %vm852_vm10, %v6526_v17  ;;  %5741 = vmatpush2.msk.msra.mxu1 %vm854_vm11, %v6526_v17  ;;  %vm724_vm10 = vcmp.eq.s32.totalorder %v7006_v43, %v7075_v51  ;;  %vm726_vm11 = vcmp.eq.s32.totalorder %v7006_v43, %v7079_v52 }
  0x80   :  { %5678 = vmatprep.subr.msk.mxu0 %vm821_vm12, %v6526_v17  ;;  %5742 = vmatprep.subr.msk.mxu1 %vm823_vm13, %v6526_v17  ;;  %vm693_vm12 = vcmp.eq.s32.totalorder %v7015_v44, %v7063_v49  ;;  %vm695_vm13 = vcmp.eq.s32.totalorder %v7015_v44, %v7067_v50 }
  0x81   :  { %5679 = vmatpush2.msk.msra.mxu0 %vm820_vm14, %v6526_v17  ;;  %5743 = vmatpush2.msk.msra.mxu1 %vm822_vm15, %v6526_v17  ;;  %vm692_vm14 = vcmp.eq.s32.totalorder %v7015_v44, %v7075_v51  ;;  %vm694_vm15 = vcmp.eq.s32.totalorder %v7015_v44, %v7079_v52  ;;  %v8352_v52 = vld [vmem:[%s10020_s0] sm:$0xff] }
  0x82   :  { %5680 = vmatprep.subr.msk.mxu0 %vm789_vm0, %v6526_v17  ;;  %5744 = vmatprep.subr.msk.mxu1 %vm791_vm1, %v6526_v17  ;;  %vm665_vm0 = vcmp.eq.s32.totalorder %v6559_v5, %v7477_v54  ;;  %vm667_vm1 = vcmp.eq.s32.totalorder %v6559_v5, %v7487_v55 }
  0x83   :  { %5681 = vmatpush2.msk.msra.mxu0 %vm788_vm2, %v6526_v17  ;;  %5745 = vmatpush2.msk.msra.mxu1 %vm790_vm3, %v6526_v17  ;;  %vm664_vm2 = vcmp.eq.s32.totalorder %v6559_v5, %v7495_v56  ;;  %vm666_vm3 = vcmp.eq.s32.totalorder %v6559_v5, %v7499_v57 }
  0x84   :  { %5682 = vmatprep.subr.msk.mxu0 %vm757_vm4, %v6526_v17  ;;  %5746 = vmatprep.subr.msk.mxu1 %vm759_vm5, %v6526_v17  ;;  %vm633_vm4 = vcmp.eq.s32.totalorder %v6576_v10, %v7477_v54  ;;  %vm635_vm5 = vcmp.eq.s32.totalorder %v6576_v10, %v7487_v55 }
  0x85   :  { %5683 = vmatpush2.msk.msra.mxu0 %vm756_vm6, %v6526_v17  ;;  %5747 = vmatpush2.msk.msra.mxu1 %vm758_vm7, %v6526_v17  ;;  %vm632_vm6 = vcmp.eq.s32.totalorder %v6576_v10, %v7495_v56  ;;  %vm634_vm7 = vcmp.eq.s32.totalorder %v6576_v10, %v7499_v57 }
  0x86   :  { %5684 = vmatprep.subr.msk.mxu0 %vm725_vm8, %v6526_v17  ;;  %5748 = vmatprep.subr.msk.mxu1 %vm727_vm9, %v6526_v17  ;;  %vm601_vm8 = vcmp.eq.s32.totalorder %v6591_v14, %v7477_v54  ;;  %vm603_vm9 = vcmp.eq.s32.totalorder %v6591_v14, %v7487_v55 }
  0x87   :  { %5685 = vmatpush2.msk.msra.mxu0 %vm724_vm10, %v6526_v17  ;;  %5749 = vmatpush2.msk.msra.mxu1 %vm726_vm11, %v6526_v17  ;;  %vm600_vm10 = vcmp.eq.s32.totalorder %v6591_v14, %v7495_v56  ;;  %vm602_vm11 = vcmp.eq.s32.totalorder %v6591_v14, %v7499_v57 }
  0x88   :  { %5686 = vmatprep.subr.msk.mxu0 %vm693_vm12, %v6526_v17  ;;  %5750 = vmatprep.subr.msk.mxu1 %vm695_vm13, %v6526_v17  ;;  %vm569_vm12 = vcmp.eq.s32.totalorder %v6598_v16, %v7477_v54  ;;  %vm571_vm13 = vcmp.eq.s32.totalorder %v6598_v16, %v7487_v55 }
  0x89   :  { %5687 = vmatpush2.msk.msra.mxu0 %vm692_vm14, %v6526_v17  ;;  %3458 = vmatprep.mubr.f32.mxu0 %v6551_v3  ;;  %vm568_vm14 = vcmp.eq.s32.totalorder %v6598_v16, %v7495_v56 }
  0x8a   :  { %5751 = vmatpush2.msk.msra.mxu1 %vm694_vm15, %v6526_v17  ;;  %3529 = vmatprep.mubr.f32.mxu1 %v6551_v3  ;;  %vm570_vm15 = vcmp.eq.s32.totalorder %v6598_v16, %v7499_v57 }
  0x8b   :  { %3459 = vmatmul.mubr.f32.vlgmr.msra.gmra.mxu0 %v7522_v58  ;;  %3530 = vmatmul.mubr.f32.vlgmr.msra.gmra.mxu1 %v7522_v58 }
  0x8c   :  { %5752 = vmatprep.subr.msk.mxu0 %vm665_vm0, %v6526_v17  ;;  %5816 = vmatprep.subr.msk.mxu1 %vm667_vm1, %v6526_v17  ;;  %vm537_vm0 = vcmp.eq.s32.totalorder %v6625_v18, %v7477_v54  ;;  %vm539_vm1 = vcmp.eq.s32.totalorder %v6625_v18, %v7487_v55 }
  0x8d   :  { %5753 = vmatpush1.msk.msra.mxu0 %vm664_vm2, %v6526_v17  ;;  %5817 = vmatpush1.msk.msra.mxu1 %vm666_vm3, %v6526_v17  ;;  %vm536_vm2 = vcmp.eq.s32.totalorder %v6625_v18, %v7495_v56  ;;  %vm538_vm3 = vcmp.eq.s32.totalorder %v6625_v18, %v7499_v57 }
  0x8e   :  { %5754 = vmatprep.subr.msk.mxu0 %vm633_vm4, %v6526_v17  ;;  %5818 = vmatprep.subr.msk.mxu1 %vm635_vm5, %v6526_v17  ;;  %vm505_vm4 = vcmp.eq.s32.totalorder %v6640_v19, %v7477_v54  ;;  %vm507_vm5 = vcmp.eq.s32.totalorder %v6640_v19, %v7487_v55 }
  0x8f   :  { %5755 = vmatpush1.msk.msra.mxu0 %vm632_vm6, %v6526_v17  ;;  %5819 = vmatpush1.msk.msra.mxu1 %vm634_vm7, %v6526_v17  ;;  %vm504_vm6 = vcmp.eq.s32.totalorder %v6640_v19, %v7495_v56  ;;  %vm506_vm7 = vcmp.eq.s32.totalorder %v6640_v19, %v7499_v57 }
  0x90   :  { %5756 = vmatprep.subr.msk.mxu0 %vm601_vm8, %v6526_v17  ;;  %5820 = vmatprep.subr.msk.mxu1 %vm603_vm9, %v6526_v17  ;;  %vm473_vm8 = vcmp.eq.s32.totalorder %v6655_v20, %v7477_v54  ;;  %vm475_vm9 = vcmp.eq.s32.totalorder %v6655_v20, %v7487_v55 }
  0x91   :  { %5757 = vmatpush1.msk.msra.mxu0 %vm600_vm10, %v6526_v17  ;;  %5821 = vmatpush1.msk.msra.mxu1 %vm602_vm11, %v6526_v17  ;;  %vm472_vm10 = vcmp.eq.s32.totalorder %v6655_v20, %v7495_v56  ;;  %vm474_vm11 = vcmp.eq.s32.totalorder %v6655_v20, %v7499_v57 }
  0x92   :  { %5758 = vmatprep.subr.msk.mxu0 %vm569_vm12, %v6526_v17  ;;  %5822 = vmatprep.subr.msk.mxu1 %vm571_vm13, %v6526_v17  ;;  %vm441_vm12 = vcmp.eq.s32.totalorder %v6670_v21, %v7477_v54  ;;  %vm443_vm13 = vcmp.eq.s32.totalorder %v6670_v21, %v7487_v55 }
  0x93   :  { %5759 = vmatpush1.msk.msra.mxu0 %vm568_vm14, %v6526_v17  ;;  %5823 = vmatpush1.msk.msra.mxu1 %vm570_vm15, %v6526_v17  ;;  %vm440_vm14 = vcmp.eq.s32.totalorder %v6670_v21, %v7495_v56  ;;  %vm442_vm15 = vcmp.eq.s32.totalorder %v6670_v21, %v7499_v57 }
  0x94   :  { %5760 = vmatprep.subr.msk.mxu0 %vm537_vm0, %v6526_v17  ;;  %5824 = vmatprep.subr.msk.mxu1 %vm539_vm1, %v6526_v17  ;;  %vm409_vm0 = vcmp.eq.s32.totalorder %v6685_v22, %v7477_v54  ;;  %vm411_vm1 = vcmp.eq.s32.totalorder %v6685_v22, %v7487_v55 }
  0x95   :  { %5761 = vmatpush1.msk.msra.mxu0 %vm536_vm2, %v6526_v17  ;;  %5825 = vmatpush1.msk.msra.mxu1 %vm538_vm3, %v6526_v17  ;;  %vm408_vm2 = vcmp.eq.s32.totalorder %v6685_v22, %v7495_v56  ;;  %vm410_vm3 = vcmp.eq.s32.totalorder %v6685_v22, %v7499_v57 }
  0x96   :  { %5762 = vmatprep.subr.msk.mxu0 %vm505_vm4, %v6526_v17  ;;  %5826 = vmatprep.subr.msk.mxu1 %vm507_vm5, %v6526_v17  ;;  %vm377_vm4 = vcmp.eq.s32.totalorder %v6700_v23, %v7477_v54  ;;  %vm379_vm5 = vcmp.eq.s32.totalorder %v6700_v23, %v7487_v55 }
  0x97   :  { %5763 = vmatpush1.msk.msra.mxu0 %vm504_vm6, %v6526_v17  ;;  %5827 = vmatpush1.msk.msra.mxu1 %vm506_vm7, %v6526_v17  ;;  %vm376_vm6 = vcmp.eq.s32.totalorder %v6700_v23, %v7495_v56  ;;  %vm378_vm7 = vcmp.eq.s32.totalorder %v6700_v23, %v7499_v57 }
  0x98   :  { %5764 = vmatprep.subr.msk.mxu0 %vm473_vm8, %v6526_v17  ;;  %5828 = vmatprep.subr.msk.mxu1 %vm475_vm9, %v6526_v17  ;;  %vm345_vm8 = vcmp.eq.s32.totalorder %v6715_v24, %v7477_v54  ;;  %vm347_vm9 = vcmp.eq.s32.totalorder %v6715_v24, %v7487_v55 }
  0x99   :  { %5765 = vmatpush1.msk.msra.mxu0 %vm472_vm10, %v6526_v17  ;;  %5829 = vmatpush1.msk.msra.mxu1 %vm474_vm11, %v6526_v17  ;;  %vm344_vm10 = vcmp.eq.s32.totalorder %v6715_v24, %v7495_v56  ;;  %vm346_vm11 = vcmp.eq.s32.totalorder %v6715_v24, %v7499_v57 }
  0x9a   :  { %5766 = vmatprep.subr.msk.mxu0 %vm441_vm12, %v6526_v17  ;;  %5830 = vmatprep.subr.msk.mxu1 %vm443_vm13, %v6526_v17  ;;  %vm313_vm12 = vcmp.eq.s32.totalorder %v6730_v25, %v7477_v54  ;;  %vm315_vm13 = vcmp.eq.s32.totalorder %v6730_v25, %v7487_v55 }
  0x9b   :  { %5767 = vmatpush1.msk.msra.mxu0 %vm440_vm14, %v6526_v17  ;;  %5831 = vmatpush1.msk.msra.mxu1 %vm442_vm15, %v6526_v17  ;;  %vm312_vm14 = vcmp.eq.s32.totalorder %v6730_v25, %v7495_v56  ;;  %vm314_vm15 = vcmp.eq.s32.totalorder %v6730_v25, %v7499_v57 }
  0x9c   :  { %5768 = vmatprep.subr.msk.mxu0 %vm409_vm0, %v6526_v17  ;;  %5832 = vmatprep.subr.msk.mxu1 %vm411_vm1, %v6526_v17  ;;  %vm281_vm0 = vcmp.eq.s32.totalorder %v6745_v26, %v7477_v54  ;;  %vm283_vm1 = vcmp.eq.s32.totalorder %v6745_v26, %v7487_v55 }
  0x9d   :  { %5769 = vmatpush1.msk.msra.mxu0 %vm408_vm2, %v6526_v17  ;;  %5833 = vmatpush1.msk.msra.mxu1 %vm410_vm3, %v6526_v17  ;;  %vm280_vm2 = vcmp.eq.s32.totalorder %v6745_v26, %v7495_v56  ;;  %vm282_vm3 = vcmp.eq.s32.totalorder %v6745_v26, %v7499_v57 }
  0x9e   :  { %5770 = vmatprep.subr.msk.mxu0 %vm377_vm4, %v6526_v17  ;;  %5834 = vmatprep.subr.msk.mxu1 %vm379_vm5, %v6526_v17  ;;  %vm249_vm4 = vcmp.eq.s32.totalorder %v6760_v27, %v7477_v54  ;;  %vm251_vm5 = vcmp.eq.s32.totalorder %v6760_v27, %v7487_v55 }
  0x9f   :  { %5771 = vmatpush1.msk.msra.mxu0 %vm376_vm6, %v6526_v17  ;;  %5835 = vmatpush1.msk.msra.mxu1 %vm378_vm7, %v6526_v17  ;;  %vm248_vm6 = vcmp.eq.s32.totalorder %v6760_v27, %v7495_v56  ;;  %vm250_vm7 = vcmp.eq.s32.totalorder %v6760_v27, %v7499_v57 }
  0xa0   :  { %5772 = vmatprep.subr.msk.mxu0 %vm345_vm8, %v6526_v17  ;;  %5836 = vmatprep.subr.msk.mxu1 %vm347_vm9, %v6526_v17  ;;  %vm217_vm8 = vcmp.eq.s32.totalorder %v6775_v28, %v7477_v54  ;;  %vm219_vm9 = vcmp.eq.s32.totalorder %v6775_v28, %v7487_v55 }
  0xa1   :  { %5773 = vmatpush1.msk.msra.mxu0 %vm344_vm10, %v6526_v17  ;;  %5837 = vmatpush1.msk.msra.mxu1 %vm346_vm11, %v6526_v17  ;;  %vm216_vm10 = vcmp.eq.s32.totalorder %v6775_v28, %v7495_v56  ;;  %vm218_vm11 = vcmp.eq.s32.totalorder %v6775_v28, %v7499_v57 }
  0xa2   :  { %5774 = vmatprep.subr.msk.mxu0 %vm313_vm12, %v6526_v17  ;;  %5838 = vmatprep.subr.msk.mxu1 %vm315_vm13, %v6526_v17  ;;  %vm185_vm12 = vcmp.eq.s32.totalorder %v6547_v2, %v7477_v54  ;;  %vm187_vm13 = vcmp.eq.s32.totalorder %v6547_v2, %v7487_v55 }
  0xa3   :  { %5775 = vmatpush1.msk.msra.mxu0 %vm312_vm14, %v6526_v17  ;;  %5839 = vmatpush1.msk.msra.mxu1 %vm314_vm15, %v6526_v17  ;;  %vm184_vm14 = vcmp.eq.s32.totalorder %v6547_v2, %v7495_v56  ;;  %vm186_vm15 = vcmp.eq.s32.totalorder %v6547_v2, %v7499_v57 }
  0xa4   :  { %5776 = vmatprep.subr.msk.mxu0 %vm281_vm0, %v6526_v17  ;;  %5840 = vmatprep.subr.msk.mxu1 %vm283_vm1, %v6526_v17  ;;  %vm1177_vm0 = vcmp.eq.s32.totalorder %v6802_v29, %v7477_v54  ;;  %vm1179_vm1 = vcmp.eq.s32.totalorder %v6802_v29, %v7487_v55 }
  0xa5   :  { %5777 = vmatpush1.msk.msra.mxu0 %vm280_vm2, %v6526_v17  ;;  %5841 = vmatpush1.msk.msra.mxu1 %vm282_vm3, %v6526_v17  ;;  %vm1176_vm2 = vcmp.eq.s32.totalorder %v6802_v29, %v7495_v56  ;;  %vm1178_vm3 = vcmp.eq.s32.totalorder %v6802_v29, %v7499_v57 }
  0xa6   :  { %5778 = vmatprep.subr.msk.mxu0 %vm249_vm4, %v6526_v17  ;;  %5842 = vmatprep.subr.msk.mxu1 %vm251_vm5, %v6526_v17  ;;  %vm1145_vm4 = vcmp.eq.s32.totalorder %v6817_v30, %v7477_v54  ;;  %vm1147_vm5 = vcmp.eq.s32.totalorder %v6817_v30, %v7487_v55 }
  0xa7   :  { %5779 = vmatpush1.msk.msra.mxu0 %vm248_vm6, %v6526_v17  ;;  %5843 = vmatpush1.msk.msra.mxu1 %vm250_vm7, %v6526_v17  ;;  %vm1144_vm6 = vcmp.eq.s32.totalorder %v6817_v30, %v7495_v56  ;;  %vm1146_vm7 = vcmp.eq.s32.totalorder %v6817_v30, %v7499_v57 }
  0xa8   :  { %5780 = vmatprep.subr.msk.mxu0 %vm217_vm8, %v6526_v17  ;;  %5844 = vmatprep.subr.msk.mxu1 %vm219_vm9, %v6526_v17  ;;  %vm1113_vm8 = vcmp.eq.s32.totalorder %v6832_v31, %v7477_v54  ;;  %vm1115_vm9 = vcmp.eq.s32.totalorder %v6832_v31, %v7487_v55 }
  0xa9   :  { %5781 = vmatpush1.msk.msra.mxu0 %vm216_vm10, %v6526_v17  ;;  %5845 = vmatpush1.msk.msra.mxu1 %vm218_vm11, %v6526_v17  ;;  %vm1112_vm10 = vcmp.eq.s32.totalorder %v6832_v31, %v7495_v56  ;;  %vm1114_vm11 = vcmp.eq.s32.totalorder %v6832_v31, %v7499_v57 }
  0xaa   :  { %5782 = vmatprep.subr.msk.mxu0 %vm185_vm12, %v6526_v17  ;;  %5846 = vmatprep.subr.msk.mxu1 %vm187_vm13, %v6526_v17  ;;  %vm1081_vm12 = vcmp.eq.s32.totalorder %v6847_v32, %v7477_v54  ;;  %vm1083_vm13 = vcmp.eq.s32.totalorder %v6847_v32, %v7487_v55 }
  0xab   :  { %5783 = vmatpush1.msk.msra.mxu0 %vm184_vm14, %v6526_v17  ;;  %5847 = vmatpush1.msk.msra.mxu1 %vm186_vm15, %v6526_v17  ;;  %vm1080_vm14 = vcmp.eq.s32.totalorder %v6847_v32, %v7495_v56  ;;  %vm1082_vm15 = vcmp.eq.s32.totalorder %v6847_v32, %v7499_v57 }
  0xac   :  { %5784 = vmatprep.subr.msk.mxu0 %vm1177_vm0, %v6526_v17  ;;  %5848 = vmatprep.subr.msk.mxu1 %vm1179_vm1, %v6526_v17  ;;  %vm1049_vm0 = vcmp.eq.s32.totalorder %v6862_v33, %v7477_v54  ;;  %vm1051_vm1 = vcmp.eq.s32.totalorder %v6862_v33, %v7487_v55 }
  0xad   :  { %5785 = vmatpush2.msk.msra.mxu0 %vm1176_vm2, %v6526_v17  ;;  %5849 = vmatpush2.msk.msra.mxu1 %vm1178_vm3, %v6526_v17  ;;  %vm1048_vm2 = vcmp.eq.s32.totalorder %v6862_v33, %v7495_v56  ;;  %vm1050_vm3 = vcmp.eq.s32.totalorder %v6862_v33, %v7499_v57 }
  0xae   :  { %5786 = vmatprep.subr.msk.mxu0 %vm1145_vm4, %v6526_v17  ;;  %5850 = vmatprep.subr.msk.mxu1 %vm1147_vm5, %v6526_v17  ;;  %vm1017_vm4 = vcmp.eq.s32.totalorder %v6877_v34, %v7477_v54  ;;  %vm1019_vm5 = vcmp.eq.s32.totalorder %v6877_v34, %v7487_v55 }
  0xaf   :  { %5787 = vmatpush2.msk.msra.mxu0 %vm1144_vm6, %v6526_v17  ;;  %5851 = vmatpush2.msk.msra.mxu1 %vm1146_vm7, %v6526_v17  ;;  %vm1016_vm6 = vcmp.eq.s32.totalorder %v6877_v34, %v7495_v56  ;;  %vm1018_vm7 = vcmp.eq.s32.totalorder %v6877_v34, %v7499_v57 }
  0xb0   :  { %5788 = vmatprep.subr.msk.mxu0 %vm1113_vm8, %v6526_v17  ;;  %5852 = vmatprep.subr.msk.mxu1 %vm1115_vm9, %v6526_v17  ;;  %vm985_vm8 = vcmp.eq.s32.totalorder %v6892_v35, %v7477_v54  ;;  %vm987_vm9 = vcmp.eq.s32.totalorder %v6892_v35, %v7487_v55 }
  0xb1   :  { %5789 = vmatpush2.msk.msra.mxu0 %vm1112_vm10, %v6526_v17  ;;  %5853 = vmatpush2.msk.msra.mxu1 %vm1114_vm11, %v6526_v17  ;;  %vm984_vm10 = vcmp.eq.s32.totalorder %v6892_v35, %v7495_v56  ;;  %vm986_vm11 = vcmp.eq.s32.totalorder %v6892_v35, %v7499_v57 }
  0xb2   :  { %5790 = vmatprep.subr.msk.mxu0 %vm1081_vm12, %v6526_v17  ;;  %5854 = vmatprep.subr.msk.mxu1 %vm1083_vm13, %v6526_v17  ;;  %vm953_vm12 = vcmp.eq.s32.totalorder %v6907_v36, %v7477_v54  ;;  %vm955_vm13 = vcmp.eq.s32.totalorder %v6907_v36, %v7487_v55 }
  0xb3   :  { %5791 = vmatpush2.msk.msra.mxu0 %vm1080_vm14, %v6526_v17  ;;  %5855 = vmatpush2.msk.msra.mxu1 %vm1082_vm15, %v6526_v17  ;;  %vm952_vm14 = vcmp.eq.s32.totalorder %v6907_v36, %v7495_v56  ;;  %vm954_vm15 = vcmp.eq.s32.totalorder %v6907_v36, %v7499_v57 }
  0xb4   :  { %5792 = vmatprep.subr.msk.mxu0 %vm1049_vm0, %v6526_v17  ;;  %5856 = vmatprep.subr.msk.mxu1 %vm1051_vm1, %v6526_v17  ;;  %vm921_vm0 = vcmp.eq.s32.totalorder %v6922_v37, %v7477_v54  ;;  %vm923_vm1 = vcmp.eq.s32.totalorder %v6922_v37, %v7487_v55 }
  0xb5   :  { %5793 = vmatpush2.msk.msra.mxu0 %vm1048_vm2, %v6526_v17  ;;  %5857 = vmatpush2.msk.msra.mxu1 %vm1050_vm3, %v6526_v17  ;;  %vm920_vm2 = vcmp.eq.s32.totalorder %v6922_v37, %v7495_v56  ;;  %vm922_vm3 = vcmp.eq.s32.totalorder %v6922_v37, %v7499_v57 }
  0xb6   :  { %5794 = vmatprep.subr.msk.mxu0 %vm1017_vm4, %v6526_v17  ;;  %5858 = vmatprep.subr.msk.mxu1 %vm1019_vm5, %v6526_v17  ;;  %vm889_vm4 = vcmp.eq.s32.totalorder %v6937_v38, %v7477_v54  ;;  %vm891_vm5 = vcmp.eq.s32.totalorder %v6937_v38, %v7487_v55 }
  0xb7   :  { %5795 = vmatpush2.msk.msra.mxu0 %vm1016_vm6, %v6526_v17  ;;  %5859 = vmatpush2.msk.msra.mxu1 %vm1018_vm7, %v6526_v17  ;;  %vm888_vm6 = vcmp.eq.s32.totalorder %v6937_v38, %v7495_v56  ;;  %vm890_vm7 = vcmp.eq.s32.totalorder %v6937_v38, %v7499_v57 }
  0xb8   :  { %5796 = vmatprep.subr.msk.mxu0 %vm985_vm8, %v6526_v17  ;;  %5860 = vmatprep.subr.msk.mxu1 %vm987_vm9, %v6526_v17  ;;  %vm857_vm8 = vcmp.eq.s32.totalorder %v6952_v39, %v7477_v54  ;;  %vm859_vm9 = vcmp.eq.s32.totalorder %v6952_v39, %v7487_v55 }
  0xb9   :  { %5797 = vmatpush2.msk.msra.mxu0 %vm984_vm10, %v6526_v17  ;;  %5861 = vmatpush2.msk.msra.mxu1 %vm986_vm11, %v6526_v17  ;;  %vm856_vm10 = vcmp.eq.s32.totalorder %v6952_v39, %v7495_v56  ;;  %vm858_vm11 = vcmp.eq.s32.totalorder %v6952_v39, %v7499_v57 }
  0xba   :  { %5798 = vmatprep.subr.msk.mxu0 %vm953_vm12, %v6526_v17  ;;  %5862 = vmatprep.subr.msk.mxu1 %vm955_vm13, %v6526_v17  ;;  %vm825_vm12 = vcmp.eq.s32.totalorder %v6967_v40, %v7477_v54  ;;  %vm827_vm13 = vcmp.eq.s32.totalorder %v6967_v40, %v7487_v55 }
  0xbb   :  { %5799 = vmatpush2.msk.msra.mxu0 %vm952_vm14, %v6526_v17  ;;  %5863 = vmatpush2.msk.msra.mxu1 %vm954_vm15, %v6526_v17  ;;  %vm824_vm14 = vcmp.eq.s32.totalorder %v6967_v40, %v7495_v56  ;;  %vm826_vm15 = vcmp.eq.s32.totalorder %v6967_v40, %v7499_v57 }
  0xbc   :  { %5800 = vmatprep.subr.msk.mxu0 %vm921_vm0, %v6526_v17  ;;  %5864 = vmatprep.subr.msk.mxu1 %vm923_vm1, %v6526_v17  ;;  %vm793_vm0 = vcmp.eq.s32.totalorder %v6982_v41, %v7477_v54  ;;  %vm795_vm1 = vcmp.eq.s32.totalorder %v6982_v41, %v7487_v55 }
  0xbd   :  { %5801 = vmatpush2.msk.msra.mxu0 %vm920_vm2, %v6526_v17  ;;  %5865 = vmatpush2.msk.msra.mxu1 %vm922_vm3, %v6526_v17  ;;  %vm792_vm2 = vcmp.eq.s32.totalorder %v6982_v41, %v7495_v56  ;;  %vm794_vm3 = vcmp.eq.s32.totalorder %v6982_v41, %v7499_v57 }
  0xbe   :  { %5802 = vmatprep.subr.msk.mxu0 %vm889_vm4, %v6526_v17  ;;  %5866 = vmatprep.subr.msk.mxu1 %vm891_vm5, %v6526_v17  ;;  %vm761_vm4 = vcmp.eq.s32.totalorder %v6997_v42, %v7477_v54  ;;  %vm763_vm5 = vcmp.eq.s32.totalorder %v6997_v42, %v7487_v55 }
  0xbf   :  { %5803 = vmatpush2.msk.msra.mxu0 %vm888_vm6, %v6526_v17  ;;  %5867 = vmatpush2.msk.msra.mxu1 %vm890_vm7, %v6526_v17  ;;  %vm760_vm6 = vcmp.eq.s32.totalorder %v6997_v42, %v7495_v56  ;;  %vm762_vm7 = vcmp.eq.s32.totalorder %v6997_v42, %v7499_v57 }
  0xc0   :  { %5804 = vmatprep.subr.msk.mxu0 %vm857_vm8, %v6526_v17  ;;  %5868 = vmatprep.subr.msk.mxu1 %vm859_vm9, %v6526_v17  ;;  %vm729_vm8 = vcmp.eq.s32.totalorder %v7006_v43, %v7477_v54  ;;  %vm731_vm9 = vcmp.eq.s32.totalorder %v7006_v43, %v7487_v55 }
  0xc1   :  { %5805 = vmatpush2.msk.msra.mxu0 %vm856_vm10, %v6526_v17  ;;  %5869 = vmatpush2.msk.msra.mxu1 %vm858_vm11, %v6526_v17  ;;  %vm728_vm10 = vcmp.eq.s32.totalorder %v7006_v43, %v7495_v56  ;;  %vm730_vm11 = vcmp.eq.s32.totalorder %v7006_v43, %v7499_v57 }
  0xc2   :  { %5806 = vmatprep.subr.msk.mxu0 %vm825_vm12, %v6526_v17  ;;  %5870 = vmatprep.subr.msk.mxu1 %vm827_vm13, %v6526_v17  ;;  %vm697_vm12 = vcmp.eq.s32.totalorder %v7015_v44, %v7477_v54  ;;  %vm699_vm13 = vcmp.eq.s32.totalorder %v7015_v44, %v7487_v55  ;;  %v8722_v55 = vrot.slane %v8279_v63, %v7024_v45 }
  0xc3   :  { %5807 = vmatpush2.msk.msra.mxu0 %vm824_vm14, %v6526_v17  ;;  %5871 = vmatpush2.msk.msra.mxu1 %vm826_vm15, %v6526_v17  ;;  %vm696_vm14 = vcmp.eq.s32.totalorder %v7015_v44, %v7495_v56  ;;  %vm698_vm15 = vcmp.eq.s32.totalorder %v7015_v44, %v7499_v57  ;;  %v8726_v56 = vrot.slane %v8279_v63, %v7027_v46 }
  0xc4   :  { %5808 = vmatprep.subr.msk.mxu0 %vm793_vm0, %v6526_v17  ;;  %5872 = vmatprep.subr.msk.mxu1 %vm795_vm1, %v6526_v17  ;;  %vm669_vm0 = vcmp.eq.s32.totalorder %v6559_v5, %v7892_v59  ;;  %vm671_vm1 = vcmp.eq.s32.totalorder %v6559_v5, %v7896_v60  ;;  %v8734_v57 = vrot.slane %v8279_v63, %v7036_v47 }
  0xc5   :  { %5809 = vmatpush2.msk.msra.mxu0 %vm792_vm2, %v6526_v17  ;;  %5873 = vmatpush2.msk.msra.mxu1 %vm794_vm3, %v6526_v17  ;;  %vm668_vm2 = vcmp.eq.s32.totalorder %v6559_v5, %v7904_v61  ;;  %vm670_vm3 = vcmp.eq.s32.totalorder %v6559_v5, %v7908_v62 }
  0xc6   :  { %5810 = vmatprep.subr.msk.mxu0 %vm761_vm4, %v6526_v17  ;;  %5874 = vmatprep.subr.msk.mxu1 %vm763_vm5, %v6526_v17  ;;  %vm637_vm4 = vcmp.eq.s32.totalorder %v6576_v10, %v7892_v59  ;;  %vm639_vm5 = vcmp.eq.s32.totalorder %v6576_v10, %v7896_v60 }
  0xc7   :  { %5811 = vmatpush2.msk.msra.mxu0 %vm760_vm6, %v6526_v17  ;;  %5875 = vmatpush2.msk.msra.mxu1 %vm762_vm7, %v6526_v17  ;;  %vm636_vm6 = vcmp.eq.s32.totalorder %v6576_v10, %v7904_v61  ;;  %vm638_vm7 = vcmp.eq.s32.totalorder %v6576_v10, %v7908_v62 }
  0xc8   :  { %5812 = vmatprep.subr.msk.mxu0 %vm729_vm8, %v6526_v17  ;;  %5876 = vmatprep.subr.msk.mxu1 %vm731_vm9, %v6526_v17  ;;  %vm605_vm8 = vcmp.eq.s32.totalorder %v6591_v14, %v7892_v59  ;;  %vm607_vm9 = vcmp.eq.s32.totalorder %v6591_v14, %v7896_v60 }
  0xc9   :  { %5813 = vmatpush2.msk.msra.mxu0 %vm728_vm10, %v6526_v17  ;;  %5877 = vmatpush2.msk.msra.mxu1 %vm730_vm11, %v6526_v17  ;;  %vm604_vm10 = vcmp.eq.s32.totalorder %v6591_v14, %v7904_v61  ;;  %vm606_vm11 = vcmp.eq.s32.totalorder %v6591_v14, %v7908_v62 }
  0xca   :  { %5814 = vmatprep.subr.msk.mxu0 %vm697_vm12, %v6526_v17  ;;  %5878 = vmatprep.subr.msk.mxu1 %vm699_vm13, %v6526_v17  ;;  %vm573_vm12 = vcmp.eq.s32.totalorder %v6598_v16, %v7892_v59  ;;  %vm575_vm13 = vcmp.eq.s32.totalorder %v6598_v16, %v7896_v60 }
  0xcb   :  { %5815 = vmatpush2.msk.msra.mxu0 %vm696_vm14, %v6526_v17  ;;  %3600 = vmatprep.mubr.f32.mxu0 %v6551_v3  ;;  %vm572_vm14 = vcmp.eq.s32.totalorder %v6598_v16, %v7904_v61 }
  0xcc   :  { %5879 = vmatpush2.msk.msra.mxu1 %vm698_vm15, %v6526_v17  ;;  %3671 = vmatprep.mubr.f32.mxu1 %v6551_v3  ;;  %vm574_vm15 = vcmp.eq.s32.totalorder %v6598_v16, %v7908_v62 }
  0xcd   :  { %3601 = vmatmul.mubr.f32.vlgmr.msra.gmra.mxu0 %v7522_v58  ;;  %3672 = vmatmul.mubr.f32.vlgmr.msra.gmra.mxu1 %v7522_v58  ;;  %v8738_v58 = vrot.slane %v8279_v63, %v7039_v48  ;;  %v9121_v63 = vld [vmem:[%s10019_s1 + $0x18] sm:$0xff] }
  0xce   :  { %5880 = vmatprep.subr.msk.mxu0 %vm669_vm0, %v6526_v17  ;;  %5944 = vmatprep.subr.msk.mxu1 %vm671_vm1, %v6526_v17  ;;  %vm541_vm0 = vcmp.eq.s32.totalorder %v6625_v18, %v7892_v59  ;;  %vm543_vm1 = vcmp.eq.s32.totalorder %v6625_v18, %v7896_v60 }
  0xcf   :  { %5881 = vmatpush1.msk.msra.mxu0 %vm668_vm2, %v6526_v17  ;;  %5945 = vmatpush1.msk.msra.mxu1 %vm670_vm3, %v6526_v17  ;;  %vm540_vm2 = vcmp.eq.s32.totalorder %v6625_v18, %v7904_v61  ;;  %vm542_vm3 = vcmp.eq.s32.totalorder %v6625_v18, %v7908_v62 }
  0xd0   :  { %5882 = vmatprep.subr.msk.mxu0 %vm637_vm4, %v6526_v17  ;;  %5946 = vmatprep.subr.msk.mxu1 %vm639_vm5, %v6526_v17  ;;  %vm509_vm4 = vcmp.eq.s32.totalorder %v6640_v19, %v7892_v59  ;;  %vm511_vm5 = vcmp.eq.s32.totalorder %v6640_v19, %v7896_v60 }
  0xd1   :  { %5883 = vmatpush1.msk.msra.mxu0 %vm636_vm6, %v6526_v17  ;;  %5947 = vmatpush1.msk.msra.mxu1 %vm638_vm7, %v6526_v17  ;;  %vm508_vm6 = vcmp.eq.s32.totalorder %v6640_v19, %v7904_v61  ;;  %vm510_vm7 = vcmp.eq.s32.totalorder %v6640_v19, %v7908_v62 }
  0xd2   :  { %5884 = vmatprep.subr.msk.mxu0 %vm605_vm8, %v6526_v17  ;;  %5948 = vmatprep.subr.msk.mxu1 %vm607_vm9, %v6526_v17  ;;  %vm477_vm8 = vcmp.eq.s32.totalorder %v6655_v20, %v7892_v59  ;;  %vm479_vm9 = vcmp.eq.s32.totalorder %v6655_v20, %v7896_v60 }
  0xd3   :  { %5885 = vmatpush1.msk.msra.mxu0 %vm604_vm10, %v6526_v17  ;;  %5949 = vmatpush1.msk.msra.mxu1 %vm606_vm11, %v6526_v17  ;;  %vm476_vm10 = vcmp.eq.s32.totalorder %v6655_v20, %v7904_v61  ;;  %vm478_vm11 = vcmp.eq.s32.totalorder %v6655_v20, %v7908_v62 }
  0xd4   :  { %5886 = vmatprep.subr.msk.mxu0 %vm573_vm12, %v6526_v17  ;;  %5950 = vmatprep.subr.msk.mxu1 %vm575_vm13, %v6526_v17  ;;  %vm445_vm12 = vcmp.eq.s32.totalorder %v6670_v21, %v7892_v59  ;;  %vm447_vm13 = vcmp.eq.s32.totalorder %v6670_v21, %v7896_v60 }
  0xd5   :  { %5887 = vmatpush1.msk.msra.mxu0 %vm572_vm14, %v6526_v17  ;;  %5951 = vmatpush1.msk.msra.mxu1 %vm574_vm15, %v6526_v17  ;;  %vm444_vm14 = vcmp.eq.s32.totalorder %v6670_v21, %v7904_v61  ;;  %vm446_vm15 = vcmp.eq.s32.totalorder %v6670_v21, %v7908_v62 }
  0xd6   :  { %5888 = vmatprep.subr.msk.mxu0 %vm541_vm0, %v6526_v17  ;;  %5952 = vmatprep.subr.msk.mxu1 %vm543_vm1, %v6526_v17  ;;  %vm413_vm0 = vcmp.eq.s32.totalorder %v6685_v22, %v7892_v59  ;;  %vm415_vm1 = vcmp.eq.s32.totalorder %v6685_v22, %v7896_v60 }
  0xd7   :  { %5889 = vmatpush1.msk.msra.mxu0 %vm540_vm2, %v6526_v17  ;;  %5953 = vmatpush1.msk.msra.mxu1 %vm542_vm3, %v6526_v17  ;;  %vm412_vm2 = vcmp.eq.s32.totalorder %v6685_v22, %v7904_v61  ;;  %vm414_vm3 = vcmp.eq.s32.totalorder %v6685_v22, %v7908_v62 }
  0xd8   :  { %5890 = vmatprep.subr.msk.mxu0 %vm509_vm4, %v6526_v17  ;;  %5954 = vmatprep.subr.msk.mxu1 %vm511_vm5, %v6526_v17  ;;  %vm381_vm4 = vcmp.eq.s32.totalorder %v6700_v23, %v7892_v59  ;;  %vm383_vm5 = vcmp.eq.s32.totalorder %v6700_v23, %v7896_v60 }
  0xd9   :  { %5891 = vmatpush1.msk.msra.mxu0 %vm508_vm6, %v6526_v17  ;;  %5955 = vmatpush1.msk.msra.mxu1 %vm510_vm7, %v6526_v17  ;;  %vm380_vm6 = vcmp.eq.s32.totalorder %v6700_v23, %v7904_v61  ;;  %vm382_vm7 = vcmp.eq.s32.totalorder %v6700_v23, %v7908_v62 }
  0xda   :  { %5892 = vmatprep.subr.msk.mxu0 %vm477_vm8, %v6526_v17  ;;  %5956 = vmatprep.subr.msk.mxu1 %vm479_vm9, %v6526_v17  ;;  %vm349_vm8 = vcmp.eq.s32.totalorder %v6715_v24, %v7892_v59  ;;  %vm351_vm9 = vcmp.eq.s32.totalorder %v6715_v24, %v7896_v60 }
  0xdb   :  { %5893 = vmatpush1.msk.msra.mxu0 %vm476_vm10, %v6526_v17  ;;  %5957 = vmatpush1.msk.msra.mxu1 %vm478_vm11, %v6526_v17  ;;  %vm348_vm10 = vcmp.eq.s32.totalorder %v6715_v24, %v7904_v61  ;;  %vm350_vm11 = vcmp.eq.s32.totalorder %v6715_v24, %v7908_v62 }
  0xdc   :  { %5894 = vmatprep.subr.msk.mxu0 %vm445_vm12, %v6526_v17  ;;  %5958 = vmatprep.subr.msk.mxu1 %vm447_vm13, %v6526_v17  ;;  %vm317_vm12 = vcmp.eq.s32.totalorder %v6730_v25, %v7892_v59  ;;  %vm319_vm13 = vcmp.eq.s32.totalorder %v6730_v25, %v7896_v60 }
  0xdd   :  { %5895 = vmatpush1.msk.msra.mxu0 %vm444_vm14, %v6526_v17  ;;  %5959 = vmatpush1.msk.msra.mxu1 %vm446_vm15, %v6526_v17  ;;  %vm316_vm14 = vcmp.eq.s32.totalorder %v6730_v25, %v7904_v61  ;;  %vm318_vm15 = vcmp.eq.s32.totalorder %v6730_v25, %v7908_v62 }
  0xde   :  { %5896 = vmatprep.subr.msk.mxu0 %vm413_vm0, %v6526_v17  ;;  %5960 = vmatprep.subr.msk.mxu1 %vm415_vm1, %v6526_v17  ;;  %vm285_vm0 = vcmp.eq.s32.totalorder %v6745_v26, %v7892_v59  ;;  %vm287_vm1 = vcmp.eq.s32.totalorder %v6745_v26, %v7896_v60 }
  0xdf   :  { %5897 = vmatpush1.msk.msra.mxu0 %vm412_vm2, %v6526_v17  ;;  %5961 = vmatpush1.msk.msra.mxu1 %vm414_vm3, %v6526_v17  ;;  %vm284_vm2 = vcmp.eq.s32.totalorder %v6745_v26, %v7904_v61  ;;  %vm286_vm3 = vcmp.eq.s32.totalorder %v6745_v26, %v7908_v62 }
  0xe0   :  { %5898 = vmatprep.subr.msk.mxu0 %vm381_vm4, %v6526_v17  ;;  %5962 = vmatprep.subr.msk.mxu1 %vm383_vm5, %v6526_v17  ;;  %vm253_vm4 = vcmp.eq.s32.totalorder %v6760_v27, %v7892_v59  ;;  %vm255_vm5 = vcmp.eq.s32.totalorder %v6760_v27, %v7896_v60 }
  0xe1   :  { %5899 = vmatpush1.msk.msra.mxu0 %vm380_vm6, %v6526_v17  ;;  %5963 = vmatpush1.msk.msra.mxu1 %vm382_vm7, %v6526_v17  ;;  %vm252_vm6 = vcmp.eq.s32.totalorder %v6760_v27, %v7904_v61  ;;  %vm254_vm7 = vcmp.eq.s32.totalorder %v6760_v27, %v7908_v62 }
  0xe2   :  { %5900 = vmatprep.subr.msk.mxu0 %vm349_vm8, %v6526_v17  ;;  %5964 = vmatprep.subr.msk.mxu1 %vm351_vm9, %v6526_v17  ;;  %vm221_vm8 = vcmp.eq.s32.totalorder %v6775_v28, %v7892_v59  ;;  %vm223_vm9 = vcmp.eq.s32.totalorder %v6775_v28, %v7896_v60 }
  0xe3   :  { %5901 = vmatpush1.msk.msra.mxu0 %vm348_vm10, %v6526_v17  ;;  %5965 = vmatpush1.msk.msra.mxu1 %vm350_vm11, %v6526_v17  ;;  %vm220_vm10 = vcmp.eq.s32.totalorder %v6775_v28, %v7904_v61  ;;  %vm222_vm11 = vcmp.eq.s32.totalorder %v6775_v28, %v7908_v62 }
  0xe4   :  { %5902 = vmatprep.subr.msk.mxu0 %vm317_vm12, %v6526_v17  ;;  %5966 = vmatprep.subr.msk.mxu1 %vm319_vm13, %v6526_v17  ;;  %vm189_vm12 = vcmp.eq.s32.totalorder %v6547_v2, %v7892_v59  ;;  %vm191_vm13 = vcmp.eq.s32.totalorder %v6547_v2, %v7896_v60 }
  0xe5   :  { %5903 = vmatpush1.msk.msra.mxu0 %vm316_vm14, %v6526_v17  ;;  %5967 = vmatpush1.msk.msra.mxu1 %vm318_vm15, %v6526_v17  ;;  %vm188_vm14 = vcmp.eq.s32.totalorder %v6547_v2, %v7904_v61  ;;  %vm190_vm15 = vcmp.eq.s32.totalorder %v6547_v2, %v7908_v62 }
  0xe6   :  { %5904 = vmatprep.subr.msk.mxu0 %vm285_vm0, %v6526_v17  ;;  %5968 = vmatprep.subr.msk.mxu1 %vm287_vm1, %v6526_v17  ;;  %vm1181_vm0 = vcmp.eq.s32.totalorder %v6802_v29, %v7892_v59  ;;  %vm1183_vm1 = vcmp.eq.s32.totalorder %v6802_v29, %v7896_v60 }
  0xe7   :  { %5905 = vmatpush1.msk.msra.mxu0 %vm284_vm2, %v6526_v17  ;;  %5969 = vmatpush1.msk.msra.mxu1 %vm286_vm3, %v6526_v17  ;;  %vm1180_vm2 = vcmp.eq.s32.totalorder %v6802_v29, %v7904_v61  ;;  %vm1182_vm3 = vcmp.eq.s32.totalorder %v6802_v29, %v7908_v62 }
  0xe8   :  { %5906 = vmatprep.subr.msk.mxu0 %vm253_vm4, %v6526_v17  ;;  %5970 = vmatprep.subr.msk.mxu1 %vm255_vm5, %v6526_v17  ;;  %vm1149_vm4 = vcmp.eq.s32.totalorder %v6817_v30, %v7892_v59  ;;  %vm1151_vm5 = vcmp.eq.s32.totalorder %v6817_v30, %v7896_v60 }
  0xe9   :  { %5907 = vmatpush1.msk.msra.mxu0 %vm252_vm6, %v6526_v17  ;;  %5971 = vmatpush1.msk.msra.mxu1 %vm254_vm7, %v6526_v17  ;;  %vm1148_vm6 = vcmp.eq.s32.totalorder %v6817_v30, %v7904_v61  ;;  %vm1150_vm7 = vcmp.eq.s32.totalorder %v6817_v30, %v7908_v62 }
  0xea   :  { %5908 = vmatprep.subr.msk.mxu0 %vm221_vm8, %v6526_v17  ;;  %5972 = vmatprep.subr.msk.mxu1 %vm223_vm9, %v6526_v17  ;;  %vm1117_vm8 = vcmp.eq.s32.totalorder %v6832_v31, %v7892_v59  ;;  %vm1119_vm9 = vcmp.eq.s32.totalorder %v6832_v31, %v7896_v60 }
  0xeb   :  { %5909 = vmatpush1.msk.msra.mxu0 %vm220_vm10, %v6526_v17  ;;  %5973 = vmatpush1.msk.msra.mxu1 %vm222_vm11, %v6526_v17  ;;  %vm1116_vm10 = vcmp.eq.s32.totalorder %v6832_v31, %v7904_v61  ;;  %vm1118_vm11 = vcmp.eq.s32.totalorder %v6832_v31, %v7908_v62 }
  0xec   :  { %5910 = vmatprep.subr.msk.mxu0 %vm189_vm12, %v6526_v17  ;;  %5974 = vmatprep.subr.msk.mxu1 %vm191_vm13, %v6526_v17  ;;  %vm1085_vm12 = vcmp.eq.s32.totalorder %v6847_v32, %v7892_v59  ;;  %vm1087_vm13 = vcmp.eq.s32.totalorder %v6847_v32, %v7896_v60 }
  0xed   :  { %5911 = vmatpush1.msk.msra.mxu0 %vm188_vm14, %v6526_v17  ;;  %5975 = vmatpush1.msk.msra.mxu1 %vm190_vm15, %v6526_v17  ;;  %vm1084_vm14 = vcmp.eq.s32.totalorder %v6847_v32, %v7904_v61  ;;  %vm1086_vm15 = vcmp.eq.s32.totalorder %v6847_v32, %v7908_v62 }
  0xee   :  { %5912 = vmatprep.subr.msk.mxu0 %vm1181_vm0, %v6526_v17  ;;  %5976 = vmatprep.subr.msk.mxu1 %vm1183_vm1, %v6526_v17  ;;  %vm1053_vm0 = vcmp.eq.s32.totalorder %v6862_v33, %v7892_v59  ;;  %vm1055_vm1 = vcmp.eq.s32.totalorder %v6862_v33, %v7896_v60 }
  0xef   :  { %5913 = vmatpush2.msk.msra.mxu0 %vm1180_vm2, %v6526_v17  ;;  %5977 = vmatpush2.msk.msra.mxu1 %vm1182_vm3, %v6526_v17  ;;  %vm1052_vm2 = vcmp.eq.s32.totalorder %v6862_v33, %v7904_v61  ;;  %vm1054_vm3 = vcmp.eq.s32.totalorder %v6862_v33, %v7908_v62 }
  0xf0   :  { %5914 = vmatprep.subr.msk.mxu0 %vm1149_vm4, %v6526_v17  ;;  %5978 = vmatprep.subr.msk.mxu1 %vm1151_vm5, %v6526_v17  ;;  %vm1021_vm4 = vcmp.eq.s32.totalorder %v6877_v34, %v7892_v59  ;;  %vm1023_vm5 = vcmp.eq.s32.totalorder %v6877_v34, %v7896_v60 }
  0xf1   :  { %5915 = vmatpush2.msk.msra.mxu0 %vm1148_vm6, %v6526_v17  ;;  %5979 = vmatpush2.msk.msra.mxu1 %vm1150_vm7, %v6526_v17  ;;  %vm1020_vm6 = vcmp.eq.s32.totalorder %v6877_v34, %v7904_v61  ;;  %vm1022_vm7 = vcmp.eq.s32.totalorder %v6877_v34, %v7908_v62 }
  0xf2   :  { %5916 = vmatprep.subr.msk.mxu0 %vm1117_vm8, %v6526_v17  ;;  %5980 = vmatprep.subr.msk.mxu1 %vm1119_vm9, %v6526_v17  ;;  %vm989_vm8 = vcmp.eq.s32.totalorder %v6892_v35, %v7892_v59  ;;  %vm991_vm9 = vcmp.eq.s32.totalorder %v6892_v35, %v7896_v60 }
  0xf3   :  { %5917 = vmatpush2.msk.msra.mxu0 %vm1116_vm10, %v6526_v17  ;;  %5981 = vmatpush2.msk.msra.mxu1 %vm1118_vm11, %v6526_v17  ;;  %vm988_vm10 = vcmp.eq.s32.totalorder %v6892_v35, %v7904_v61  ;;  %vm990_vm11 = vcmp.eq.s32.totalorder %v6892_v35, %v7908_v62 }
  0xf4   :  { %5918 = vmatprep.subr.msk.mxu0 %vm1085_vm12, %v6526_v17  ;;  %5982 = vmatprep.subr.msk.mxu1 %vm1087_vm13, %v6526_v17  ;;  %vm957_vm12 = vcmp.eq.s32.totalorder %v6907_v36, %v7892_v59  ;;  %vm959_vm13 = vcmp.eq.s32.totalorder %v6907_v36, %v7896_v60 }
  0xf5   :  { %5919 = vmatpush2.msk.msra.mxu0 %vm1084_vm14, %v6526_v17  ;;  %5983 = vmatpush2.msk.msra.mxu1 %vm1086_vm15, %v6526_v17  ;;  %vm956_vm14 = vcmp.eq.s32.totalorder %v6907_v36, %v7904_v61  ;;  %vm958_vm15 = vcmp.eq.s32.totalorder %v6907_v36, %v7908_v62 }
  0xf6   :  { %5920 = vmatprep.subr.msk.mxu0 %vm1053_vm0, %v6526_v17  ;;  %5984 = vmatprep.subr.msk.mxu1 %vm1055_vm1, %v6526_v17  ;;  %vm925_vm0 = vcmp.eq.s32.totalorder %v6922_v37, %v7892_v59  ;;  %vm927_vm1 = vcmp.eq.s32.totalorder %v6922_v37, %v7896_v60 }
  0xf7   :  { %5921 = vmatpush2.msk.msra.mxu0 %vm1052_vm2, %v6526_v17  ;;  %5985 = vmatpush2.msk.msra.mxu1 %vm1054_vm3, %v6526_v17  ;;  %vm924_vm2 = vcmp.eq.s32.totalorder %v6922_v37, %v7904_v61  ;;  %vm926_vm3 = vcmp.eq.s32.totalorder %v6922_v37, %v7908_v62 }
  0xf8   :  { %5922 = vmatprep.subr.msk.mxu0 %vm1021_vm4, %v6526_v17  ;;  %5986 = vmatprep.subr.msk.mxu1 %vm1023_vm5, %v6526_v17  ;;  %vm893_vm4 = vcmp.eq.s32.totalorder %v6937_v38, %v7892_v59  ;;  %vm895_vm5 = vcmp.eq.s32.totalorder %v6937_v38, %v7896_v60 }
  0xf9   :  { %5923 = vmatpush2.msk.msra.mxu0 %vm1020_vm6, %v6526_v17  ;;  %5987 = vmatpush2.msk.msra.mxu1 %vm1022_vm7, %v6526_v17  ;;  %vm892_vm6 = vcmp.eq.s32.totalorder %v6937_v38, %v7904_v61  ;;  %vm894_vm7 = vcmp.eq.s32.totalorder %v6937_v38, %v7908_v62 }
  0xfa   :  { %5924 = vmatprep.subr.msk.mxu0 %vm989_vm8, %v6526_v17  ;;  %5988 = vmatprep.subr.msk.mxu1 %vm991_vm9, %v6526_v17  ;;  %vm861_vm8 = vcmp.eq.s32.totalorder %v6952_v39, %v7892_v59  ;;  %vm863_vm9 = vcmp.eq.s32.totalorder %v6952_v39, %v7896_v60 }
  0xfb   :  { %5925 = vmatpush2.msk.msra.mxu0 %vm988_vm10, %v6526_v17  ;;  %5989 = vmatpush2.msk.msra.mxu1 %vm990_vm11, %v6526_v17  ;;  %vm860_vm10 = vcmp.eq.s32.totalorder %v6952_v39, %v7904_v61  ;;  %vm862_vm11 = vcmp.eq.s32.totalorder %v6952_v39, %v7908_v62 }
  0xfc   :  { %5926 = vmatprep.subr.msk.mxu0 %vm957_vm12, %v6526_v17  ;;  %5990 = vmatprep.subr.msk.mxu1 %vm959_vm13, %v6526_v17  ;;  %vm829_vm12 = vcmp.eq.s32.totalorder %v6967_v40, %v7892_v59  ;;  %vm831_vm13 = vcmp.eq.s32.totalorder %v6967_v40, %v7896_v60 }
  0xfd   :  { %5927 = vmatpush2.msk.msra.mxu0 %vm956_vm14, %v6526_v17  ;;  %5991 = vmatpush2.msk.msra.mxu1 %vm958_vm15, %v6526_v17  ;;  %vm828_vm14 = vcmp.eq.s32.totalorder %v6967_v40, %v7904_v61  ;;  %vm830_vm15 = vcmp.eq.s32.totalorder %v6967_v40, %v7908_v62 }
  0xfe   :  { %5928 = vmatprep.subr.msk.mxu0 %vm925_vm0, %v6526_v17  ;;  %5992 = vmatprep.subr.msk.mxu1 %vm927_vm1, %v6526_v17  ;;  %vm797_vm0 = vcmp.eq.s32.totalorder %v6982_v41, %v7892_v59  ;;  %vm799_vm1 = vcmp.eq.s32.totalorder %v6982_v41, %v7896_v60 }
  0xff   :  { %5929 = vmatpush2.msk.msra.mxu0 %vm924_vm2, %v6526_v17  ;;  %5993 = vmatpush2.msk.msra.mxu1 %vm926_vm3, %v6526_v17  ;;  %vm796_vm2 = vcmp.eq.s32.totalorder %v6982_v41, %v7904_v61  ;;  %vm798_vm3 = vcmp.eq.s32.totalorder %v6982_v41, %v7908_v62 }
 0x100   :  { %5930 = vmatprep.subr.msk.mxu0 %vm893_vm4, %v6526_v17  ;;  %5994 = vmatprep.subr.msk.mxu1 %vm895_vm5, %v6526_v17  ;;  %vm765_vm4 = vcmp.eq.s32.totalorder %v6997_v42, %v7892_v59  ;;  %vm767_vm5 = vcmp.eq.s32.totalorder %v6997_v42, %v7896_v60 }
 0x101   :  { %5931 = vmatpush2.msk.msra.mxu0 %vm892_vm6, %v6526_v17  ;;  %5995 = vmatpush2.msk.msra.mxu1 %vm894_vm7, %v6526_v17  ;;  %vm764_vm6 = vcmp.eq.s32.totalorder %v6997_v42, %v7904_v61  ;;  %vm766_vm7 = vcmp.eq.s32.totalorder %v6997_v42, %v7908_v62 }
 0x102   :  { %5932 = vmatprep.subr.msk.mxu0 %vm861_vm8, %v6526_v17  ;;  %5996 = vmatprep.subr.msk.mxu1 %vm863_vm9, %v6526_v17  ;;  %vm733_vm8 = vcmp.eq.s32.totalorder %v7006_v43, %v7892_v59  ;;  %vm735_vm9 = vcmp.eq.s32.totalorder %v7006_v43, %v7896_v60 }
 0x103   :  { %5933 = vmatpush2.msk.msra.mxu0 %vm860_vm10, %v6526_v17  ;;  %5997 = vmatpush2.msk.msra.mxu1 %vm862_vm11, %v6526_v17  ;;  %vm732_vm10 = vcmp.eq.s32.totalorder %v7006_v43, %v7904_v61  ;;  %vm734_vm11 = vcmp.eq.s32.totalorder %v7006_v43, %v7908_v62 }
 0x104   :  { %5934 = vmatprep.subr.msk.mxu0 %vm829_vm12, %v6526_v17  ;;  %5998 = vmatprep.subr.msk.mxu1 %vm831_vm13, %v6526_v17  ;;  %vm701_vm12 = vcmp.eq.s32.totalorder %v7015_v44, %v7892_v59  ;;  %vm703_vm13 = vcmp.eq.s32.totalorder %v7015_v44, %v7896_v60 }
 0x105   :  { %5935 = vmatpush2.msk.msra.mxu0 %vm828_vm14, %v6526_v17  ;;  %5999 = vmatpush2.msk.msra.mxu1 %vm830_vm15, %v6526_v17  ;;  %vm700_vm14 = vcmp.eq.s32.totalorder %v7015_v44, %v7904_v61  ;;  %vm702_vm15 = vcmp.eq.s32.totalorder %v7015_v44, %v7908_v62 }
 0x106   :  { %5936 = vmatprep.subr.msk.mxu0 %vm797_vm0, %v6526_v17  ;;  %6000 = vmatprep.subr.msk.mxu1 %vm799_vm1, %v6526_v17  ;;  %vm673_vm0 = vcmp.eq.s32.totalorder %v6559_v5, %v8301_v4  ;;  %vm675_vm1 = vcmp.eq.s32.totalorder %v6559_v5, %v8305_v11 }
 0x107   :  { %5937 = vmatpush2.msk.msra.mxu0 %vm796_vm2, %v6526_v17  ;;  %6001 = vmatpush2.msk.msra.mxu1 %vm798_vm3, %v6526_v17  ;;  %vm672_vm2 = vcmp.eq.s32.totalorder %v6559_v5, %v8313_v12  ;;  %vm674_vm3 = vcmp.eq.s32.totalorder %v6559_v5, %v8317_v13 }
 0x108   :  { %5938 = vmatprep.subr.msk.mxu0 %vm765_vm4, %v6526_v17  ;;  %6002 = vmatprep.subr.msk.mxu1 %vm767_vm5, %v6526_v17  ;;  %vm641_vm4 = vcmp.eq.s32.totalorder %v6576_v10, %v8301_v4  ;;  %vm643_vm5 = vcmp.eq.s32.totalorder %v6576_v10, %v8305_v11 }
 0x109   :  { %5939 = vmatpush2.msk.msra.mxu0 %vm764_vm6, %v6526_v17  ;;  %6003 = vmatpush2.msk.msra.mxu1 %vm766_vm7, %v6526_v17  ;;  %v3318_v0 = vpop.f32.mrf.mxu0  ;;  %v3389_v1 = vpop.f32.mrf.mxu1  ;;  %vm640_vm6 = vcmp.eq.s32.totalorder %v6576_v10, %v8313_v12  ;;  %vm642_vm7 = vcmp.eq.s32.totalorder %v6576_v10, %v8317_v13 }
 0x10a   :  { %5940 = vmatprep.subr.msk.mxu0 %vm733_vm8, %v6526_v17  ;;  %6004 = vmatprep.subr.msk.mxu1 %vm735_vm9, %v6526_v17  ;;  %vm609_vm8 = vcmp.eq.s32.totalorder %v6591_v14, %v8301_v4  ;;  %vm611_vm9 = vcmp.eq.s32.totalorder %v6591_v14, %v8305_v11 }
 0x10b   :  { %5941 = vmatpush2.msk.msra.mxu0 %vm732_vm10, %v6526_v17  ;;  %6005 = vmatpush2.msk.msra.mxu1 %vm734_vm11, %v6526_v17  ;;  %v3320_v15 = vpop.f32.mrf.mxu0  ;;  %v3391_v49 = vpop.f32.mrf.mxu1  ;;  %vm608_vm10 = vcmp.eq.s32.totalorder %v6591_v14, %v8313_v12  ;;  %vm610_vm11 = vcmp.eq.s32.totalorder %v6591_v14, %v8317_v13 }
 0x10c   :  { %5942 = vmatprep.subr.msk.mxu0 %vm701_vm12, %v6526_v17  ;;  %6006 = vmatprep.subr.msk.mxu1 %vm703_vm13, %v6526_v17  ;;  %v4420_v50 = vcombine.low %v3318_v0, %v3320_v15  ;;  %v4421_v51 = vcombine.low %v3389_v1, %v3391_v49  ;;  %vm577_vm12 = vcmp.eq.s32.totalorder %v6598_v16, %v8301_v4  ;;  %v9194_v15 = vld [vmem:[%s10020_s0] sm:$0xff] }
 0x10d   :  { %5943 = vmatpush2.msk.msra.mxu0 %vm700_vm14, %v6526_v17  ;;  %3742 = vmatprep.mubr.f32.mxu0 %v6551_v3  ;;  %vm579_vm13 = vcmp.eq.s32.totalorder %v6598_v16, %v8305_v11  ;;  %vm576_vm14 = vcmp.eq.s32.totalorder %v6598_v16, %v8313_v12 }
 0x10e   :  { %6007 = vmatpush2.msk.msra.mxu1 %vm702_vm15, %v6526_v17  ;;  %3813 = vmatprep.mubr.f32.mxu1 %v6551_v3  ;;  %4452 = vst [vmem:[%s10021_s2] sm:$0xff] %v4420_v50  ;;  %4453 = vst [vmem:[%s10021_s2 + $0x8] sm:$0xff] %v4421_v51  ;;  %vm578_vm15 = vcmp.eq.s32.totalorder %v6598_v16, %v8317_v13  ;;  %v9564_v51 = vrot.slane %v9121_v63, %v7024_v45 }
 0x10f   :  { %3743 = vmatmul.mubr.f32.vlgmr.msra.gmra.mxu0 %v8352_v52  ;;  %3814 = vmatmul.mubr.f32.vlgmr.msra.gmra.mxu1 %v8352_v52 }
 0x110   :  { %6008 = vmatprep.subr.msk.mxu0 %vm673_vm0, %v6526_v17  ;;  %6072 = vmatprep.subr.msk.mxu1 %vm675_vm1, %v6526_v17  ;;  %vm545_vm0 = vcmp.eq.s32.totalorder %v6625_v18, %v8301_v4  ;;  %vm547_vm1 = vcmp.eq.s32.totalorder %v6625_v18, %v8305_v11 }
 0x111   :  { %6009 = vmatpush1.msk.msra.mxu0 %vm672_vm2, %v6526_v17  ;;  %6073 = vmatpush1.msk.msra.mxu1 %vm674_vm3, %v6526_v17  ;;  %vm544_vm2 = vcmp.eq.s32.totalorder %v6625_v18, %v8313_v12  ;;  %vm546_vm3 = vcmp.eq.s32.totalorder %v6625_v18, %v8317_v13 }
 0x112   :  { %6010 = vmatprep.subr.msk.mxu0 %vm641_vm4, %v6526_v17  ;;  %6074 = vmatprep.subr.msk.mxu1 %vm643_vm5, %v6526_v17  ;;  %vm513_vm4 = vcmp.eq.s32.totalorder %v6640_v19, %v8301_v4  ;;  %vm515_vm5 = vcmp.eq.s32.totalorder %v6640_v19, %v8305_v11 }
 0x113   :  { %6011 = vmatpush1.msk.msra.mxu0 %vm640_vm6, %v6526_v17  ;;  %6075 = vmatpush1.msk.msra.mxu1 %vm642_vm7, %v6526_v17  ;;  %vm512_vm6 = vcmp.eq.s32.totalorder %v6640_v19, %v8313_v12  ;;  %vm514_vm7 = vcmp.eq.s32.totalorder %v6640_v19, %v8317_v13 }
 0x114   :  { %6012 = vmatprep.subr.msk.mxu0 %vm609_vm8, %v6526_v17  ;;  %6076 = vmatprep.subr.msk.mxu1 %vm611_vm9, %v6526_v17  ;;  %vm481_vm8 = vcmp.eq.s32.totalorder %v6655_v20, %v8301_v4  ;;  %vm483_vm9 = vcmp.eq.s32.totalorder %v6655_v20, %v8305_v11 }
 0x115   :  { %6013 = vmatpush1.msk.msra.mxu0 %vm608_vm10, %v6526_v17  ;;  %6077 = vmatpush1.msk.msra.mxu1 %vm610_vm11, %v6526_v17  ;;  %vm480_vm10 = vcmp.eq.s32.totalorder %v6655_v20, %v8313_v12  ;;  %vm482_vm11 = vcmp.eq.s32.totalorder %v6655_v20, %v8317_v13 }
 0x116   :  { %6014 = vmatprep.subr.msk.mxu0 %vm577_vm12, %v6526_v17  ;;  %6078 = vmatprep.subr.msk.mxu1 %vm579_vm13, %v6526_v17  ;;  %vm449_vm12 = vcmp.eq.s32.totalorder %v6670_v21, %v8301_v4  ;;  %vm451_vm13 = vcmp.eq.s32.totalorder %v6670_v21, %v8305_v11 }
 0x117   :  { %6015 = vmatpush1.msk.msra.mxu0 %vm576_vm14, %v6526_v17  ;;  %6079 = vmatpush1.msk.msra.mxu1 %vm578_vm15, %v6526_v17  ;;  %vm448_vm14 = vcmp.eq.s32.totalorder %v6670_v21, %v8313_v12  ;;  %vm450_vm15 = vcmp.eq.s32.totalorder %v6670_v21, %v8317_v13 }
 0x118   :  { %6016 = vmatprep.subr.msk.mxu0 %vm545_vm0, %v6526_v17  ;;  %6080 = vmatprep.subr.msk.mxu1 %vm547_vm1, %v6526_v17  ;;  %vm417_vm0 = vcmp.eq.s32.totalorder %v6685_v22, %v8301_v4  ;;  %vm419_vm1 = vcmp.eq.s32.totalorder %v6685_v22, %v8305_v11 }
 0x119   :  { %6017 = vmatpush1.msk.msra.mxu0 %vm544_vm2, %v6526_v17  ;;  %6081 = vmatpush1.msk.msra.mxu1 %vm546_vm3, %v6526_v17  ;;  %vm416_vm2 = vcmp.eq.s32.totalorder %v6685_v22, %v8313_v12  ;;  %vm418_vm3 = vcmp.eq.s32.totalorder %v6685_v22, %v8317_v13 }
 0x11a   :  { %6018 = vmatprep.subr.msk.mxu0 %vm513_vm4, %v6526_v17  ;;  %6082 = vmatprep.subr.msk.mxu1 %vm515_vm5, %v6526_v17  ;;  %vm385_vm4 = vcmp.eq.s32.totalorder %v6700_v23, %v8301_v4  ;;  %vm387_vm5 = vcmp.eq.s32.totalorder %v6700_v23, %v8305_v11 }
 0x11b   :  { %6019 = vmatpush1.msk.msra.mxu0 %vm512_vm6, %v6526_v17  ;;  %6083 = vmatpush1.msk.msra.mxu1 %vm514_vm7, %v6526_v17  ;;  %vm384_vm6 = vcmp.eq.s32.totalorder %v6700_v23, %v8313_v12  ;;  %vm386_vm7 = vcmp.eq.s32.totalorder %v6700_v23, %v8317_v13 }
 0x11c   :  { %6020 = vmatprep.subr.msk.mxu0 %vm481_vm8, %v6526_v17  ;;  %6084 = vmatprep.subr.msk.mxu1 %vm483_vm9, %v6526_v17  ;;  %vm353_vm8 = vcmp.eq.s32.totalorder %v6715_v24, %v8301_v4  ;;  %vm355_vm9 = vcmp.eq.s32.totalorder %v6715_v24, %v8305_v11 }
 0x11d   :  { %6021 = vmatpush1.msk.msra.mxu0 %vm480_vm10, %v6526_v17  ;;  %6085 = vmatpush1.msk.msra.mxu1 %vm482_vm11, %v6526_v17  ;;  %vm352_vm10 = vcmp.eq.s32.totalorder %v6715_v24, %v8313_v12  ;;  %vm354_vm11 = vcmp.eq.s32.totalorder %v6715_v24, %v8317_v13 }
 0x11e   :  { %6022 = vmatprep.subr.msk.mxu0 %vm449_vm12, %v6526_v17  ;;  %6086 = vmatprep.subr.msk.mxu1 %vm451_vm13, %v6526_v17  ;;  %vm321_vm12 = vcmp.eq.s32.totalorder %v6730_v25, %v8301_v4  ;;  %vm323_vm13 = vcmp.eq.s32.totalorder %v6730_v25, %v8305_v11 }
 0x11f   :  { %6023 = vmatpush1.msk.msra.mxu0 %vm448_vm14, %v6526_v17  ;;  %6087 = vmatpush1.msk.msra.mxu1 %vm450_vm15, %v6526_v17  ;;  %vm320_vm14 = vcmp.eq.s32.totalorder %v6730_v25, %v8313_v12  ;;  %vm322_vm15 = vcmp.eq.s32.totalorder %v6730_v25, %v8317_v13 }
 0x120   :  { %6024 = vmatprep.subr.msk.mxu0 %vm417_vm0, %v6526_v17  ;;  %6088 = vmatprep.subr.msk.mxu1 %vm419_vm1, %v6526_v17  ;;  %vm289_vm0 = vcmp.eq.s32.totalorder %v6745_v26, %v8301_v4  ;;  %vm291_vm1 = vcmp.eq.s32.totalorder %v6745_v26, %v8305_v11 }
 0x121   :  { %6025 = vmatpush1.msk.msra.mxu0 %vm416_vm2, %v6526_v17  ;;  %6089 = vmatpush1.msk.msra.mxu1 %vm418_vm3, %v6526_v17  ;;  %vm288_vm2 = vcmp.eq.s32.totalorder %v6745_v26, %v8313_v12  ;;  %vm290_vm3 = vcmp.eq.s32.totalorder %v6745_v26, %v8317_v13 }
 0x122   :  { %6026 = vmatprep.subr.msk.mxu0 %vm385_vm4, %v6526_v17  ;;  %6090 = vmatprep.subr.msk.mxu1 %vm387_vm5, %v6526_v17  ;;  %vm257_vm4 = vcmp.eq.s32.totalorder %v6760_v27, %v8301_v4  ;;  %vm259_vm5 = vcmp.eq.s32.totalorder %v6760_v27, %v8305_v11 }
 0x123   :  { %6027 = vmatpush1.msk.msra.mxu0 %vm384_vm6, %v6526_v17  ;;  %6091 = vmatpush1.msk.msra.mxu1 %vm386_vm7, %v6526_v17  ;;  %vm256_vm6 = vcmp.eq.s32.totalorder %v6760_v27, %v8313_v12  ;;  %vm258_vm7 = vcmp.eq.s32.totalorder %v6760_v27, %v8317_v13 }
 0x124   :  { %6028 = vmatprep.subr.msk.mxu0 %vm353_vm8, %v6526_v17  ;;  %6092 = vmatprep.subr.msk.mxu1 %vm355_vm9, %v6526_v17  ;;  %vm225_vm8 = vcmp.eq.s32.totalorder %v6775_v28, %v8301_v4  ;;  %vm227_vm9 = vcmp.eq.s32.totalorder %v6775_v28, %v8305_v11 }
 0x125   :  { %6029 = vmatpush1.msk.msra.mxu0 %vm352_vm10, %v6526_v17  ;;  %6093 = vmatpush1.msk.msra.mxu1 %vm354_vm11, %v6526_v17  ;;  %vm224_vm10 = vcmp.eq.s32.totalorder %v6775_v28, %v8313_v12  ;;  %vm226_vm11 = vcmp.eq.s32.totalorder %v6775_v28, %v8317_v13 }
 0x126   :  { %6030 = vmatprep.subr.msk.mxu0 %vm321_vm12, %v6526_v17  ;;  %6094 = vmatprep.subr.msk.mxu1 %vm323_vm13, %v6526_v17  ;;  %vm193_vm12 = vcmp.eq.s32.totalorder %v6547_v2, %v8301_v4  ;;  %vm195_vm13 = vcmp.eq.s32.totalorder %v6547_v2, %v8305_v11 }
 0x127   :  { %6031 = vmatpush1.msk.msra.mxu0 %vm320_vm14, %v6526_v17  ;;  %6095 = vmatpush1.msk.msra.mxu1 %vm322_vm15, %v6526_v17  ;;  %vm192_vm14 = vcmp.eq.s32.totalorder %v6547_v2, %v8313_v12  ;;  %vm194_vm15 = vcmp.eq.s32.totalorder %v6547_v2, %v8317_v13 }
 0x128   :  { %6032 = vmatprep.subr.msk.mxu0 %vm289_vm0, %v6526_v17  ;;  %6096 = vmatprep.subr.msk.mxu1 %vm291_vm1, %v6526_v17  ;;  %vm1185_vm0 = vcmp.eq.s32.totalorder %v6802_v29, %v8301_v4  ;;  %vm1187_vm1 = vcmp.eq.s32.totalorder %v6802_v29, %v8305_v11 }
 0x129   :  { %6033 = vmatpush1.msk.msra.mxu0 %vm288_vm2, %v6526_v17  ;;  %6097 = vmatpush1.msk.msra.mxu1 %vm290_vm3, %v6526_v17  ;;  %vm1184_vm2 = vcmp.eq.s32.totalorder %v6802_v29, %v8313_v12  ;;  %vm1186_vm3 = vcmp.eq.s32.totalorder %v6802_v29, %v8317_v13 }
 0x12a   :  { %6034 = vmatprep.subr.msk.mxu0 %vm257_vm4, %v6526_v17  ;;  %6098 = vmatprep.subr.msk.mxu1 %vm259_vm5, %v6526_v17  ;;  %vm1153_vm4 = vcmp.eq.s32.totalorder %v6817_v30, %v8301_v4  ;;  %vm1155_vm5 = vcmp.eq.s32.totalorder %v6817_v30, %v8305_v11 }
 0x12b   :  { %6035 = vmatpush1.msk.msra.mxu0 %vm256_vm6, %v6526_v17  ;;  %6099 = vmatpush1.msk.msra.mxu1 %vm258_vm7, %v6526_v17  ;;  %vm1152_vm6 = vcmp.eq.s32.totalorder %v6817_v30, %v8313_v12  ;;  %vm1154_vm7 = vcmp.eq.s32.totalorder %v6817_v30, %v8317_v13 }
 0x12c   :  { %6036 = vmatprep.subr.msk.mxu0 %vm225_vm8, %v6526_v17  ;;  %6100 = vmatprep.subr.msk.mxu1 %vm227_vm9, %v6526_v17  ;;  %vm1121_vm8 = vcmp.eq.s32.totalorder %v6832_v31, %v8301_v4  ;;  %vm1123_vm9 = vcmp.eq.s32.totalorder %v6832_v31, %v8305_v11 }
 0x12d   :  { %6037 = vmatpush1.msk.msra.mxu0 %vm224_vm10, %v6526_v17  ;;  %6101 = vmatpush1.msk.msra.mxu1 %vm226_vm11, %v6526_v17  ;;  %vm1120_vm10 = vcmp.eq.s32.totalorder %v6832_v31, %v8313_v12  ;;  %vm1122_vm11 = vcmp.eq.s32.totalorder %v6832_v31, %v8317_v13 }
 0x12e   :  { %6038 = vmatprep.subr.msk.mxu0 %vm193_vm12, %v6526_v17  ;;  %6102 = vmatprep.subr.msk.mxu1 %vm195_vm13, %v6526_v17  ;;  %vm1089_vm12 = vcmp.eq.s32.totalorder %v6847_v32, %v8301_v4  ;;  %vm1091_vm13 = vcmp.eq.s32.totalorder %v6847_v32, %v8305_v11 }
 0x12f   :  { %6039 = vmatpush1.msk.msra.mxu0 %vm192_vm14, %v6526_v17  ;;  %6103 = vmatpush1.msk.msra.mxu1 %vm194_vm15, %v6526_v17  ;;  %vm1088_vm14 = vcmp.eq.s32.totalorder %v6847_v32, %v8313_v12  ;;  %vm1090_vm15 = vcmp.eq.s32.totalorder %v6847_v32, %v8317_v13 }
 0x130   :  { %6040 = vmatprep.subr.msk.mxu0 %vm1185_vm0, %v6526_v17  ;;  %6104 = vmatprep.subr.msk.mxu1 %vm1187_vm1, %v6526_v17  ;;  %vm1057_vm0 = vcmp.eq.s32.totalorder %v6862_v33, %v8301_v4  ;;  %vm1059_vm1 = vcmp.eq.s32.totalorder %v6862_v33, %v8305_v11 }
 0x131   :  { %6041 = vmatpush2.msk.msra.mxu0 %vm1184_vm2, %v6526_v17  ;;  %6105 = vmatpush2.msk.msra.mxu1 %vm1186_vm3, %v6526_v17  ;;  %vm1056_vm2 = vcmp.eq.s32.totalorder %v6862_v33, %v8313_v12  ;;  %vm1058_vm3 = vcmp.eq.s32.totalorder %v6862_v33, %v8317_v13 }
 0x132   :  { %6042 = vmatprep.subr.msk.mxu0 %vm1153_vm4, %v6526_v17  ;;  %6106 = vmatprep.subr.msk.mxu1 %vm1155_vm5, %v6526_v17  ;;  %vm1025_vm4 = vcmp.eq.s32.totalorder %v6877_v34, %v8301_v4  ;;  %vm1027_vm5 = vcmp.eq.s32.totalorder %v6877_v34, %v8305_v11 }
 0x133   :  { %6043 = vmatpush2.msk.msra.mxu0 %vm1152_vm6, %v6526_v17  ;;  %6107 = vmatpush2.msk.msra.mxu1 %vm1154_vm7, %v6526_v17  ;;  %vm1024_vm6 = vcmp.eq.s32.totalorder %v6877_v34, %v8313_v12  ;;  %vm1026_vm7 = vcmp.eq.s32.totalorder %v6877_v34, %v8317_v13 }
 0x134   :  { %6044 = vmatprep.subr.msk.mxu0 %vm1121_vm8, %v6526_v17  ;;  %6108 = vmatprep.subr.msk.mxu1 %vm1123_vm9, %v6526_v17  ;;  %vm993_vm8 = vcmp.eq.s32.totalorder %v6892_v35, %v8301_v4  ;;  %vm995_vm9 = vcmp.eq.s32.totalorder %v6892_v35, %v8305_v11 }
 0x135   :  { %6045 = vmatpush2.msk.msra.mxu0 %vm1120_vm10, %v6526_v17  ;;  %6109 = vmatpush2.msk.msra.mxu1 %vm1122_vm11, %v6526_v17  ;;  %vm992_vm10 = vcmp.eq.s32.totalorder %v6892_v35, %v8313_v12  ;;  %vm994_vm11 = vcmp.eq.s32.totalorder %v6892_v35, %v8317_v13 }
 0x136   :  { %6046 = vmatprep.subr.msk.mxu0 %vm1089_vm12, %v6526_v17  ;;  %6110 = vmatprep.subr.msk.mxu1 %vm1091_vm13, %v6526_v17  ;;  %vm961_vm12 = vcmp.eq.s32.totalorder %v6907_v36, %v8301_v4  ;;  %vm963_vm13 = vcmp.eq.s32.totalorder %v6907_v36, %v8305_v11 }
 0x137   :  { %6047 = vmatpush2.msk.msra.mxu0 %vm1088_vm14, %v6526_v17  ;;  %6111 = vmatpush2.msk.msra.mxu1 %vm1090_vm15, %v6526_v17  ;;  %vm960_vm14 = vcmp.eq.s32.totalorder %v6907_v36, %v8313_v12  ;;  %vm962_vm15 = vcmp.eq.s32.totalorder %v6907_v36, %v8317_v13 }
 0x138   :  { %6048 = vmatprep.subr.msk.mxu0 %vm1057_vm0, %v6526_v17  ;;  %6112 = vmatprep.subr.msk.mxu1 %vm1059_vm1, %v6526_v17  ;;  %vm929_vm0 = vcmp.eq.s32.totalorder %v6922_v37, %v8301_v4  ;;  %vm931_vm1 = vcmp.eq.s32.totalorder %v6922_v37, %v8305_v11 }
 0x139   :  { %6049 = vmatpush2.msk.msra.mxu0 %vm1056_vm2, %v6526_v17  ;;  %6113 = vmatpush2.msk.msra.mxu1 %vm1058_vm3, %v6526_v17  ;;  %vm928_vm2 = vcmp.eq.s32.totalorder %v6922_v37, %v8313_v12  ;;  %vm930_vm3 = vcmp.eq.s32.totalorder %v6922_v37, %v8317_v13 }
 0x13a   :  { %6050 = vmatprep.subr.msk.mxu0 %vm1025_vm4, %v6526_v17  ;;  %6114 = vmatprep.subr.msk.mxu1 %vm1027_vm5, %v6526_v17  ;;  %vm897_vm4 = vcmp.eq.s32.totalorder %v6937_v38, %v8301_v4  ;;  %vm899_vm5 = vcmp.eq.s32.totalorder %v6937_v38, %v8305_v11 }
 0x13b   :  { %6051 = vmatpush2.msk.msra.mxu0 %vm1024_vm6, %v6526_v17  ;;  %6115 = vmatpush2.msk.msra.mxu1 %vm1026_vm7, %v6526_v17  ;;  %vm896_vm6 = vcmp.eq.s32.totalorder %v6937_v38, %v8313_v12  ;;  %vm898_vm7 = vcmp.eq.s32.totalorder %v6937_v38, %v8317_v13 }
 0x13c   :  { %6052 = vmatprep.subr.msk.mxu0 %vm993_vm8, %v6526_v17  ;;  %6116 = vmatprep.subr.msk.mxu1 %vm995_vm9, %v6526_v17  ;;  %vm865_vm8 = vcmp.eq.s32.totalorder %v6952_v39, %v8301_v4  ;;  %vm867_vm9 = vcmp.eq.s32.totalorder %v6952_v39, %v8305_v11 }
 0x13d   :  { %6053 = vmatpush2.msk.msra.mxu0 %vm992_vm10, %v6526_v17  ;;  %6117 = vmatpush2.msk.msra.mxu1 %vm994_vm11, %v6526_v17  ;;  %vm864_vm10 = vcmp.eq.s32.totalorder %v6952_v39, %v8313_v12  ;;  %vm866_vm11 = vcmp.eq.s32.totalorder %v6952_v39, %v8317_v13 }
 0x13e   :  { %6054 = vmatprep.subr.msk.mxu0 %vm961_vm12, %v6526_v17  ;;  %6118 = vmatprep.subr.msk.mxu1 %vm963_vm13, %v6526_v17  ;;  %vm833_vm12 = vcmp.eq.s32.totalorder %v6967_v40, %v8301_v4  ;;  %vm835_vm13 = vcmp.eq.s32.totalorder %v6967_v40, %v8305_v11 }
 0x13f   :  { %6055 = vmatpush2.msk.msra.mxu0 %vm960_vm14, %v6526_v17  ;;  %6119 = vmatpush2.msk.msra.mxu1 %vm962_vm15, %v6526_v17  ;;  %vm832_vm14 = vcmp.eq.s32.totalorder %v6967_v40, %v8313_v12  ;;  %vm834_vm15 = vcmp.eq.s32.totalorder %v6967_v40, %v8317_v13 }
 0x140   :  { %6056 = vmatprep.subr.msk.mxu0 %vm929_vm0, %v6526_v17  ;;  %6120 = vmatprep.subr.msk.mxu1 %vm931_vm1, %v6526_v17  ;;  %vm801_vm0 = vcmp.eq.s32.totalorder %v6982_v41, %v8301_v4  ;;  %vm803_vm1 = vcmp.eq.s32.totalorder %v6982_v41, %v8305_v11 }
 0x141   :  { %6057 = vmatpush2.msk.msra.mxu0 %vm928_vm2, %v6526_v17  ;;  %6121 = vmatpush2.msk.msra.mxu1 %vm930_vm3, %v6526_v17  ;;  %vm800_vm2 = vcmp.eq.s32.totalorder %v6982_v41, %v8313_v12  ;;  %vm802_vm3 = vcmp.eq.s32.totalorder %v6982_v41, %v8317_v13 }
 0x142   :  { %6058 = vmatprep.subr.msk.mxu0 %vm897_vm4, %v6526_v17  ;;  %6122 = vmatprep.subr.msk.mxu1 %vm899_vm5, %v6526_v17  ;;  %vm769_vm4 = vcmp.eq.s32.totalorder %v6997_v42, %v8301_v4  ;;  %vm771_vm5 = vcmp.eq.s32.totalorder %v6997_v42, %v8305_v11 }
 0x143   :  { %6059 = vmatpush2.msk.msra.mxu0 %vm896_vm6, %v6526_v17  ;;  %6123 = vmatpush2.msk.msra.mxu1 %vm898_vm7, %v6526_v17  ;;  %vm768_vm6 = vcmp.eq.s32.totalorder %v6997_v42, %v8313_v12  ;;  %vm770_vm7 = vcmp.eq.s32.totalorder %v6997_v42, %v8317_v13 }
 0x144   :  { %6060 = vmatprep.subr.msk.mxu0 %vm865_vm8, %v6526_v17  ;;  %6124 = vmatprep.subr.msk.mxu1 %vm867_vm9, %v6526_v17  ;;  %vm737_vm8 = vcmp.eq.s32.totalorder %v7006_v43, %v8301_v4  ;;  %vm739_vm9 = vcmp.eq.s32.totalorder %v7006_v43, %v8305_v11 }
 0x145   :  { %6061 = vmatpush2.msk.msra.mxu0 %vm864_vm10, %v6526_v17  ;;  %6125 = vmatpush2.msk.msra.mxu1 %vm866_vm11, %v6526_v17  ;;  %vm736_vm10 = vcmp.eq.s32.totalorder %v7006_v43, %v8313_v12  ;;  %vm738_vm11 = vcmp.eq.s32.totalorder %v7006_v43, %v8317_v13 }
 0x146   :  { %6062 = vmatprep.subr.msk.mxu0 %vm833_vm12, %v6526_v17  ;;  %6126 = vmatprep.subr.msk.mxu1 %vm835_vm13, %v6526_v17  ;;  %vm705_vm12 = vcmp.eq.s32.totalorder %v7015_v44, %v8301_v4  ;;  %vm707_vm13 = vcmp.eq.s32.totalorder %v7015_v44, %v8305_v11  ;;  %v9143_v4 = vrot.slane %v9121_v63, %v6562_v6 }
 0x147   :  { %6063 = vmatpush2.msk.msra.mxu0 %vm832_vm14, %v6526_v17  ;;  %6127 = vmatpush2.msk.msra.mxu1 %vm834_vm15, %v6526_v17  ;;  %vm704_vm14 = vcmp.eq.s32.totalorder %v7015_v44, %v8313_v12  ;;  %vm706_vm15 = vcmp.eq.s32.totalorder %v7015_v44, %v8317_v13  ;;  %v9147_v11 = vrot.slane %v9121_v63, %v6565_v7 }
 0x148   :  { %6064 = vmatprep.subr.msk.mxu0 %vm801_vm0, %v6526_v17  ;;  %6128 = vmatprep.subr.msk.mxu1 %vm803_vm1, %v6526_v17  ;;  %vm677_vm0 = vcmp.eq.s32.totalorder %v6559_v5, %v8722_v55  ;;  %vm679_vm1 = vcmp.eq.s32.totalorder %v6559_v5, %v8726_v56  ;;  %v9155_v12 = vrot.slane %v9121_v63, %v6568_v8 }
 0x149   :  { %6065 = vmatpush2.msk.msra.mxu0 %vm800_vm2, %v6526_v17  ;;  %6129 = vmatpush2.msk.msra.mxu1 %vm802_vm3, %v6526_v17  ;;  %vm676_vm2 = vcmp.eq.s32.totalorder %v6559_v5, %v8734_v57  ;;  %vm678_vm3 = vcmp.eq.s32.totalorder %v6559_v5, %v8738_v58  ;;  %v9159_v13 = vrot.slane %v9121_v63, %v6573_v9 }
 0x14a   :  { %6066 = vmatprep.subr.msk.mxu0 %vm769_vm4, %v6526_v17  ;;  %6130 = vmatprep.subr.msk.mxu1 %vm771_vm5, %v6526_v17  ;;  %vm645_vm4 = vcmp.eq.s32.totalorder %v6576_v10, %v8722_v55  ;;  %vm647_vm5 = vcmp.eq.s32.totalorder %v6576_v10, %v8726_v56 }
 0x14b   :  { %6067 = vmatpush2.msk.msra.mxu0 %vm768_vm6, %v6526_v17  ;;  %6131 = vmatpush2.msk.msra.mxu1 %vm770_vm7, %v6526_v17  ;;  %v3460_v53 = vpop.f32.mrf.mxu0  ;;  %v3531_v54 = vpop.f32.mrf.mxu1  ;;  %vm644_vm6 = vcmp.eq.s32.totalorder %v6576_v10, %v8734_v57  ;;  %vm646_vm7 = vcmp.eq.s32.totalorder %v6576_v10, %v8738_v58 }
 0x14c   :  { %6068 = vmatprep.subr.msk.mxu0 %vm737_vm8, %v6526_v17  ;;  %6132 = vmatprep.subr.msk.mxu1 %vm739_vm9, %v6526_v17  ;;  %vm613_vm8 = vcmp.eq.s32.totalorder %v6591_v14, %v8722_v55  ;;  %vm615_vm9 = vcmp.eq.s32.totalorder %v6591_v14, %v8726_v56 }
 0x14d   :  { %6069 = vmatpush2.msk.msra.mxu0 %vm736_vm10, %v6526_v17  ;;  %6133 = vmatpush2.msk.msra.mxu1 %vm738_vm11, %v6526_v17  ;;  %v3462_v59 = vpop.f32.mrf.mxu0  ;;  %v3533_v60 = vpop.f32.mrf.mxu1  ;;  %vm612_vm10 = vcmp.eq.s32.totalorder %v6591_v14, %v8734_v57  ;;  %vm614_vm11 = vcmp.eq.s32.totalorder %v6591_v14, %v8738_v58 }
 0x14e   :  { %6070 = vmatprep.subr.msk.mxu0 %vm705_vm12, %v6526_v17  ;;  %6134 = vmatprep.subr.msk.mxu1 %vm707_vm13, %v6526_v17  ;;  %v4422_v61 = vcombine.low %v3460_v53, %v3462_v59  ;;  %v4423_v62 = vcombine.low %v3531_v54, %v3533_v60  ;;  %vm581_vm12 = vcmp.eq.s32.totalorder %v6598_v16, %v8722_v55 }
 0x14f   :  { %6071 = vmatpush2.msk.msra.mxu0 %vm704_vm14, %v6526_v17  ;;  %3884 = vmatprep.mubr.f32.mxu0 %v6551_v3  ;;  %vm583_vm13 = vcmp.eq.s32.totalorder %v6598_v16, %v8726_v56  ;;  %vm580_vm14 = vcmp.eq.s32.totalorder %v6598_v16, %v8734_v57  ;;  %v9576_v53 = vrot.slane %v9121_v63, %v7036_v47 }
 0x150   :  { %6135 = vmatpush2.msk.msra.mxu1 %vm706_vm15, %v6526_v17  ;;  %3955 = vmatprep.mubr.f32.mxu1 %v6551_v3  ;;  %4454 = vst [vmem:[%s10021_s2 + $0x10] sm:$0xff] %v4422_v61  ;;  %4455 = vst [vmem:[%s10021_s2 + $0x18] sm:$0xff] %v4423_v62  ;;  %vm582_vm15 = vcmp.eq.s32.totalorder %v6598_v16, %v8738_v58  ;;  %v9580_v54 = vrot.slane %v9121_v63, %v7039_v48 }
 0x151   :  { %3885 = vmatmul.mubr.f32.vlgmr.msra.gmra.mxu0 %v8352_v52  ;;  %3956 = vmatmul.mubr.f32.vlgmr.msra.gmra.mxu1 %v8352_v52  ;;  %v9568_v52 = vrot.slane %v9121_v63, %v7027_v46 }
 0x152   :  { %6136 = vmatprep.subr.msk.mxu0 %vm677_vm0, %v6526_v17  ;;  %6200 = vmatprep.subr.msk.mxu1 %vm679_vm1, %v6526_v17  ;;  %vm549_vm0 = vcmp.eq.s32.totalorder %v6625_v18, %v8722_v55  ;;  %vm551_vm1 = vcmp.eq.s32.totalorder %v6625_v18, %v8726_v56 }
 0x153   :  { %6137 = vmatpush1.msk.msra.mxu0 %vm676_vm2, %v6526_v17  ;;  %6201 = vmatpush1.msk.msra.mxu1 %vm678_vm3, %v6526_v17  ;;  %vm548_vm2 = vcmp.eq.s32.totalorder %v6625_v18, %v8734_v57  ;;  %vm550_vm3 = vcmp.eq.s32.totalorder %v6625_v18, %v8738_v58 }
 0x154   :  { %6138 = vmatprep.subr.msk.mxu0 %vm645_vm4, %v6526_v17  ;;  %6202 = vmatprep.subr.msk.mxu1 %vm647_vm5, %v6526_v17  ;;  %vm517_vm4 = vcmp.eq.s32.totalorder %v6640_v19, %v8722_v55  ;;  %vm519_vm5 = vcmp.eq.s32.totalorder %v6640_v19, %v8726_v56 }
 0x155   :  { %6139 = vmatpush1.msk.msra.mxu0 %vm644_vm6, %v6526_v17  ;;  %6203 = vmatpush1.msk.msra.mxu1 %vm646_vm7, %v6526_v17  ;;  %vm516_vm6 = vcmp.eq.s32.totalorder %v6640_v19, %v8734_v57  ;;  %vm518_vm7 = vcmp.eq.s32.totalorder %v6640_v19, %v8738_v58 }
 0x156   :  { %6140 = vmatprep.subr.msk.mxu0 %vm613_vm8, %v6526_v17  ;;  %6204 = vmatprep.subr.msk.mxu1 %vm615_vm9, %v6526_v17  ;;  %vm485_vm8 = vcmp.eq.s32.totalorder %v6655_v20, %v8722_v55  ;;  %vm487_vm9 = vcmp.eq.s32.totalorder %v6655_v20, %v8726_v56 }
 0x157   :  { %6141 = vmatpush1.msk.msra.mxu0 %vm612_vm10, %v6526_v17  ;;  %6205 = vmatpush1.msk.msra.mxu1 %vm614_vm11, %v6526_v17  ;;  %vm484_vm10 = vcmp.eq.s32.totalorder %v6655_v20, %v8734_v57  ;;  %vm486_vm11 = vcmp.eq.s32.totalorder %v6655_v20, %v8738_v58 }
 0x158   :  { %6142 = vmatprep.subr.msk.mxu0 %vm581_vm12, %v6526_v17  ;;  %6206 = vmatprep.subr.msk.mxu1 %vm583_vm13, %v6526_v17  ;;  %vm453_vm12 = vcmp.eq.s32.totalorder %v6670_v21, %v8722_v55  ;;  %vm455_vm13 = vcmp.eq.s32.totalorder %v6670_v21, %v8726_v56 }
 0x159   :  { %6143 = vmatpush1.msk.msra.mxu0 %vm580_vm14, %v6526_v17  ;;  %6207 = vmatpush1.msk.msra.mxu1 %vm582_vm15, %v6526_v17  ;;  %vm452_vm14 = vcmp.eq.s32.totalorder %v6670_v21, %v8734_v57  ;;  %vm454_vm15 = vcmp.eq.s32.totalorder %v6670_v21, %v8738_v58 }
 0x15a   :  { %6144 = vmatprep.subr.msk.mxu0 %vm549_vm0, %v6526_v17  ;;  %6208 = vmatprep.subr.msk.mxu1 %vm551_vm1, %v6526_v17  ;;  %vm421_vm0 = vcmp.eq.s32.totalorder %v6685_v22, %v8722_v55  ;;  %vm423_vm1 = vcmp.eq.s32.totalorder %v6685_v22, %v8726_v56 }
 0x15b   :  { %6145 = vmatpush1.msk.msra.mxu0 %vm548_vm2, %v6526_v17  ;;  %6209 = vmatpush1.msk.msra.mxu1 %vm550_vm3, %v6526_v17  ;;  %vm420_vm2 = vcmp.eq.s32.totalorder %v6685_v22, %v8734_v57  ;;  %vm422_vm3 = vcmp.eq.s32.totalorder %v6685_v22, %v8738_v58 }
 0x15c   :  { %6146 = vmatprep.subr.msk.mxu0 %vm517_vm4, %v6526_v17  ;;  %6210 = vmatprep.subr.msk.mxu1 %vm519_vm5, %v6526_v17  ;;  %vm389_vm4 = vcmp.eq.s32.totalorder %v6700_v23, %v8722_v55  ;;  %vm391_vm5 = vcmp.eq.s32.totalorder %v6700_v23, %v8726_v56 }
 0x15d   :  { %6147 = vmatpush1.msk.msra.mxu0 %vm516_vm6, %v6526_v17  ;;  %6211 = vmatpush1.msk.msra.mxu1 %vm518_vm7, %v6526_v17  ;;  %vm388_vm6 = vcmp.eq.s32.totalorder %v6700_v23, %v8734_v57  ;;  %vm390_vm7 = vcmp.eq.s32.totalorder %v6700_v23, %v8738_v58 }
 0x15e   :  { %6148 = vmatprep.subr.msk.mxu0 %vm485_vm8, %v6526_v17  ;;  %6212 = vmatprep.subr.msk.mxu1 %vm487_vm9, %v6526_v17  ;;  %vm357_vm8 = vcmp.eq.s32.totalorder %v6715_v24, %v8722_v55  ;;  %vm359_vm9 = vcmp.eq.s32.totalorder %v6715_v24, %v8726_v56 }
 0x15f   :  { %6149 = vmatpush1.msk.msra.mxu0 %vm484_vm10, %v6526_v17  ;;  %6213 = vmatpush1.msk.msra.mxu1 %vm486_vm11, %v6526_v17  ;;  %vm356_vm10 = vcmp.eq.s32.totalorder %v6715_v24, %v8734_v57  ;;  %vm358_vm11 = vcmp.eq.s32.totalorder %v6715_v24, %v8738_v58 }
 0x160   :  { %6150 = vmatprep.subr.msk.mxu0 %vm453_vm12, %v6526_v17  ;;  %6214 = vmatprep.subr.msk.mxu1 %vm455_vm13, %v6526_v17  ;;  %vm325_vm12 = vcmp.eq.s32.totalorder %v6730_v25, %v8722_v55  ;;  %vm327_vm13 = vcmp.eq.s32.totalorder %v6730_v25, %v8726_v56 }
 0x161   :  { %6151 = vmatpush1.msk.msra.mxu0 %vm452_vm14, %v6526_v17  ;;  %6215 = vmatpush1.msk.msra.mxu1 %vm454_vm15, %v6526_v17  ;;  %vm324_vm14 = vcmp.eq.s32.totalorder %v6730_v25, %v8734_v57  ;;  %vm326_vm15 = vcmp.eq.s32.totalorder %v6730_v25, %v8738_v58 }
 0x162   :  { %6152 = vmatprep.subr.msk.mxu0 %vm421_vm0, %v6526_v17  ;;  %6216 = vmatprep.subr.msk.mxu1 %vm423_vm1, %v6526_v17  ;;  %vm293_vm0 = vcmp.eq.s32.totalorder %v6745_v26, %v8722_v55  ;;  %vm295_vm1 = vcmp.eq.s32.totalorder %v6745_v26, %v8726_v56 }
 0x163   :  { %6153 = vmatpush1.msk.msra.mxu0 %vm420_vm2, %v6526_v17  ;;  %6217 = vmatpush1.msk.msra.mxu1 %vm422_vm3, %v6526_v17  ;;  %vm292_vm2 = vcmp.eq.s32.totalorder %v6745_v26, %v8734_v57  ;;  %vm294_vm3 = vcmp.eq.s32.totalorder %v6745_v26, %v8738_v58 }
 0x164   :  { %6154 = vmatprep.subr.msk.mxu0 %vm389_vm4, %v6526_v17  ;;  %6218 = vmatprep.subr.msk.mxu1 %vm391_vm5, %v6526_v17  ;;  %vm261_vm4 = vcmp.eq.s32.totalorder %v6760_v27, %v8722_v55  ;;  %vm263_vm5 = vcmp.eq.s32.totalorder %v6760_v27, %v8726_v56 }
 0x165   :  { %6155 = vmatpush1.msk.msra.mxu0 %vm388_vm6, %v6526_v17  ;;  %6219 = vmatpush1.msk.msra.mxu1 %vm390_vm7, %v6526_v17  ;;  %vm260_vm6 = vcmp.eq.s32.totalorder %v6760_v27, %v8734_v57  ;;  %vm262_vm7 = vcmp.eq.s32.totalorder %v6760_v27, %v8738_v58 }
 0x166   :  { %6156 = vmatprep.subr.msk.mxu0 %vm357_vm8, %v6526_v17  ;;  %6220 = vmatprep.subr.msk.mxu1 %vm359_vm9, %v6526_v17  ;;  %vm229_vm8 = vcmp.eq.s32.totalorder %v6775_v28, %v8722_v55  ;;  %vm231_vm9 = vcmp.eq.s32.totalorder %v6775_v28, %v8726_v56 }
 0x167   :  { %6157 = vmatpush1.msk.msra.mxu0 %vm356_vm10, %v6526_v17  ;;  %6221 = vmatpush1.msk.msra.mxu1 %vm358_vm11, %v6526_v17  ;;  %vm228_vm10 = vcmp.eq.s32.totalorder %v6775_v28, %v8734_v57  ;;  %vm230_vm11 = vcmp.eq.s32.totalorder %v6775_v28, %v8738_v58 }
 0x168   :  { %6158 = vmatprep.subr.msk.mxu0 %vm325_vm12, %v6526_v17  ;;  %6222 = vmatprep.subr.msk.mxu1 %vm327_vm13, %v6526_v17  ;;  %vm197_vm12 = vcmp.eq.s32.totalorder %v6547_v2, %v8722_v55  ;;  %vm199_vm13 = vcmp.eq.s32.totalorder %v6547_v2, %v8726_v56 }
 0x169   :  { %6159 = vmatpush1.msk.msra.mxu0 %vm324_vm14, %v6526_v17  ;;  %6223 = vmatpush1.msk.msra.mxu1 %vm326_vm15, %v6526_v17  ;;  %vm196_vm14 = vcmp.eq.s32.totalorder %v6547_v2, %v8734_v57  ;;  %vm198_vm15 = vcmp.eq.s32.totalorder %v6547_v2, %v8738_v58 }
 0x16a   :  { %6160 = vmatprep.subr.msk.mxu0 %vm293_vm0, %v6526_v17  ;;  %6224 = vmatprep.subr.msk.mxu1 %vm295_vm1, %v6526_v17  ;;  %vm1189_vm0 = vcmp.eq.s32.totalorder %v6802_v29, %v8722_v55  ;;  %vm1191_vm1 = vcmp.eq.s32.totalorder %v6802_v29, %v8726_v56 }
 0x16b   :  { %6161 = vmatpush1.msk.msra.mxu0 %vm292_vm2, %v6526_v17  ;;  %6225 = vmatpush1.msk.msra.mxu1 %vm294_vm3, %v6526_v17  ;;  %vm1188_vm2 = vcmp.eq.s32.totalorder %v6802_v29, %v8734_v57  ;;  %vm1190_vm3 = vcmp.eq.s32.totalorder %v6802_v29, %v8738_v58 }
 0x16c   :  { %6162 = vmatprep.subr.msk.mxu0 %vm261_vm4, %v6526_v17  ;;  %6226 = vmatprep.subr.msk.mxu1 %vm263_vm5, %v6526_v17  ;;  %vm1157_vm4 = vcmp.eq.s32.totalorder %v6817_v30, %v8722_v55  ;;  %vm1159_vm5 = vcmp.eq.s32.totalorder %v6817_v30, %v8726_v56 }
 0x16d   :  { %6163 = vmatpush1.msk.msra.mxu0 %vm260_vm6, %v6526_v17  ;;  %6227 = vmatpush1.msk.msra.mxu1 %vm262_vm7, %v6526_v17  ;;  %vm1156_vm6 = vcmp.eq.s32.totalorder %v6817_v30, %v8734_v57  ;;  %vm1158_vm7 = vcmp.eq.s32.totalorder %v6817_v30, %v8738_v58 }
 0x16e   :  { %6164 = vmatprep.subr.msk.mxu0 %vm229_vm8, %v6526_v17  ;;  %6228 = vmatprep.subr.msk.mxu1 %vm231_vm9, %v6526_v17  ;;  %vm1125_vm8 = vcmp.eq.s32.totalorder %v6832_v31, %v8722_v55  ;;  %vm1127_vm9 = vcmp.eq.s32.totalorder %v6832_v31, %v8726_v56 }
 0x16f   :  { %6165 = vmatpush1.msk.msra.mxu0 %vm228_vm10, %v6526_v17  ;;  %6229 = vmatpush1.msk.msra.mxu1 %vm230_vm11, %v6526_v17  ;;  %vm1124_vm10 = vcmp.eq.s32.totalorder %v6832_v31, %v8734_v57  ;;  %vm1126_vm11 = vcmp.eq.s32.totalorder %v6832_v31, %v8738_v58 }
 0x170   :  { %6166 = vmatprep.subr.msk.mxu0 %vm197_vm12, %v6526_v17  ;;  %6230 = vmatprep.subr.msk.mxu1 %vm199_vm13, %v6526_v17  ;;  %vm1093_vm12 = vcmp.eq.s32.totalorder %v6847_v32, %v8722_v55  ;;  %vm1095_vm13 = vcmp.eq.s32.totalorder %v6847_v32, %v8726_v56 }
 0x171   :  { %6167 = vmatpush1.msk.msra.mxu0 %vm196_vm14, %v6526_v17  ;;  %6231 = vmatpush1.msk.msra.mxu1 %vm198_vm15, %v6526_v17  ;;  %vm1092_vm14 = vcmp.eq.s32.totalorder %v6847_v32, %v8734_v57  ;;  %vm1094_vm15 = vcmp.eq.s32.totalorder %v6847_v32, %v8738_v58 }
 0x172   :  { %6168 = vmatprep.subr.msk.mxu0 %vm1189_vm0, %v6526_v17  ;;  %6232 = vmatprep.subr.msk.mxu1 %vm1191_vm1, %v6526_v17  ;;  %vm1061_vm0 = vcmp.eq.s32.totalorder %v6862_v33, %v8722_v55  ;;  %vm1063_vm1 = vcmp.eq.s32.totalorder %v6862_v33, %v8726_v56 }
 0x173   :  { %6169 = vmatpush2.msk.msra.mxu0 %vm1188_vm2, %v6526_v17  ;;  %6233 = vmatpush2.msk.msra.mxu1 %vm1190_vm3, %v6526_v17  ;;  %vm1060_vm2 = vcmp.eq.s32.totalorder %v6862_v33, %v8734_v57  ;;  %vm1062_vm3 = vcmp.eq.s32.totalorder %v6862_v33, %v8738_v58 }
 0x174   :  { %6170 = vmatprep.subr.msk.mxu0 %vm1157_vm4, %v6526_v17  ;;  %6234 = vmatprep.subr.msk.mxu1 %vm1159_vm5, %v6526_v17  ;;  %vm1029_vm4 = vcmp.eq.s32.totalorder %v6877_v34, %v8722_v55  ;;  %vm1031_vm5 = vcmp.eq.s32.totalorder %v6877_v34, %v8726_v56 }
 0x175   :  { %6171 = vmatpush2.msk.msra.mxu0 %vm1156_vm6, %v6526_v17  ;;  %6235 = vmatpush2.msk.msra.mxu1 %vm1158_vm7, %v6526_v17  ;;  %vm1028_vm6 = vcmp.eq.s32.totalorder %v6877_v34, %v8734_v57  ;;  %vm1030_vm7 = vcmp.eq.s32.totalorder %v6877_v34, %v8738_v58 }
 0x176   :  { %6172 = vmatprep.subr.msk.mxu0 %vm1125_vm8, %v6526_v17  ;;  %6236 = vmatprep.subr.msk.mxu1 %vm1127_vm9, %v6526_v17  ;;  %vm997_vm8 = vcmp.eq.s32.totalorder %v6892_v35, %v8722_v55  ;;  %vm999_vm9 = vcmp.eq.s32.totalorder %v6892_v35, %v8726_v56 }
 0x177   :  { %6173 = vmatpush2.msk.msra.mxu0 %vm1124_vm10, %v6526_v17  ;;  %6237 = vmatpush2.msk.msra.mxu1 %vm1126_vm11, %v6526_v17  ;;  %vm996_vm10 = vcmp.eq.s32.totalorder %v6892_v35, %v8734_v57  ;;  %vm998_vm11 = vcmp.eq.s32.totalorder %v6892_v35, %v8738_v58 }
 0x178   :  { %6174 = vmatprep.subr.msk.mxu0 %vm1093_vm12, %v6526_v17  ;;  %6238 = vmatprep.subr.msk.mxu1 %vm1095_vm13, %v6526_v17  ;;  %vm965_vm12 = vcmp.eq.s32.totalorder %v6907_v36, %v8722_v55  ;;  %vm967_vm13 = vcmp.eq.s32.totalorder %v6907_v36, %v8726_v56 }
 0x179   :  { %6175 = vmatpush2.msk.msra.mxu0 %vm1092_vm14, %v6526_v17  ;;  %6239 = vmatpush2.msk.msra.mxu1 %vm1094_vm15, %v6526_v17  ;;  %vm964_vm14 = vcmp.eq.s32.totalorder %v6907_v36, %v8734_v57  ;;  %vm966_vm15 = vcmp.eq.s32.totalorder %v6907_v36, %v8738_v58 }
 0x17a   :  { %6176 = vmatprep.subr.msk.mxu0 %vm1061_vm0, %v6526_v17  ;;  %6240 = vmatprep.subr.msk.mxu1 %vm1063_vm1, %v6526_v17  ;;  %vm933_vm0 = vcmp.eq.s32.totalorder %v6922_v37, %v8722_v55  ;;  %vm935_vm1 = vcmp.eq.s32.totalorder %v6922_v37, %v8726_v56 }
 0x17b   :  { %6177 = vmatpush2.msk.msra.mxu0 %vm1060_vm2, %v6526_v17  ;;  %6241 = vmatpush2.msk.msra.mxu1 %vm1062_vm3, %v6526_v17  ;;  %vm932_vm2 = vcmp.eq.s32.totalorder %v6922_v37, %v8734_v57  ;;  %vm934_vm3 = vcmp.eq.s32.totalorder %v6922_v37, %v8738_v58 }
 0x17c   :  { %6178 = vmatprep.subr.msk.mxu0 %vm1029_vm4, %v6526_v17  ;;  %6242 = vmatprep.subr.msk.mxu1 %vm1031_vm5, %v6526_v17  ;;  %vm901_vm4 = vcmp.eq.s32.totalorder %v6937_v38, %v8722_v55  ;;  %vm903_vm5 = vcmp.eq.s32.totalorder %v6937_v38, %v8726_v56 }
 0x17d   :  { %6179 = vmatpush2.msk.msra.mxu0 %vm1028_vm6, %v6526_v17  ;;  %6243 = vmatpush2.msk.msra.mxu1 %vm1030_vm7, %v6526_v17  ;;  %vm900_vm6 = vcmp.eq.s32.totalorder %v6937_v38, %v8734_v57  ;;  %vm902_vm7 = vcmp.eq.s32.totalorder %v6937_v38, %v8738_v58 }
 0x17e   :  { %6180 = vmatprep.subr.msk.mxu0 %vm997_vm8, %v6526_v17  ;;  %6244 = vmatprep.subr.msk.mxu1 %vm999_vm9, %v6526_v17  ;;  %vm869_vm8 = vcmp.eq.s32.totalorder %v6952_v39, %v8722_v55  ;;  %vm871_vm9 = vcmp.eq.s32.totalorder %v6952_v39, %v8726_v56 }
 0x17f   :  { %6181 = vmatpush2.msk.msra.mxu0 %vm996_vm10, %v6526_v17  ;;  %6245 = vmatpush2.msk.msra.mxu1 %vm998_vm11, %v6526_v17  ;;  %vm868_vm10 = vcmp.eq.s32.totalorder %v6952_v39, %v8734_v57  ;;  %vm870_vm11 = vcmp.eq.s32.totalorder %v6952_v39, %v8738_v58 }
 0x180   :  { %6182 = vmatprep.subr.msk.mxu0 %vm965_vm12, %v6526_v17  ;;  %6246 = vmatprep.subr.msk.mxu1 %vm967_vm13, %v6526_v17  ;;  %vm837_vm12 = vcmp.eq.s32.totalorder %v6967_v40, %v8722_v55  ;;  %vm839_vm13 = vcmp.eq.s32.totalorder %v6967_v40, %v8726_v56 }
 0x181   :  { %6183 = vmatpush2.msk.msra.mxu0 %vm964_vm14, %v6526_v17  ;;  %6247 = vmatpush2.msk.msra.mxu1 %vm966_vm15, %v6526_v17  ;;  %vm836_vm14 = vcmp.eq.s32.totalorder %v6967_v40, %v8734_v57  ;;  %vm838_vm15 = vcmp.eq.s32.totalorder %v6967_v40, %v8738_v58 }
 0x182   :  { %6184 = vmatprep.subr.msk.mxu0 %vm933_vm0, %v6526_v17  ;;  %6248 = vmatprep.subr.msk.mxu1 %vm935_vm1, %v6526_v17  ;;  %vm805_vm0 = vcmp.eq.s32.totalorder %v6982_v41, %v8722_v55  ;;  %vm807_vm1 = vcmp.eq.s32.totalorder %v6982_v41, %v8726_v56 }
 0x183   :  { %6185 = vmatpush2.msk.msra.mxu0 %vm932_vm2, %v6526_v17  ;;  %6249 = vmatpush2.msk.msra.mxu1 %vm934_vm3, %v6526_v17  ;;  %vm804_vm2 = vcmp.eq.s32.totalorder %v6982_v41, %v8734_v57  ;;  %vm806_vm3 = vcmp.eq.s32.totalorder %v6982_v41, %v8738_v58 }
 0x184   :  { %6186 = vmatprep.subr.msk.mxu0 %vm901_vm4, %v6526_v17  ;;  %6250 = vmatprep.subr.msk.mxu1 %vm903_vm5, %v6526_v17  ;;  %vm773_vm4 = vcmp.eq.s32.totalorder %v6997_v42, %v8722_v55  ;;  %vm775_vm5 = vcmp.eq.s32.totalorder %v6997_v42, %v8726_v56 }
 0x185   :  { %6187 = vmatpush2.msk.msra.mxu0 %vm900_vm6, %v6526_v17  ;;  %6251 = vmatpush2.msk.msra.mxu1 %vm902_vm7, %v6526_v17  ;;  %vm772_vm6 = vcmp.eq.s32.totalorder %v6997_v42, %v8734_v57  ;;  %vm774_vm7 = vcmp.eq.s32.totalorder %v6997_v42, %v8738_v58 }
 0x186   :  { %6188 = vmatprep.subr.msk.mxu0 %vm869_vm8, %v6526_v17  ;;  %6252 = vmatprep.subr.msk.mxu1 %vm871_vm9, %v6526_v17  ;;  %vm741_vm8 = vcmp.eq.s32.totalorder %v7006_v43, %v8722_v55  ;;  %vm743_vm9 = vcmp.eq.s32.totalorder %v7006_v43, %v8726_v56 }
 0x187   :  { %6189 = vmatpush2.msk.msra.mxu0 %vm868_vm10, %v6526_v17  ;;  %6253 = vmatpush2.msk.msra.mxu1 %vm870_vm11, %v6526_v17  ;;  %vm740_vm10 = vcmp.eq.s32.totalorder %v7006_v43, %v8734_v57  ;;  %vm742_vm11 = vcmp.eq.s32.totalorder %v7006_v43, %v8738_v58 }
 0x188   :  { %6190 = vmatprep.subr.msk.mxu0 %vm837_vm12, %v6526_v17  ;;  %6254 = vmatprep.subr.msk.mxu1 %vm839_vm13, %v6526_v17  ;;  %vm709_vm12 = vcmp.eq.s32.totalorder %v7015_v44, %v8722_v55  ;;  %vm711_vm13 = vcmp.eq.s32.totalorder %v7015_v44, %v8726_v56 }
 0x189   :  { %6191 = vmatpush2.msk.msra.mxu0 %vm836_vm14, %v6526_v17  ;;  %6255 = vmatpush2.msk.msra.mxu1 %vm838_vm15, %v6526_v17  ;;  %vm708_vm14 = vcmp.eq.s32.totalorder %v7015_v44, %v8734_v57  ;;  %vm710_vm15 = vcmp.eq.s32.totalorder %v7015_v44, %v8738_v58 }
 0x18a   :  { %6192 = vmatprep.subr.msk.mxu0 %vm805_vm0, %v6526_v17  ;;  %6256 = vmatprep.subr.msk.mxu1 %vm807_vm1, %v6526_v17  ;;  %vm681_vm0 = vcmp.eq.s32.totalorder %v6559_v5, %v9143_v4  ;;  %vm683_vm1 = vcmp.eq.s32.totalorder %v6559_v5, %v9147_v11 }
 0x18b   :  { %6193 = vmatpush2.msk.msra.mxu0 %vm804_vm2, %v6526_v17  ;;  %6257 = vmatpush2.msk.msra.mxu1 %vm806_vm3, %v6526_v17  ;;  %vm680_vm2 = vcmp.eq.s32.totalorder %v6559_v5, %v9155_v12  ;;  %vm682_vm3 = vcmp.eq.s32.totalorder %v6559_v5, %v9159_v13 }
 0x18c   :  { %6194 = vmatprep.subr.msk.mxu0 %vm773_vm4, %v6526_v17  ;;  %6258 = vmatprep.subr.msk.mxu1 %vm775_vm5, %v6526_v17  ;;  %vm649_vm4 = vcmp.eq.s32.totalorder %v6576_v10, %v9143_v4  ;;  %vm651_vm5 = vcmp.eq.s32.totalorder %v6576_v10, %v9147_v11 }
 0x18d   :  { %6195 = vmatpush2.msk.msra.mxu0 %vm772_vm6, %v6526_v17  ;;  %6259 = vmatpush2.msk.msra.mxu1 %vm774_vm7, %v6526_v17  ;;  %v3602_v0 = vpop.f32.mrf.mxu0  ;;  %v3673_v1 = vpop.f32.mrf.mxu1  ;;  %vm648_vm6 = vcmp.eq.s32.totalorder %v6576_v10, %v9155_v12  ;;  %vm650_vm7 = vcmp.eq.s32.totalorder %v6576_v10, %v9159_v13 }
 0x18e   :  { %6196 = vmatprep.subr.msk.mxu0 %vm741_vm8, %v6526_v17  ;;  %6260 = vmatprep.subr.msk.mxu1 %vm743_vm9, %v6526_v17  ;;  %vm617_vm8 = vcmp.eq.s32.totalorder %v6591_v14, %v9143_v4  ;;  %vm619_vm9 = vcmp.eq.s32.totalorder %v6591_v14, %v9147_v11 }
 0x18f   :  { %6197 = vmatpush2.msk.msra.mxu0 %vm740_vm10, %v6526_v17  ;;  %6261 = vmatpush2.msk.msra.mxu1 %vm742_vm11, %v6526_v17  ;;  %v3604_v6 = vpop.f32.mrf.mxu0  ;;  %v3675_v7 = vpop.f32.mrf.mxu1  ;;  %vm616_vm10 = vcmp.eq.s32.totalorder %v6591_v14, %v9155_v12  ;;  %vm618_vm11 = vcmp.eq.s32.totalorder %v6591_v14, %v9159_v13 }
 0x190   :  { %6198 = vmatprep.subr.msk.mxu0 %vm709_vm12, %v6526_v17  ;;  %6262 = vmatprep.subr.msk.mxu1 %vm711_vm13, %v6526_v17  ;;  %v4424_v8 = vcombine.low %v3602_v0, %v3604_v6  ;;  %v4425_v9 = vcombine.low %v3673_v1, %v3675_v7  ;;  %vm585_vm12 = vcmp.eq.s32.totalorder %v6598_v16, %v9143_v4 }
 0x191   :  { %6199 = vmatpush2.msk.msra.mxu0 %vm708_vm14, %v6526_v17  ;;  %4026 = vmatprep.mubr.f32.mxu0 %v6551_v3  ;;  %vm587_vm13 = vcmp.eq.s32.totalorder %v6598_v16, %v9147_v11  ;;  %vm584_vm14 = vcmp.eq.s32.totalorder %v6598_v16, %v9155_v12 }
 0x192   :  { %6263 = vmatpush2.msk.msra.mxu1 %vm710_vm15, %v6526_v17  ;;  %4097 = vmatprep.mubr.f32.mxu1 %v6551_v3  ;;  %4456 = vst [vmem:[%s10021_s2 + $0x20] sm:$0xff] %v4424_v8  ;;  %4457 = vst [vmem:[%s10021_s2 + $0x28] sm:$0xff] %v4425_v9  ;;  %vm586_vm15 = vcmp.eq.s32.totalorder %v6598_v16, %v9159_v13 }
 0x193   :  { %4027 = vmatmul.mubr.f32.vlgmr.msra.gmra.mxu0 %v9194_v15  ;;  %4098 = vmatmul.mubr.f32.vlgmr.msra.gmra.mxu1 %v9194_v15 }
 0x194   :  { %6264 = vmatprep.subr.msk.mxu0 %vm681_vm0, %v6526_v17  ;;  %6328 = vmatprep.subr.msk.mxu1 %vm683_vm1, %v6526_v17  ;;  %vm553_vm0 = vcmp.eq.s32.totalorder %v6625_v18, %v9143_v4  ;;  %vm555_vm1 = vcmp.eq.s32.totalorder %v6625_v18, %v9147_v11 }
 0x195   :  { %6265 = vmatpush1.msk.msra.mxu0 %vm680_vm2, %v6526_v17  ;;  %6329 = vmatpush1.msk.msra.mxu1 %vm682_vm3, %v6526_v17  ;;  %vm552_vm2 = vcmp.eq.s32.totalorder %v6625_v18, %v9155_v12  ;;  %vm554_vm3 = vcmp.eq.s32.totalorder %v6625_v18, %v9159_v13 }
 0x196   :  { %6266 = vmatprep.subr.msk.mxu0 %vm649_vm4, %v6526_v17  ;;  %6330 = vmatprep.subr.msk.mxu1 %vm651_vm5, %v6526_v17  ;;  %vm521_vm4 = vcmp.eq.s32.totalorder %v6640_v19, %v9143_v4  ;;  %vm523_vm5 = vcmp.eq.s32.totalorder %v6640_v19, %v9147_v11 }
 0x197   :  { %6267 = vmatpush1.msk.msra.mxu0 %vm648_vm6, %v6526_v17  ;;  %6331 = vmatpush1.msk.msra.mxu1 %vm650_vm7, %v6526_v17  ;;  %vm520_vm6 = vcmp.eq.s32.totalorder %v6640_v19, %v9155_v12  ;;  %vm522_vm7 = vcmp.eq.s32.totalorder %v6640_v19, %v9159_v13 }
 0x198   :  { %6268 = vmatprep.subr.msk.mxu0 %vm617_vm8, %v6526_v17  ;;  %6332 = vmatprep.subr.msk.mxu1 %vm619_vm9, %v6526_v17  ;;  %vm489_vm8 = vcmp.eq.s32.totalorder %v6655_v20, %v9143_v4  ;;  %vm491_vm9 = vcmp.eq.s32.totalorder %v6655_v20, %v9147_v11 }
 0x199   :  { %6269 = vmatpush1.msk.msra.mxu0 %vm616_vm10, %v6526_v17  ;;  %6333 = vmatpush1.msk.msra.mxu1 %vm618_vm11, %v6526_v17  ;;  %vm488_vm10 = vcmp.eq.s32.totalorder %v6655_v20, %v9155_v12  ;;  %vm490_vm11 = vcmp.eq.s32.totalorder %v6655_v20, %v9159_v13 }
 0x19a   :  { %6270 = vmatprep.subr.msk.mxu0 %vm585_vm12, %v6526_v17  ;;  %6334 = vmatprep.subr.msk.mxu1 %vm587_vm13, %v6526_v17  ;;  %vm457_vm12 = vcmp.eq.s32.totalorder %v6670_v21, %v9143_v4  ;;  %vm459_vm13 = vcmp.eq.s32.totalorder %v6670_v21, %v9147_v11 }
 0x19b   :  { %6271 = vmatpush1.msk.msra.mxu0 %vm584_vm14, %v6526_v17  ;;  %6335 = vmatpush1.msk.msra.mxu1 %vm586_vm15, %v6526_v17  ;;  %vm456_vm14 = vcmp.eq.s32.totalorder %v6670_v21, %v9155_v12  ;;  %vm458_vm15 = vcmp.eq.s32.totalorder %v6670_v21, %v9159_v13 }
 0x19c   :  { %6272 = vmatprep.subr.msk.mxu0 %vm553_vm0, %v6526_v17  ;;  %6336 = vmatprep.subr.msk.mxu1 %vm555_vm1, %v6526_v17  ;;  %vm425_vm0 = vcmp.eq.s32.totalorder %v6685_v22, %v9143_v4  ;;  %vm427_vm1 = vcmp.eq.s32.totalorder %v6685_v22, %v9147_v11 }
 0x19d   :  { %6273 = vmatpush1.msk.msra.mxu0 %vm552_vm2, %v6526_v17  ;;  %6337 = vmatpush1.msk.msra.mxu1 %vm554_vm3, %v6526_v17  ;;  %vm424_vm2 = vcmp.eq.s32.totalorder %v6685_v22, %v9155_v12  ;;  %vm426_vm3 = vcmp.eq.s32.totalorder %v6685_v22, %v9159_v13 }
 0x19e   :  { %6274 = vmatprep.subr.msk.mxu0 %vm521_vm4, %v6526_v17  ;;  %6338 = vmatprep.subr.msk.mxu1 %vm523_vm5, %v6526_v17  ;;  %vm393_vm4 = vcmp.eq.s32.totalorder %v6700_v23, %v9143_v4  ;;  %vm395_vm5 = vcmp.eq.s32.totalorder %v6700_v23, %v9147_v11 }
 0x19f   :  { %6275 = vmatpush1.msk.msra.mxu0 %vm520_vm6, %v6526_v17  ;;  %6339 = vmatpush1.msk.msra.mxu1 %vm522_vm7, %v6526_v17  ;;  %vm392_vm6 = vcmp.eq.s32.totalorder %v6700_v23, %v9155_v12  ;;  %vm394_vm7 = vcmp.eq.s32.totalorder %v6700_v23, %v9159_v13 }
 0x1a0   :  { %6276 = vmatprep.subr.msk.mxu0 %vm489_vm8, %v6526_v17  ;;  %6340 = vmatprep.subr.msk.mxu1 %vm491_vm9, %v6526_v17  ;;  %vm361_vm8 = vcmp.eq.s32.totalorder %v6715_v24, %v9143_v4  ;;  %vm363_vm9 = vcmp.eq.s32.totalorder %v6715_v24, %v9147_v11 }
 0x1a1   :  { %6277 = vmatpush1.msk.msra.mxu0 %vm488_vm10, %v6526_v17  ;;  %6341 = vmatpush1.msk.msra.mxu1 %vm490_vm11, %v6526_v17  ;;  %vm360_vm10 = vcmp.eq.s32.totalorder %v6715_v24, %v9155_v12  ;;  %vm362_vm11 = vcmp.eq.s32.totalorder %v6715_v24, %v9159_v13 }
 0x1a2   :  { %6278 = vmatprep.subr.msk.mxu0 %vm457_vm12, %v6526_v17  ;;  %6342 = vmatprep.subr.msk.mxu1 %vm459_vm13, %v6526_v17  ;;  %vm329_vm12 = vcmp.eq.s32.totalorder %v6730_v25, %v9143_v4  ;;  %vm331_vm13 = vcmp.eq.s32.totalorder %v6730_v25, %v9147_v11 }
 0x1a3   :  { %6279 = vmatpush1.msk.msra.mxu0 %vm456_vm14, %v6526_v17  ;;  %6343 = vmatpush1.msk.msra.mxu1 %vm458_vm15, %v6526_v17  ;;  %vm328_vm14 = vcmp.eq.s32.totalorder %v6730_v25, %v9155_v12  ;;  %vm330_vm15 = vcmp.eq.s32.totalorder %v6730_v25, %v9159_v13 }
 0x1a4   :  { %6280 = vmatprep.subr.msk.mxu0 %vm425_vm0, %v6526_v17  ;;  %6344 = vmatprep.subr.msk.mxu1 %vm427_vm1, %v6526_v17  ;;  %vm297_vm0 = vcmp.eq.s32.totalorder %v6745_v26, %v9143_v4  ;;  %vm299_vm1 = vcmp.eq.s32.totalorder %v6745_v26, %v9147_v11 }
 0x1a5   :  { %6281 = vmatpush1.msk.msra.mxu0 %vm424_vm2, %v6526_v17  ;;  %6345 = vmatpush1.msk.msra.mxu1 %vm426_vm3, %v6526_v17  ;;  %vm296_vm2 = vcmp.eq.s32.totalorder %v6745_v26, %v9155_v12  ;;  %vm298_vm3 = vcmp.eq.s32.totalorder %v6745_v26, %v9159_v13 }
 0x1a6   :  { %6282 = vmatprep.subr.msk.mxu0 %vm393_vm4, %v6526_v17  ;;  %6346 = vmatprep.subr.msk.mxu1 %vm395_vm5, %v6526_v17  ;;  %vm265_vm4 = vcmp.eq.s32.totalorder %v6760_v27, %v9143_v4  ;;  %vm267_vm5 = vcmp.eq.s32.totalorder %v6760_v27, %v9147_v11 }
 0x1a7   :  { %6283 = vmatpush1.msk.msra.mxu0 %vm392_vm6, %v6526_v17  ;;  %6347 = vmatpush1.msk.msra.mxu1 %vm394_vm7, %v6526_v17  ;;  %vm264_vm6 = vcmp.eq.s32.totalorder %v6760_v27, %v9155_v12  ;;  %vm266_vm7 = vcmp.eq.s32.totalorder %v6760_v27, %v9159_v13 }
 0x1a8   :  { %6284 = vmatprep.subr.msk.mxu0 %vm361_vm8, %v6526_v17  ;;  %6348 = vmatprep.subr.msk.mxu1 %vm363_vm9, %v6526_v17  ;;  %vm233_vm8 = vcmp.eq.s32.totalorder %v6775_v28, %v9143_v4  ;;  %vm235_vm9 = vcmp.eq.s32.totalorder %v6775_v28, %v9147_v11 }
 0x1a9   :  { %6285 = vmatpush1.msk.msra.mxu0 %vm360_vm10, %v6526_v17  ;;  %6349 = vmatpush1.msk.msra.mxu1 %vm362_vm11, %v6526_v17  ;;  %vm232_vm10 = vcmp.eq.s32.totalorder %v6775_v28, %v9155_v12  ;;  %vm234_vm11 = vcmp.eq.s32.totalorder %v6775_v28, %v9159_v13 }
 0x1aa   :  { %6286 = vmatprep.subr.msk.mxu0 %vm329_vm12, %v6526_v17  ;;  %6350 = vmatprep.subr.msk.mxu1 %vm331_vm13, %v6526_v17  ;;  %vm201_vm12 = vcmp.eq.s32.totalorder %v6547_v2, %v9143_v4  ;;  %vm203_vm13 = vcmp.eq.s32.totalorder %v6547_v2, %v9147_v11 }
 0x1ab   :  { %6287 = vmatpush1.msk.msra.mxu0 %vm328_vm14, %v6526_v17  ;;  %6351 = vmatpush1.msk.msra.mxu1 %vm330_vm15, %v6526_v17  ;;  %vm200_vm14 = vcmp.eq.s32.totalorder %v6547_v2, %v9155_v12  ;;  %vm202_vm15 = vcmp.eq.s32.totalorder %v6547_v2, %v9159_v13 }
 0x1ac   :  { %6288 = vmatprep.subr.msk.mxu0 %vm297_vm0, %v6526_v17  ;;  %6352 = vmatprep.subr.msk.mxu1 %vm299_vm1, %v6526_v17  ;;  %vm1193_vm0 = vcmp.eq.s32.totalorder %v6802_v29, %v9143_v4  ;;  %vm1195_vm1 = vcmp.eq.s32.totalorder %v6802_v29, %v9147_v11 }
 0x1ad   :  { %6289 = vmatpush1.msk.msra.mxu0 %vm296_vm2, %v6526_v17  ;;  %6353 = vmatpush1.msk.msra.mxu1 %vm298_vm3, %v6526_v17  ;;  %vm1192_vm2 = vcmp.eq.s32.totalorder %v6802_v29, %v9155_v12  ;;  %vm1194_vm3 = vcmp.eq.s32.totalorder %v6802_v29, %v9159_v13 }
 0x1ae   :  { %6290 = vmatprep.subr.msk.mxu0 %vm265_vm4, %v6526_v17  ;;  %6354 = vmatprep.subr.msk.mxu1 %vm267_vm5, %v6526_v17  ;;  %vm1161_vm4 = vcmp.eq.s32.totalorder %v6817_v30, %v9143_v4  ;;  %vm1163_vm5 = vcmp.eq.s32.totalorder %v6817_v30, %v9147_v11 }
 0x1af   :  { %6291 = vmatpush1.msk.msra.mxu0 %vm264_vm6, %v6526_v17  ;;  %6355 = vmatpush1.msk.msra.mxu1 %vm266_vm7, %v6526_v17  ;;  %vm1160_vm6 = vcmp.eq.s32.totalorder %v6817_v30, %v9155_v12  ;;  %vm1162_vm7 = vcmp.eq.s32.totalorder %v6817_v30, %v9159_v13 }
 0x1b0   :  { %6292 = vmatprep.subr.msk.mxu0 %vm233_vm8, %v6526_v17  ;;  %6356 = vmatprep.subr.msk.mxu1 %vm235_vm9, %v6526_v17  ;;  %vm1129_vm8 = vcmp.eq.s32.totalorder %v6832_v31, %v9143_v4  ;;  %vm1131_vm9 = vcmp.eq.s32.totalorder %v6832_v31, %v9147_v11 }
 0x1b1   :  { %6293 = vmatpush1.msk.msra.mxu0 %vm232_vm10, %v6526_v17  ;;  %6357 = vmatpush1.msk.msra.mxu1 %vm234_vm11, %v6526_v17  ;;  %vm1128_vm10 = vcmp.eq.s32.totalorder %v6832_v31, %v9155_v12  ;;  %vm1130_vm11 = vcmp.eq.s32.totalorder %v6832_v31, %v9159_v13 }
 0x1b2   :  { %6294 = vmatprep.subr.msk.mxu0 %vm201_vm12, %v6526_v17  ;;  %6358 = vmatprep.subr.msk.mxu1 %vm203_vm13, %v6526_v17  ;;  %vm1097_vm12 = vcmp.eq.s32.totalorder %v6847_v32, %v9143_v4  ;;  %vm1099_vm13 = vcmp.eq.s32.totalorder %v6847_v32, %v9147_v11 }
 0x1b3   :  { %6295 = vmatpush1.msk.msra.mxu0 %vm200_vm14, %v6526_v17  ;;  %6359 = vmatpush1.msk.msra.mxu1 %vm202_vm15, %v6526_v17  ;;  %vm1096_vm14 = vcmp.eq.s32.totalorder %v6847_v32, %v9155_v12  ;;  %vm1098_vm15 = vcmp.eq.s32.totalorder %v6847_v32, %v9159_v13 }
 0x1b4   :  { %6296 = vmatprep.subr.msk.mxu0 %vm1193_vm0, %v6526_v17  ;;  %6360 = vmatprep.subr.msk.mxu1 %vm1195_vm1, %v6526_v17  ;;  %vm1065_vm0 = vcmp.eq.s32.totalorder %v6862_v33, %v9143_v4  ;;  %vm1067_vm1 = vcmp.eq.s32.totalorder %v6862_v33, %v9147_v11 }
 0x1b5   :  { %6297 = vmatpush2.msk.msra.mxu0 %vm1192_vm2, %v6526_v17  ;;  %6361 = vmatpush2.msk.msra.mxu1 %vm1194_vm3, %v6526_v17  ;;  %vm1064_vm2 = vcmp.eq.s32.totalorder %v6862_v33, %v9155_v12  ;;  %vm1066_vm3 = vcmp.eq.s32.totalorder %v6862_v33, %v9159_v13 }
 0x1b6   :  { %6298 = vmatprep.subr.msk.mxu0 %vm1161_vm4, %v6526_v17  ;;  %6362 = vmatprep.subr.msk.mxu1 %vm1163_vm5, %v6526_v17  ;;  %vm1033_vm4 = vcmp.eq.s32.totalorder %v6877_v34, %v9143_v4  ;;  %vm1035_vm5 = vcmp.eq.s32.totalorder %v6877_v34, %v9147_v11 }
 0x1b7   :  { %6299 = vmatpush2.msk.msra.mxu0 %vm1160_vm6, %v6526_v17  ;;  %6363 = vmatpush2.msk.msra.mxu1 %vm1162_vm7, %v6526_v17  ;;  %vm1032_vm6 = vcmp.eq.s32.totalorder %v6877_v34, %v9155_v12  ;;  %vm1034_vm7 = vcmp.eq.s32.totalorder %v6877_v34, %v9159_v13 }
 0x1b8   :  { %6300 = vmatprep.subr.msk.mxu0 %vm1129_vm8, %v6526_v17  ;;  %6364 = vmatprep.subr.msk.mxu1 %vm1131_vm9, %v6526_v17  ;;  %vm1001_vm8 = vcmp.eq.s32.totalorder %v6892_v35, %v9143_v4  ;;  %vm1003_vm9 = vcmp.eq.s32.totalorder %v6892_v35, %v9147_v11 }
 0x1b9   :  { %6301 = vmatpush2.msk.msra.mxu0 %vm1128_vm10, %v6526_v17  ;;  %6365 = vmatpush2.msk.msra.mxu1 %vm1130_vm11, %v6526_v17  ;;  %vm1000_vm10 = vcmp.eq.s32.totalorder %v6892_v35, %v9155_v12  ;;  %vm1002_vm11 = vcmp.eq.s32.totalorder %v6892_v35, %v9159_v13 }
 0x1ba   :  { %6302 = vmatprep.subr.msk.mxu0 %vm1097_vm12, %v6526_v17  ;;  %6366 = vmatprep.subr.msk.mxu1 %vm1099_vm13, %v6526_v17  ;;  %vm969_vm12 = vcmp.eq.s32.totalorder %v6907_v36, %v9143_v4  ;;  %vm971_vm13 = vcmp.eq.s32.totalorder %v6907_v36, %v9147_v11 }
 0x1bb   :  { %6303 = vmatpush2.msk.msra.mxu0 %vm1096_vm14, %v6526_v17  ;;  %6367 = vmatpush2.msk.msra.mxu1 %vm1098_vm15, %v6526_v17  ;;  %vm968_vm14 = vcmp.eq.s32.totalorder %v6907_v36, %v9155_v12  ;;  %vm970_vm15 = vcmp.eq.s32.totalorder %v6907_v36, %v9159_v13 }
 0x1bc   :  { %6304 = vmatprep.subr.msk.mxu0 %vm1065_vm0, %v6526_v17  ;;  %6368 = vmatprep.subr.msk.mxu1 %vm1067_vm1, %v6526_v17  ;;  %vm937_vm0 = vcmp.eq.s32.totalorder %v6922_v37, %v9143_v4  ;;  %vm939_vm1 = vcmp.eq.s32.totalorder %v6922_v37, %v9147_v11 }
 0x1bd   :  { %6305 = vmatpush2.msk.msra.mxu0 %vm1064_vm2, %v6526_v17  ;;  %6369 = vmatpush2.msk.msra.mxu1 %vm1066_vm3, %v6526_v17  ;;  %vm936_vm2 = vcmp.eq.s32.totalorder %v6922_v37, %v9155_v12  ;;  %vm938_vm3 = vcmp.eq.s32.totalorder %v6922_v37, %v9159_v13 }
 0x1be   :  { %6306 = vmatprep.subr.msk.mxu0 %vm1033_vm4, %v6526_v17  ;;  %6370 = vmatprep.subr.msk.mxu1 %vm1035_vm5, %v6526_v17  ;;  %vm905_vm4 = vcmp.eq.s32.totalorder %v6937_v38, %v9143_v4  ;;  %vm907_vm5 = vcmp.eq.s32.totalorder %v6937_v38, %v9147_v11 }
 0x1bf   :  { %6307 = vmatpush2.msk.msra.mxu0 %vm1032_vm6, %v6526_v17  ;;  %6371 = vmatpush2.msk.msra.mxu1 %vm1034_vm7, %v6526_v17  ;;  %vm904_vm6 = vcmp.eq.s32.totalorder %v6937_v38, %v9155_v12  ;;  %vm906_vm7 = vcmp.eq.s32.totalorder %v6937_v38, %v9159_v13 }
 0x1c0   :  { %6308 = vmatprep.subr.msk.mxu0 %vm1001_vm8, %v6526_v17  ;;  %6372 = vmatprep.subr.msk.mxu1 %vm1003_vm9, %v6526_v17  ;;  %vm873_vm8 = vcmp.eq.s32.totalorder %v6952_v39, %v9143_v4  ;;  %vm875_vm9 = vcmp.eq.s32.totalorder %v6952_v39, %v9147_v11 }
 0x1c1   :  { %6309 = vmatpush2.msk.msra.mxu0 %vm1000_vm10, %v6526_v17  ;;  %6373 = vmatpush2.msk.msra.mxu1 %vm1002_vm11, %v6526_v17  ;;  %vm872_vm10 = vcmp.eq.s32.totalorder %v6952_v39, %v9155_v12  ;;  %vm874_vm11 = vcmp.eq.s32.totalorder %v6952_v39, %v9159_v13 }
 0x1c2   :  { %6310 = vmatprep.subr.msk.mxu0 %vm969_vm12, %v6526_v17  ;;  %6374 = vmatprep.subr.msk.mxu1 %vm971_vm13, %v6526_v17  ;;  %vm841_vm12 = vcmp.eq.s32.totalorder %v6967_v40, %v9143_v4  ;;  %vm843_vm13 = vcmp.eq.s32.totalorder %v6967_v40, %v9147_v11 }
 0x1c3   :  { %6311 = vmatpush2.msk.msra.mxu0 %vm968_vm14, %v6526_v17  ;;  %6375 = vmatpush2.msk.msra.mxu1 %vm970_vm15, %v6526_v17  ;;  %vm840_vm14 = vcmp.eq.s32.totalorder %v6967_v40, %v9155_v12  ;;  %vm842_vm15 = vcmp.eq.s32.totalorder %v6967_v40, %v9159_v13 }
 0x1c4   :  { %6312 = vmatprep.subr.msk.mxu0 %vm937_vm0, %v6526_v17  ;;  %6376 = vmatprep.subr.msk.mxu1 %vm939_vm1, %v6526_v17  ;;  %vm809_vm0 = vcmp.eq.s32.totalorder %v6982_v41, %v9143_v4  ;;  %vm811_vm1 = vcmp.eq.s32.totalorder %v6982_v41, %v9147_v11 }
 0x1c5   :  { %6313 = vmatpush2.msk.msra.mxu0 %vm936_vm2, %v6526_v17  ;;  %6377 = vmatpush2.msk.msra.mxu1 %vm938_vm3, %v6526_v17  ;;  %vm808_vm2 = vcmp.eq.s32.totalorder %v6982_v41, %v9155_v12  ;;  %vm810_vm3 = vcmp.eq.s32.totalorder %v6982_v41, %v9159_v13 }
 0x1c6   :  { %6314 = vmatprep.subr.msk.mxu0 %vm905_vm4, %v6526_v17  ;;  %6378 = vmatprep.subr.msk.mxu1 %vm907_vm5, %v6526_v17  ;;  %vm777_vm4 = vcmp.eq.s32.totalorder %v6997_v42, %v9143_v4  ;;  %vm779_vm5 = vcmp.eq.s32.totalorder %v6997_v42, %v9147_v11 }
 0x1c7   :  { %6315 = vmatpush2.msk.msra.mxu0 %vm904_vm6, %v6526_v17  ;;  %6379 = vmatpush2.msk.msra.mxu1 %vm906_vm7, %v6526_v17  ;;  %vm776_vm6 = vcmp.eq.s32.totalorder %v6997_v42, %v9155_v12  ;;  %vm778_vm7 = vcmp.eq.s32.totalorder %v6997_v42, %v9159_v13 }
 0x1c8   :  { %6316 = vmatprep.subr.msk.mxu0 %vm873_vm8, %v6526_v17  ;;  %6380 = vmatprep.subr.msk.mxu1 %vm875_vm9, %v6526_v17  ;;  %vm745_vm8 = vcmp.eq.s32.totalorder %v7006_v43, %v9143_v4  ;;  %vm747_vm9 = vcmp.eq.s32.totalorder %v7006_v43, %v9147_v11 }
 0x1c9   :  { %6317 = vmatpush2.msk.msra.mxu0 %vm872_vm10, %v6526_v17  ;;  %6381 = vmatpush2.msk.msra.mxu1 %vm874_vm11, %v6526_v17  ;;  %vm744_vm10 = vcmp.eq.s32.totalorder %v7006_v43, %v9155_v12  ;;  %vm746_vm11 = vcmp.eq.s32.totalorder %v7006_v43, %v9159_v13 }
 0x1ca   :  { %6318 = vmatprep.subr.msk.mxu0 %vm841_vm12, %v6526_v17  ;;  %6382 = vmatprep.subr.msk.mxu1 %vm843_vm13, %v6526_v17  ;;  %vm713_vm12 = vcmp.eq.s32.totalorder %v7015_v44, %v9143_v4  ;;  %vm715_vm13 = vcmp.eq.s32.totalorder %v7015_v44, %v9147_v11 }
 0x1cb   :  { %6319 = vmatpush2.msk.msra.mxu0 %vm840_vm14, %v6526_v17  ;;  %6383 = vmatpush2.msk.msra.mxu1 %vm842_vm15, %v6526_v17  ;;  %vm712_vm14 = vcmp.eq.s32.totalorder %v7015_v44, %v9155_v12  ;;  %vm714_vm15 = vcmp.eq.s32.totalorder %v7015_v44, %v9159_v13 }
 0x1cc   :  { %6320 = vmatprep.subr.msk.mxu0 %vm809_vm0, %v6526_v17  ;;  %6384 = vmatprep.subr.msk.mxu1 %vm811_vm1, %v6526_v17  ;;  %vm685_vm0 = vcmp.eq.s32.totalorder %v6559_v5, %v9564_v51  ;;  %vm687_vm1 = vcmp.eq.s32.totalorder %v6559_v5, %v9568_v52 }
 0x1cd   :  { %6321 = vmatpush2.msk.msra.mxu0 %vm808_vm2, %v6526_v17  ;;  %6385 = vmatpush2.msk.msra.mxu1 %vm810_vm3, %v6526_v17  ;;  %vm684_vm2 = vcmp.eq.s32.totalorder %v6559_v5, %v9576_v53  ;;  %vm686_vm3 = vcmp.eq.s32.totalorder %v6559_v5, %v9580_v54 }
 0x1ce   :  { %6322 = vmatprep.subr.msk.mxu0 %vm777_vm4, %v6526_v17  ;;  %6386 = vmatprep.subr.msk.mxu1 %vm779_vm5, %v6526_v17  ;;  %vm653_vm4 = vcmp.eq.s32.totalorder %v6576_v10, %v9564_v51  ;;  %vm655_vm5 = vcmp.eq.s32.totalorder %v6576_v10, %v9568_v52 }
 0x1cf   :  { %6323 = vmatpush2.msk.msra.mxu0 %vm776_vm6, %v6526_v17  ;;  %6387 = vmatpush2.msk.msra.mxu1 %vm778_vm7, %v6526_v17  ;;  %v3744_v49 = vpop.f32.mrf.mxu0  ;;  %v3815_v50 = vpop.f32.mrf.mxu1  ;;  %vm652_vm6 = vcmp.eq.s32.totalorder %v6576_v10, %v9576_v53  ;;  %vm654_vm7 = vcmp.eq.s32.totalorder %v6576_v10, %v9580_v54 }
 0x1d0   :  { %6324 = vmatprep.subr.msk.mxu0 %vm745_vm8, %v6526_v17  ;;  %6388 = vmatprep.subr.msk.mxu1 %vm747_vm9, %v6526_v17  ;;  %vm621_vm8 = vcmp.eq.s32.totalorder %v6591_v14, %v9564_v51  ;;  %vm623_vm9 = vcmp.eq.s32.totalorder %v6591_v14, %v9568_v52 }
 0x1d1   :  { %6325 = vmatpush2.msk.msra.mxu0 %vm744_vm10, %v6526_v17  ;;  %6389 = vmatpush2.msk.msra.mxu1 %vm746_vm11, %v6526_v17  ;;  %v3746_v45 = vpop.f32.mrf.mxu0  ;;  %v3817_v46 = vpop.f32.mrf.mxu1  ;;  %vm620_vm10 = vcmp.eq.s32.totalorder %v6591_v14, %v9576_v53  ;;  %vm622_vm11 = vcmp.eq.s32.totalorder %v6591_v14, %v9580_v54 }
 0x1d2   :  { %6326 = vmatprep.subr.msk.mxu0 %vm713_vm12, %v6526_v17  ;;  %6390 = vmatprep.subr.msk.mxu1 %vm715_vm13, %v6526_v17  ;;  %v4426_v47 = vcombine.low %v3744_v49, %v3746_v45  ;;  %v4427_v48 = vcombine.low %v3815_v50, %v3817_v46  ;;  %vm589_vm12 = vcmp.eq.s32.totalorder %v6598_v16, %v9564_v51 }
 0x1d3   :  { %6327 = vmatpush2.msk.msra.mxu0 %vm712_vm14, %v6526_v17  ;;  %4168 = vmatprep.mubr.f32.mxu0 %v6551_v3  ;;  %vm591_vm13 = vcmp.eq.s32.totalorder %v6598_v16, %v9568_v52  ;;  %vm588_vm14 = vcmp.eq.s32.totalorder %v6598_v16, %v9576_v53 }
 0x1d4   :  { %6391 = vmatpush2.msk.msra.mxu1 %vm714_vm15, %v6526_v17  ;;  %4239 = vmatprep.mubr.f32.mxu1 %v6551_v3  ;;  %4458 = vst [vmem:[%s10021_s2 + $0x30] sm:$0xff] %v4426_v47  ;;  %4459 = vst [vmem:[%s10021_s2 + $0x38] sm:$0xff] %v4427_v48  ;;  %vm590_vm15 = vcmp.eq.s32.totalorder %v6598_v16, %v9580_v54 }
 0x1d5   :  { %4169 = vmatmul.mubr.f32.vlgmr.msra.gmra.mxu0 %v9194_v15  ;;  %4240 = vmatmul.mubr.f32.vlgmr.msra.gmra.mxu1 %v9194_v15 }
 0x1d6   :  { %6392 = vmatprep.subr.msk.mxu0 %vm685_vm0, %v6526_v17  ;;  %6456 = vmatprep.subr.msk.mxu1 %vm687_vm1, %v6526_v17  ;;  %vm557_vm0 = vcmp.eq.s32.totalorder %v6625_v18, %v9564_v51  ;;  %vm559_vm1 = vcmp.eq.s32.totalorder %v6625_v18, %v9568_v52 }
 0x1d7   :  { %6393 = vmatpush1.msk.msra.mxu0 %vm684_vm2, %v6526_v17  ;;  %6457 = vmatpush1.msk.msra.mxu1 %vm686_vm3, %v6526_v17  ;;  %vm556_vm2 = vcmp.eq.s32.totalorder %v6625_v18, %v9576_v53  ;;  %vm558_vm3 = vcmp.eq.s32.totalorder %v6625_v18, %v9580_v54 }
 0x1d8   :  { %6394 = vmatprep.subr.msk.mxu0 %vm653_vm4, %v6526_v17  ;;  %6458 = vmatprep.subr.msk.mxu1 %vm655_vm5, %v6526_v17  ;;  %vm525_vm4 = vcmp.eq.s32.totalorder %v6640_v19, %v9564_v51  ;;  %vm527_vm5 = vcmp.eq.s32.totalorder %v6640_v19, %v9568_v52 }
 0x1d9   :  { %6395 = vmatpush1.msk.msra.mxu0 %vm652_vm6, %v6526_v17  ;;  %6459 = vmatpush1.msk.msra.mxu1 %vm654_vm7, %v6526_v17  ;;  %vm524_vm6 = vcmp.eq.s32.totalorder %v6640_v19, %v9576_v53  ;;  %vm526_vm7 = vcmp.eq.s32.totalorder %v6640_v19, %v9580_v54  ;;  %v6525_v19 = vld [vmem:[%s10020_s0] sm:$0xff] }
 0x1da   :  { %6396 = vmatprep.subr.msk.mxu0 %vm621_vm8, %v6526_v17  ;;  %6460 = vmatprep.subr.msk.mxu1 %vm623_vm9, %v6526_v17  ;;  %vm493_vm8 = vcmp.eq.s32.totalorder %v6655_v20, %v9564_v51  ;;  %vm495_vm9 = vcmp.eq.s32.totalorder %v6655_v20, %v9568_v52 }
 0x1db   :  { %6397 = vmatpush1.msk.msra.mxu0 %vm620_vm10, %v6526_v17  ;;  %6461 = vmatpush1.msk.msra.mxu1 %vm622_vm11, %v6526_v17  ;;  %vm492_vm10 = vcmp.eq.s32.totalorder %v6655_v20, %v9576_v53  ;;  %vm494_vm11 = vcmp.eq.s32.totalorder %v6655_v20, %v9580_v54 }
 0x1dc   :  { %6398 = vmatprep.subr.msk.mxu0 %vm589_vm12, %v6526_v17  ;;  %6462 = vmatprep.subr.msk.mxu1 %vm591_vm13, %v6526_v17  ;;  %vm461_vm12 = vcmp.eq.s32.totalorder %v6670_v21, %v9564_v51  ;;  %vm463_vm13 = vcmp.eq.s32.totalorder %v6670_v21, %v9568_v52 }
 0x1dd   :  { %6399 = vmatpush1.msk.msra.mxu0 %vm588_vm14, %v6526_v17  ;;  %6463 = vmatpush1.msk.msra.mxu1 %vm590_vm15, %v6526_v17  ;;  %vm460_vm14 = vcmp.eq.s32.totalorder %v6670_v21, %v9576_v53  ;;  %vm462_vm15 = vcmp.eq.s32.totalorder %v6670_v21, %v9580_v54 }
 0x1de   :  { %6400 = vmatprep.subr.msk.mxu0 %vm557_vm0, %v6526_v17  ;;  %6464 = vmatprep.subr.msk.mxu1 %vm559_vm1, %v6526_v17  ;;  %vm429_vm0 = vcmp.eq.s32.totalorder %v6685_v22, %v9564_v51  ;;  %vm431_vm1 = vcmp.eq.s32.totalorder %v6685_v22, %v9568_v52 }
 0x1df   :  { %6401 = vmatpush1.msk.msra.mxu0 %vm556_vm2, %v6526_v17  ;;  %6465 = vmatpush1.msk.msra.mxu1 %vm558_vm3, %v6526_v17  ;;  %vm428_vm2 = vcmp.eq.s32.totalorder %v6685_v22, %v9576_v53  ;;  %vm430_vm3 = vcmp.eq.s32.totalorder %v6685_v22, %v9580_v54 }
 0x1e0   :  { %6402 = vmatprep.subr.msk.mxu0 %vm525_vm4, %v6526_v17  ;;  %6466 = vmatprep.subr.msk.mxu1 %vm527_vm5, %v6526_v17  ;;  %vm397_vm4 = vcmp.eq.s32.totalorder %v6700_v23, %v9564_v51  ;;  %vm399_vm5 = vcmp.eq.s32.totalorder %v6700_v23, %v9568_v52 }
 0x1e1   :  { %6403 = vmatpush1.msk.msra.mxu0 %vm524_vm6, %v6526_v17  ;;  %6467 = vmatpush1.msk.msra.mxu1 %vm526_vm7, %v6526_v17  ;;  %vm396_vm6 = vcmp.eq.s32.totalorder %v6700_v23, %v9576_v53  ;;  %vm398_vm7 = vcmp.eq.s32.totalorder %v6700_v23, %v9580_v54 }
 0x1e2   :  { %6404 = vmatprep.subr.msk.mxu0 %vm493_vm8, %v6526_v17  ;;  %6468 = vmatprep.subr.msk.mxu1 %vm495_vm9, %v6526_v17  ;;  %vm365_vm8 = vcmp.eq.s32.totalorder %v6715_v24, %v9564_v51  ;;  %vm367_vm9 = vcmp.eq.s32.totalorder %v6715_v24, %v9568_v52 }
 0x1e3   :  { %6405 = vmatpush1.msk.msra.mxu0 %vm492_vm10, %v6526_v17  ;;  %6469 = vmatpush1.msk.msra.mxu1 %vm494_vm11, %v6526_v17  ;;  %vm364_vm10 = vcmp.eq.s32.totalorder %v6715_v24, %v9576_v53  ;;  %vm366_vm11 = vcmp.eq.s32.totalorder %v6715_v24, %v9580_v54 }
 0x1e4   :  { %6406 = vmatprep.subr.msk.mxu0 %vm461_vm12, %v6526_v17  ;;  %6470 = vmatprep.subr.msk.mxu1 %vm463_vm13, %v6526_v17  ;;  %vm333_vm12 = vcmp.eq.s32.totalorder %v6730_v25, %v9564_v51  ;;  %vm335_vm13 = vcmp.eq.s32.totalorder %v6730_v25, %v9568_v52 }
 0x1e5   :  { %6407 = vmatpush1.msk.msra.mxu0 %vm460_vm14, %v6526_v17  ;;  %6471 = vmatpush1.msk.msra.mxu1 %vm462_vm15, %v6526_v17  ;;  %vm332_vm14 = vcmp.eq.s32.totalorder %v6730_v25, %v9576_v53  ;;  %vm334_vm15 = vcmp.eq.s32.totalorder %v6730_v25, %v9580_v54 }
 0x1e6   :  { %6408 = vmatprep.subr.msk.mxu0 %vm429_vm0, %v6526_v17  ;;  %6472 = vmatprep.subr.msk.mxu1 %vm431_vm1, %v6526_v17  ;;  %vm301_vm0 = vcmp.eq.s32.totalorder %v6745_v26, %v9564_v51  ;;  %vm303_vm1 = vcmp.eq.s32.totalorder %v6745_v26, %v9568_v52 }
 0x1e7   :  { %6409 = vmatpush1.msk.msra.mxu0 %vm428_vm2, %v6526_v17  ;;  %6473 = vmatpush1.msk.msra.mxu1 %vm430_vm3, %v6526_v17  ;;  %vm300_vm2 = vcmp.eq.s32.totalorder %v6745_v26, %v9576_v53  ;;  %vm302_vm3 = vcmp.eq.s32.totalorder %v6745_v26, %v9580_v54 }
 0x1e8   :  { %6410 = vmatprep.subr.msk.mxu0 %vm397_vm4, %v6526_v17  ;;  %6474 = vmatprep.subr.msk.mxu1 %vm399_vm5, %v6526_v17  ;;  %vm269_vm4 = vcmp.eq.s32.totalorder %v6760_v27, %v9564_v51  ;;  %vm271_vm5 = vcmp.eq.s32.totalorder %v6760_v27, %v9568_v52 }
 0x1e9   :  { %6411 = vmatpush1.msk.msra.mxu0 %vm396_vm6, %v6526_v17  ;;  %6475 = vmatpush1.msk.msra.mxu1 %vm398_vm7, %v6526_v17  ;;  %vm268_vm6 = vcmp.eq.s32.totalorder %v6760_v27, %v9576_v53  ;;  %vm270_vm7 = vcmp.eq.s32.totalorder %v6760_v27, %v9580_v54 }
 0x1ea   :  { %6412 = vmatprep.subr.msk.mxu0 %vm365_vm8, %v6526_v17  ;;  %6476 = vmatprep.subr.msk.mxu1 %vm367_vm9, %v6526_v17  ;;  %vm237_vm8 = vcmp.eq.s32.totalorder %v6775_v28, %v9564_v51  ;;  %vm239_vm9 = vcmp.eq.s32.totalorder %v6775_v28, %v9568_v52 }
 0x1eb   :  { %6413 = vmatpush1.msk.msra.mxu0 %vm364_vm10, %v6526_v17  ;;  %6477 = vmatpush1.msk.msra.mxu1 %vm366_vm11, %v6526_v17  ;;  %vm236_vm10 = vcmp.eq.s32.totalorder %v6775_v28, %v9576_v53  ;;  %vm238_vm11 = vcmp.eq.s32.totalorder %v6775_v28, %v9580_v54 }
 0x1ec   :  { %6414 = vmatprep.subr.msk.mxu0 %vm333_vm12, %v6526_v17  ;;  %6478 = vmatprep.subr.msk.mxu1 %vm335_vm13, %v6526_v17  ;;  %vm205_vm12 = vcmp.eq.s32.totalorder %v6547_v2, %v9564_v51  ;;  %vm207_vm13 = vcmp.eq.s32.totalorder %v6547_v2, %v9568_v52 }
 0x1ed   :  { %6415 = vmatpush1.msk.msra.mxu0 %vm332_vm14, %v6526_v17  ;;  %6479 = vmatpush1.msk.msra.mxu1 %vm334_vm15, %v6526_v17  ;;  %vm204_vm14 = vcmp.eq.s32.totalorder %v6547_v2, %v9576_v53  ;;  %vm206_vm15 = vcmp.eq.s32.totalorder %v6547_v2, %v9580_v54 }
 0x1ee   :  { %6416 = vmatprep.subr.msk.mxu0 %vm301_vm0, %v6526_v17  ;;  %6480 = vmatprep.subr.msk.mxu1 %vm303_vm1, %v6526_v17  ;;  %vm1197_vm0 = vcmp.eq.s32.totalorder %v6802_v29, %v9564_v51  ;;  %vm1199_vm1 = vcmp.eq.s32.totalorder %v6802_v29, %v9568_v52 }
 0x1ef   :  { %6417 = vmatpush1.msk.msra.mxu0 %vm300_vm2, %v6526_v17  ;;  %6481 = vmatpush1.msk.msra.mxu1 %vm302_vm3, %v6526_v17  ;;  %vm1196_vm2 = vcmp.eq.s32.totalorder %v6802_v29, %v9576_v53  ;;  %vm1198_vm3 = vcmp.eq.s32.totalorder %v6802_v29, %v9580_v54 }
 0x1f0   :  { %6418 = vmatprep.subr.msk.mxu0 %vm269_vm4, %v6526_v17  ;;  %6482 = vmatprep.subr.msk.mxu1 %vm271_vm5, %v6526_v17  ;;  %vm1165_vm4 = vcmp.eq.s32.totalorder %v6817_v30, %v9564_v51  ;;  %vm1167_vm5 = vcmp.eq.s32.totalorder %v6817_v30, %v9568_v52 }
 0x1f1   :  { %6419 = vmatpush1.msk.msra.mxu0 %vm268_vm6, %v6526_v17  ;;  %6483 = vmatpush1.msk.msra.mxu1 %vm270_vm7, %v6526_v17  ;;  %vm1164_vm6 = vcmp.eq.s32.totalorder %v6817_v30, %v9576_v53  ;;  %vm1166_vm7 = vcmp.eq.s32.totalorder %v6817_v30, %v9580_v54 }
 0x1f2   :  { %6420 = vmatprep.subr.msk.mxu0 %vm237_vm8, %v6526_v17  ;;  %6484 = vmatprep.subr.msk.mxu1 %vm239_vm9, %v6526_v17  ;;  %vm1133_vm8 = vcmp.eq.s32.totalorder %v6832_v31, %v9564_v51  ;;  %vm1135_vm9 = vcmp.eq.s32.totalorder %v6832_v31, %v9568_v52 }
 0x1f3   :  { %6421 = vmatpush1.msk.msra.mxu0 %vm236_vm10, %v6526_v17  ;;  %6485 = vmatpush1.msk.msra.mxu1 %vm238_vm11, %v6526_v17  ;;  %vm1132_vm10 = vcmp.eq.s32.totalorder %v6832_v31, %v9576_v53  ;;  %vm1134_vm11 = vcmp.eq.s32.totalorder %v6832_v31, %v9580_v54 }
 0x1f4   :  { %6422 = vmatprep.subr.msk.mxu0 %vm205_vm12, %v6526_v17  ;;  %6486 = vmatprep.subr.msk.mxu1 %vm207_vm13, %v6526_v17  ;;  %vm1101_vm12 = vcmp.eq.s32.totalorder %v6847_v32, %v9564_v51  ;;  %vm1103_vm13 = vcmp.eq.s32.totalorder %v6847_v32, %v9568_v52 }
 0x1f5   :  { %6423 = vmatpush1.msk.msra.mxu0 %vm204_vm14, %v6526_v17  ;;  %6487 = vmatpush1.msk.msra.mxu1 %vm206_vm15, %v6526_v17  ;;  %vm1100_vm14 = vcmp.eq.s32.totalorder %v6847_v32, %v9576_v53  ;;  %vm1102_vm15 = vcmp.eq.s32.totalorder %v6847_v32, %v9580_v54 }
 0x1f6   :  { %6424 = vmatprep.subr.msk.mxu0 %vm1197_vm0, %v6526_v17  ;;  %6488 = vmatprep.subr.msk.mxu1 %vm1199_vm1, %v6526_v17  ;;  %vm1069_vm0 = vcmp.eq.s32.totalorder %v6862_v33, %v9564_v51  ;;  %vm1071_vm1 = vcmp.eq.s32.totalorder %v6862_v33, %v9568_v52 }
 0x1f7   :  { %6425 = vmatpush2.msk.msra.mxu0 %vm1196_vm2, %v6526_v17  ;;  %6489 = vmatpush2.msk.msra.mxu1 %vm1198_vm3, %v6526_v17  ;;  %vm1068_vm2 = vcmp.eq.s32.totalorder %v6862_v33, %v9576_v53  ;;  %vm1070_vm3 = vcmp.eq.s32.totalorder %v6862_v33, %v9580_v54 }
 0x1f8   :  { %6426 = vmatprep.subr.msk.mxu0 %vm1165_vm4, %v6526_v17  ;;  %6490 = vmatprep.subr.msk.mxu1 %vm1167_vm5, %v6526_v17  ;;  %vm1037_vm4 = vcmp.eq.s32.totalorder %v6877_v34, %v9564_v51  ;;  %vm1039_vm5 = vcmp.eq.s32.totalorder %v6877_v34, %v9568_v52 }
 0x1f9   :  { %6427 = vmatpush2.msk.msra.mxu0 %vm1164_vm6, %v6526_v17  ;;  %6491 = vmatpush2.msk.msra.mxu1 %vm1166_vm7, %v6526_v17  ;;  %vm1036_vm6 = vcmp.eq.s32.totalorder %v6877_v34, %v9576_v53  ;;  %vm1038_vm7 = vcmp.eq.s32.totalorder %v6877_v34, %v9580_v54 }
 0x1fa   :  { %6428 = vmatprep.subr.msk.mxu0 %vm1133_vm8, %v6526_v17  ;;  %6492 = vmatprep.subr.msk.mxu1 %vm1135_vm9, %v6526_v17  ;;  %vm1005_vm8 = vcmp.eq.s32.totalorder %v6892_v35, %v9564_v51  ;;  %vm1007_vm9 = vcmp.eq.s32.totalorder %v6892_v35, %v9568_v52 }
 0x1fb   :  { %6429 = vmatpush2.msk.msra.mxu0 %vm1132_vm10, %v6526_v17  ;;  %6493 = vmatpush2.msk.msra.mxu1 %vm1134_vm11, %v6526_v17  ;;  %vm1004_vm10 = vcmp.eq.s32.totalorder %v6892_v35, %v9576_v53  ;;  %vm1006_vm11 = vcmp.eq.s32.totalorder %v6892_v35, %v9580_v54 }
 0x1fc   :  { %6430 = vmatprep.subr.msk.mxu0 %vm1101_vm12, %v6526_v17  ;;  %6494 = vmatprep.subr.msk.mxu1 %vm1103_vm13, %v6526_v17  ;;  %vm973_vm12 = vcmp.eq.s32.totalorder %v6907_v36, %v9564_v51  ;;  %vm975_vm13 = vcmp.eq.s32.totalorder %v6907_v36, %v9568_v52 }
 0x1fd   :  { %6431 = vmatpush2.msk.msra.mxu0 %vm1100_vm14, %v6526_v17  ;;  %6495 = vmatpush2.msk.msra.mxu1 %vm1102_vm15, %v6526_v17  ;;  %vm972_vm14 = vcmp.eq.s32.totalorder %v6907_v36, %v9576_v53  ;;  %vm974_vm15 = vcmp.eq.s32.totalorder %v6907_v36, %v9580_v54 }
 0x1fe   :  { %6432 = vmatprep.subr.msk.mxu0 %vm1069_vm0, %v6526_v17  ;;  %6496 = vmatprep.subr.msk.mxu1 %vm1071_vm1, %v6526_v17  ;;  %vm941_vm0 = vcmp.eq.s32.totalorder %v6922_v37, %v9564_v51  ;;  %vm943_vm1 = vcmp.eq.s32.totalorder %v6922_v37, %v9568_v52 }
 0x1ff   :  { %6433 = vmatpush2.msk.msra.mxu0 %vm1068_vm2, %v6526_v17  ;;  %6497 = vmatpush2.msk.msra.mxu1 %vm1070_vm3, %v6526_v17  ;;  %vm940_vm2 = vcmp.eq.s32.totalorder %v6922_v37, %v9576_v53  ;;  %vm942_vm3 = vcmp.eq.s32.totalorder %v6922_v37, %v9580_v54 }
 0x200   :  { %6434 = vmatprep.subr.msk.mxu0 %vm1037_vm4, %v6526_v17  ;;  %6498 = vmatprep.subr.msk.mxu1 %vm1039_vm5, %v6526_v17  ;;  %vm909_vm4 = vcmp.eq.s32.totalorder %v6937_v38, %v9564_v51  ;;  %vm911_vm5 = vcmp.eq.s32.totalorder %v6937_v38, %v9568_v52 }
 0x201   :  { %6435 = vmatpush2.msk.msra.mxu0 %vm1036_vm6, %v6526_v17  ;;  %6499 = vmatpush2.msk.msra.mxu1 %vm1038_vm7, %v6526_v17  ;;  %vm908_vm6 = vcmp.eq.s32.totalorder %v6937_v38, %v9576_v53  ;;  %vm910_vm7 = vcmp.eq.s32.totalorder %v6937_v38, %v9580_v54 }
 0x202   :  { %6436 = vmatprep.subr.msk.mxu0 %vm1005_vm8, %v6526_v17  ;;  %6500 = vmatprep.subr.msk.mxu1 %vm1007_vm9, %v6526_v17  ;;  %vm877_vm8 = vcmp.eq.s32.totalorder %v6952_v39, %v9564_v51  ;;  %vm879_vm9 = vcmp.eq.s32.totalorder %v6952_v39, %v9568_v52 }
 0x203   :  { %6437 = vmatpush2.msk.msra.mxu0 %vm1004_vm10, %v6526_v17  ;;  %6501 = vmatpush2.msk.msra.mxu1 %vm1006_vm11, %v6526_v17  ;;  %vm876_vm10 = vcmp.eq.s32.totalorder %v6952_v39, %v9576_v53  ;;  %vm878_vm11 = vcmp.eq.s32.totalorder %v6952_v39, %v9580_v54 }
 0x204   :  { %6438 = vmatprep.subr.msk.mxu0 %vm973_vm12, %v6526_v17  ;;  %6502 = vmatprep.subr.msk.mxu1 %vm975_vm13, %v6526_v17  ;;  %vm845_vm12 = vcmp.eq.s32.totalorder %v6967_v40, %v9564_v51  ;;  %vm847_vm13 = vcmp.eq.s32.totalorder %v6967_v40, %v9568_v52 }
 0x205   :  { %6439 = vmatpush2.msk.msra.mxu0 %vm972_vm14, %v6526_v17  ;;  %6503 = vmatpush2.msk.msra.mxu1 %vm974_vm15, %v6526_v17  ;;  %vm844_vm14 = vcmp.eq.s32.totalorder %v6967_v40, %v9576_v53  ;;  %vm846_vm15 = vcmp.eq.s32.totalorder %v6967_v40, %v9580_v54 }
 0x206   :  { %6440 = vmatprep.subr.msk.mxu0 %vm941_vm0, %v6526_v17  ;;  %6504 = vmatprep.subr.msk.mxu1 %vm943_vm1, %v6526_v17  ;;  %vm813_vm0 = vcmp.eq.s32.totalorder %v6982_v41, %v9564_v51  ;;  %vm815_vm1 = vcmp.eq.s32.totalorder %v6982_v41, %v9568_v52 }
 0x207   :  { %6441 = vmatpush2.msk.msra.mxu0 %vm940_vm2, %v6526_v17  ;;  %6505 = vmatpush2.msk.msra.mxu1 %vm942_vm3, %v6526_v17  ;;  %vm812_vm2 = vcmp.eq.s32.totalorder %v6982_v41, %v9576_v53  ;;  %vm814_vm3 = vcmp.eq.s32.totalorder %v6982_v41, %v9580_v54 }
 0x208   :  { %6442 = vmatprep.subr.msk.mxu0 %vm909_vm4, %v6526_v17  ;;  %6506 = vmatprep.subr.msk.mxu1 %vm911_vm5, %v6526_v17  ;;  %vm781_vm4 = vcmp.eq.s32.totalorder %v6997_v42, %v9564_v51  ;;  %vm783_vm5 = vcmp.eq.s32.totalorder %v6997_v42, %v9568_v52 }
 0x209   :  { %6443 = vmatpush2.msk.msra.mxu0 %vm908_vm6, %v6526_v17  ;;  %6507 = vmatpush2.msk.msra.mxu1 %vm910_vm7, %v6526_v17  ;;  %vm780_vm6 = vcmp.eq.s32.totalorder %v6997_v42, %v9576_v53  ;;  %vm782_vm7 = vcmp.eq.s32.totalorder %v6997_v42, %v9580_v54 }
 0x20a   :  { %6444 = vmatprep.subr.msk.mxu0 %vm877_vm8, %v6526_v17  ;;  %6508 = vmatprep.subr.msk.mxu1 %vm879_vm9, %v6526_v17  ;;  %vm749_vm8 = vcmp.eq.s32.totalorder %v7006_v43, %v9564_v51  ;;  %vm751_vm9 = vcmp.eq.s32.totalorder %v7006_v43, %v9568_v52 }
 0x20b   :  { %6445 = vmatpush2.msk.msra.mxu0 %vm876_vm10, %v6526_v17  ;;  %6509 = vmatpush2.msk.msra.mxu1 %vm878_vm11, %v6526_v17  ;;  %vm748_vm10 = vcmp.eq.s32.totalorder %v7006_v43, %v9576_v53  ;;  %vm750_vm11 = vcmp.eq.s32.totalorder %v7006_v43, %v9580_v54 }
 0x20c   :  { %6446 = vmatprep.subr.msk.mxu0 %vm845_vm12, %v6526_v17  ;;  %6510 = vmatprep.subr.msk.mxu1 %vm847_vm13, %v6526_v17  ;;  %vm717_vm12 = vcmp.eq.s32.totalorder %v7015_v44, %v9564_v51  ;;  %vm719_vm13 = vcmp.eq.s32.totalorder %v7015_v44, %v9568_v52 }
 0x20d   :  { %6447 = vmatpush2.msk.msra.mxu0 %vm844_vm14, %v6526_v17  ;;  %6511 = vmatpush2.msk.msra.mxu1 %vm846_vm15, %v6526_v17  ;;  %vm716_vm14 = vcmp.eq.s32.totalorder %v7015_v44, %v9576_v53  ;;  %vm718_vm15 = vcmp.eq.s32.totalorder %v7015_v44, %v9580_v54 }
 0x20e   :  { %6448 = vmatprep.subr.msk.mxu0 %vm813_vm0, %v6526_v17  ;;  %6512 = vmatprep.subr.msk.mxu1 %vm815_vm1, %v6526_v17 }
 0x20f   :  { %6449 = vmatpush2.msk.msra.mxu0 %vm812_vm2, %v6526_v17  ;;  %6513 = vmatpush2.msk.msra.mxu1 %vm814_vm3, %v6526_v17 }
 0x210   :  { %6450 = vmatprep.subr.msk.mxu0 %vm781_vm4, %v6526_v17  ;;  %6514 = vmatprep.subr.msk.mxu1 %vm783_vm5, %v6526_v17 }
 0x211   :  { %6451 = vmatpush2.msk.msra.mxu0 %vm780_vm6, %v6526_v17  ;;  %6515 = vmatpush2.msk.msra.mxu1 %vm782_vm7, %v6526_v17  ;;  %v3886_v2 = vpop.f32.mrf.mxu0  ;;  %v3957_v5 = vpop.f32.mrf.mxu1 }
 0x212   :  { %6452 = vmatprep.subr.msk.mxu0 %vm749_vm8, %v6526_v17  ;;  %6516 = vmatprep.subr.msk.mxu1 %vm751_vm9, %v6526_v17 }
 0x213   :  { %6453 = vmatpush2.msk.msra.mxu0 %vm748_vm10, %v6526_v17  ;;  %6517 = vmatpush2.msk.msra.mxu1 %vm750_vm11, %v6526_v17  ;;  %v3888_v10 = vpop.f32.mrf.mxu0  ;;  %v3959_v14 = vpop.f32.mrf.mxu1 }
 0x214   :  { %6454 = vmatprep.subr.msk.mxu0 %vm717_vm12, %v6526_v17  ;;  %6518 = vmatprep.subr.msk.mxu1 %vm719_vm13, %v6526_v17  ;;  %v4428_v16 = vcombine.low %v3886_v2, %v3888_v10  ;;  %v4429_v18 = vcombine.low %v3957_v5, %v3959_v14 }
 0x215   :  { %6455 = vmatpush2.msk.msra.mxu0 %vm716_vm14, %v6526_v17  ;;  %4310 = vmatprep.mubr.f32.mxu0 %v6551_v3 }
 0x216   :  { %6519 = vmatpush2.msk.msra.mxu1 %vm718_vm15, %v6526_v17  ;;  %4381 = vmatprep.mubr.f32.mxu1 %v6551_v3  ;;  %4460 = vst [vmem:[%s10021_s2 + $0x40] sm:$0xff] %v4428_v16  ;;  %4461 = vst [vmem:[%s10021_s2 + $0x48] sm:$0xff] %v4429_v18 }
 0x217   :  { %4311 = vmatmul.mubr.f32.vlgmr.msra.gmra.mxu0 %v6525_v19  ;;  %4382 = vmatmul.mubr.f32.vlgmr.msra.gmra.mxu1 %v6525_v19 }
 0x253   :  { %v4028_v20 = vpop.f32.mrf.mxu0  ;;  %v4099_v21 = vpop.f32.mrf.mxu1 }
 0x255   :  { %v4030_v22 = vpop.f32.mrf.mxu0  ;;  %v4101_v17 = vpop.f32.mrf.mxu1 }
 0x256   :  { %v4430_v23 = vcombine.low %v4028_v20, %v4030_v22  ;;  %v4431_v3 = vcombine.low %v4099_v21, %v4101_v17 }
 0x258   :  { %4462 = vst [vmem:[%s10021_s2 + $0x50] sm:$0xff] %v4430_v23  ;;  %4463 = vst [vmem:[%s10021_s2 + $0x58] sm:$0xff] %v4431_v3 }
 0x295   :  { %v4170_v24 = vpop.f32.mrf.mxu0  ;;  %v4241_v25 = vpop.f32.mrf.mxu1 }
 0x297   :  { %v4172_v26 = vpop.f32.mrf.mxu0  ;;  %v4243_v27 = vpop.f32.mrf.mxu1 }
 0x298   :  { %v4432_v28 = vcombine.low %v4170_v24, %v4172_v26  ;;  %v4433_v29 = vcombine.low %v4241_v25, %v4243_v27 }
 0x29a   :  { %4464 = vst [vmem:[%s10021_s2 + $0x60] sm:$0xff] %v4432_v28  ;;  %4465 = vst [vmem:[%s10021_s2 + $0x68] sm:$0xff] %v4433_v29 }
 0x2d7   :  { %v4312_v30 = vpop.f32.mrf.mxu0  ;;  %v4383_v31 = vpop.f32.mrf.mxu1 }
 0x2d9   :  { %v4314_v32 = vpop.f32.mrf.mxu0  ;;  %v4385_v33 = vpop.f32.mrf.mxu1 }
 0x2da   :  { %v4434_v34 = vcombine.low %v4312_v30, %v4314_v32  ;;  %v4435_v35 = vcombine.low %v4383_v31, %v4385_v33 }
 0x2dc   :  { %4466 = vst [vmem:[%s10021_s2 + $0x70] sm:$0xff] %v4434_v34  ;;  %4467 = vst [vmem:[%s10021_s2 + $0x78] sm:$0xff] %v4435_v35 }

</bundles_post_ra>
